<compile_context>
chip_gen: v6e
topology: v6e:2x2x1
jax: 0.10.0
libtpu: 0.0.40
codegen_flags: <defaults>
</compile_context>

<pallas_src>
import jax
import jax.numpy as jnp
from jax import lax
from jax.experimental import pallas as pl
from jax.experimental.pallas import tpu as pltpu

_SMOOTH = 1.0        # self.smooth (and the local smooth=1 in soft_dice)
_ALPHA = 0.5         # self.alpha
_ITERS = 3           # self.iter
_NUM_PARTIALS = 5


# ---------------------------------------------------------------------------
# Pallas kernel: per-batch partial sums over all foreground channels.
# ---------------------------------------------------------------------------
def _cldice_partials_kernel(y_pred_ref, y_true_ref, out_ref):
    C, H, W = y_pred_ref.shape     # batch dim squeezed by the BlockSpec

    # ---- border machinery (computed once per batch, loop-invariant) --------
    # Wrap masks are derived from rolled iotas so they are correct regardless
    # of the rotation-direction convention of the underlying tpu rotate op,
    # then reduced to rank-1 ((H,1) / (1,W)) so only ~H/8 + W/128 vregs of
    # long-lived state survive the skeleton loops.
    row = lax.broadcasted_iota(jnp.int32, (H, W), 0)
    col = lax.broadcasted_iota(jnp.int32, (H, W), 1)

    def _row_wrap(shift):          # 1.0 on rows whose rolled value wrapped
        m = jnp.abs(pltpu.roll(row, shift=shift, axis=0) - row) != 1
        return m.astype(jnp.float32)[:, :1]                      # (H, 1)

    def _col_wrap(shift):          # 1.0 on cols whose rolled value wrapped
        m = jnp.abs(pltpu.roll(col, shift=shift, axis=1) - col) != 1
        return m.astype(jnp.float32)[:1, :]                      # (1, W)

    wr_a, wr_b = _row_wrap(1), _row_wrap(H - 1)
    wc_a, wc_b = _col_wrap(1), _col_wrap(W - 1)
    kr_a, kr_b = 1.0 - wr_a, 1.0 - wr_b                          # "keep" masks
    kc_a, kc_b = 1.0 - wc_a, 1.0 - wc_b

    # All maps live in [0, 1] (binary), so:
    #   max(rolled, wrap) == rolled with border neighbors forced to 1.0 (+inf pad)
    #   min(rolled, keep) == rolled with border neighbors forced to 0.0 (-inf pad)
    def erode(x):   # min over the 3x1 and 1x3 crosses, borders ignored
        ra = jnp.maximum(pltpu.roll(x, shift=1, axis=0), wr_a)
        rb = jnp.maximum(pltpu.roll(x, shift=H - 1, axis=0), wr_b)
        ca = jnp.maximum(pltpu.roll(x, shift=1, axis=1), wc_a)
        cb = jnp.maximum(pltpu.roll(x, shift=W - 1, axis=1), wc_b)
        return jnp.minimum(
            jnp.minimum(jnp.minimum(ra, rb), jnp.minimum(ca, cb)), x)

    def dilate(x):  # separable 3x3 max-pool with -inf padding
        ra = jnp.minimum(pltpu.roll(x, shift=1, axis=0), kr_a)
        rb = jnp.minimum(pltpu.roll(x, shift=H - 1, axis=0), kr_b)
        r = jnp.maximum(jnp.maximum(ra, rb), x)
        ca = jnp.minimum(pltpu.roll(r, shift=1, axis=1), kc_a)
        cb = jnp.minimum(pltpu.roll(r, shift=W - 1, axis=1), kc_b)
        return jnp.maximum(jnp.maximum(ca, cb), r)

    # Chained-erode skeleton: 1 erode + 1 dilate per step (8 passes total).
    # Binary data: skel + relu(delta - skel*delta) == max(skel, delta).
    def soft_skel(img):
        e = erode(img)
        skel = jnp.maximum(img - dilate(e), 0.0)
        for _ in range(_ITERS):
            img = e
            e = erode(img)
            delta = jnp.maximum(img - dilate(e), 0.0)
            skel = jnp.maximum(skel, delta)
        return skel

    # Full-map reductions on the (idle) MXU: row-sum matmul + tiny sublane sum.
    ones_cols = jnp.ones((W, 128), jnp.float32)

    def total(m):
        rows = jnp.dot(m, ones_cols, preferred_element_type=jnp.float32)
        return jnp.sum(rows[:, :1])

    yt = y_true_ref[...].astype(jnp.float32)     # (H, W) ground truth (binary)
    skel_true = soft_skel(yt)                    # computed once per batch

    inter = jnp.float32(0.0)       # dice intersection     (fg channels only)
    sum_yp = jnp.float32(0.0)      # dice denominator term
    sum_sp_yt = jnp.float32(0.0)   # tprec numerator
    sum_sp = jnp.float32(0.0)      # tprec denominator
    sum_st_yp = jnp.float32(0.0)   # tsens numerator

    for c in range(1, C):          # channel 0 (background) is never computed
        yp = (y_pred_ref[c] > 0.5).astype(jnp.float32)
        skel_pred = soft_skel(yp)
        inter += total(yt * yp)
        sum_yp += total(yp)
        sum_sp_yt += total(skel_pred * yt)
        sum_sp += total(skel_pred)
        sum_st_yp += total(skel_true * yp)

    sums = (inter, sum_yp, sum_sp_yt, sum_sp, sum_st_yp)

    # Lane-dense (8, 128) output tile: partial-sum k lives in lane k.
    lane = lax.broadcasted_iota(jnp.int32, (8, 128), 1)
    tile = jnp.zeros((8, 128), jnp.float32)
    for k, s in enumerate(sums):
        tile = jnp.where(lane == k, s, tile)
    out_ref[...] = tile


# ---------------------------------------------------------------------------
# Wrapper: pallas_call + scalar epilogue in plain JAX.
# ---------------------------------------------------------------------------
def soft_dice_cldice_loss(y_pred, y_true):
    """Forward pass of soft_dice_cldice.

    y_pred: (B, C, H, W) raw predictions (any float dtype); y_true: (B, H, W)
    binary ground truth.  Returns the scalar loss (float32).
    """
    B, C, H, W = y_pred.shape
    if C < 2:
        raise ValueError("soft_dice_cldice needs at least 2 channels (bg + fg).")
    if H < 3 or W < 3:
        raise ValueError("spatial dims must be >= 3 (size-2 axes make the "
                         "wrap-mask derivation ambiguous).")
    if y_true.shape != (B, H, W):
        raise ValueError(f"y_true shape {y_true.shape} != {(B, H, W)}")

    # Per-program VMEM footprint: double-buffered input blocks + output tile
    # + ~16 live (H, W) f32 temporaries from the skeleton working set.
    # Capped at 48 MiB so the kernel fits v7x's 64 MiB core; v5e/v6e (128 MiB)
    # have extra headroom if larger blocks are ever adopted.
    hw = H * W
    footprint = (2 * (C * hw * jnp.dtype(y_pred.dtype).itemsize
                      + hw * jnp.dtype(y_true.dtype).itemsize)
                 + 2 * 8 * 128 * 4
                 + 16 * hw * 4)
    vmem_limit = int(min(48 * 1024 * 1024, max(8 * 1024 * 1024, 2 * footprint)))

    partials = pl.pallas_call(
        _cldice_partials_kernel,
        out_shape=jax.ShapeDtypeStruct((B, 8, 128), jnp.float32),
        grid=(B,),
        in_specs=[
            pl.BlockSpec((None, C, H, W), lambda b: (b, 0, 0, 0)),
            pl.BlockSpec((None, H, W), lambda b: (b, 0, 0)),
        ],
        out_specs=pl.BlockSpec((None, 8, 128), lambda b: (b, 0, 0)),
        compiler_params=pltpu.CompilerParams(
            # Single parallel batch axis: with B >= 2 the work splits evenly
            # across v7x's two TensorCores (no-op on single-TC v5e / v6e).
            dimension_semantics=("parallel",),
            vmem_limit_bytes=vmem_limit,
        ),
    )(y_pred, y_true)

    s = jnp.sum(partials[:, 0, :_NUM_PARTIALS], axis=0)    # (5,) f32
    intersection = s[0]
    sum_yp = s[1]
    sum_sp_yt = s[2]
    sum_sp = s[3]
    sum_st_yp = s[4]

    # soft_dice (local smooth = 1); sum(y_true[:, 1:]) == 0 because y_true has
    # a single channel after unsqueeze(1).
    dice = 1.0 - (2.0 * intersection + 1.0) / (sum_yp + 1.0)

    # clDice; sum(skel_true[:, 1:]) == 0 for the same reason (intentional
    # replication of the torch module's quirk).
    tprec = (sum_sp_yt + _SMOOTH) / (sum_sp + _SMOOTH)
    tsens = (sum_st_yp + _SMOOTH) / _SMOOTH
    cl_dice = 1.0 - 2.0 * (tprec * tsens) / (tprec + tsens)

    return (1.0 - _ALPHA) * dice + _ALPHA * cl_dice


# ---------------------------------------------------------------------------
# Pure-JAX reference (faithful port of the torch module, f32 instead of f64).
# ---------------------------------------------------------------------------
def _reference(y_pred, y_true):
    yp = (y_pred > 0.5).astype(jnp.float32)            # (B, C, H, W)
    yt = y_true.astype(jnp.float32)[:, None, :, :]      # (B, 1, H, W)

    def min_pool_h(x):
        pad = jnp.full_like(x[:, :, :1, :], jnp.inf)
        up = jnp.concatenate([x[:, :, 1:, :], pad], axis=2)
        dn = jnp.concatenate([pad, x[:, :, :-1, :]], axis=2)
        return jnp.minimum(jnp.minimum(up, x), dn)

    def min_pool_w(x):
        pad = jnp.full_like(x[:, :, :, :1], jnp.inf)
        lf = jnp.concatenate([x[:, :, :, 1:], pad], axis=3)
        rt = jnp.concatenate([pad, x[:, :, :, :-1]], axis=3)
        return jnp.minimum(jnp.minimum(lf, x), rt)

    def max_pool_h(x):
        pad = jnp.full_like(x[:, :, :1, :], -jnp.inf)
        up = jnp.concatenate([x[:, :, 1:, :], pad], axis=2)
        dn = jnp.concatenate([pad, x[:, :, :-1, :]], axis=2)
        return jnp.maximum(jnp.maximum(up, x), dn)

    def max_pool_w(x):
        pad = jnp.full_like(x[:, :, :, :1], -jnp.inf)
        lf = jnp.concatenate([x[:, :, :, 1:], pad], axis=3)
        rt = jnp.concatenate([pad, x[:, :, :, :-1]], axis=3)
        return jnp.maximum(jnp.maximum(lf, x), rt)

    def soft_erode(x):
        return jnp.minimum(min_pool_h(x), min_pool_w(x))

    def soft_dilate(x):
        return max_pool_w(max_pool_h(x))

    def soft_open(x):
        return soft_dilate(soft_erode(x))

    def soft_skel(img, iters):
        img1 = soft_open(img)
        skel = jax.nn.relu(img - img1)
        for _ in range(iters):
            img = soft_erode(img)
            img1 = soft_open(img)
            delta = jax.nn.relu(img - img1)
            skel = skel + jax.nn.relu(delta - skel * delta)
        return skel

    intersection = jnp.sum((yt * yp)[:, 1:])
    dice = 1.0 - (2.0 * intersection + 1.0) / (
        jnp.sum(yt[:, 1:]) + jnp.sum(yp[:, 1:]) + 1.0)

    skel_pred = soft_skel(yp, _ITERS)
    skel_true = soft_skel(yt, _ITERS)
    tprec = (jnp.sum((skel_pred * yt)[:, 1:]) + _SMOOTH) / (
        jnp.sum(skel_pred[:, 1:]) + _SMOOTH)
    tsens = (jnp.sum((skel_true * yp)[:, 1:]) + _SMOOTH) / (
        jnp.sum(skel_true[:, 1:]) + _SMOOTH)
    cl_dice = 1.0 - 2.0 * (tprec * tsens) / (tprec + tsens)
    return (1.0 - _ALPHA) * dice + _ALPHA * cl_dice


if __name__ == "__main__":
    key = jax.random.PRNGKey(0)
    k1, k2 = jax.random.split(key)
    # W = 128 keeps the lane dimension dense; B = 2 is even for v7x's two TCs.
    B, C, H, W = 2, 4, 16, 128
    y_pred = jax.random.uniform(k1, (B, C, H, W), dtype=jnp.float32)
    y_true = (jax.random.uniform(k2, (B, H, W), dtype=jnp.float32) > 0.5).astype(
        jnp.float32)

    loss = jax.jit(soft_dice_cldice_loss)(y_pred, y_true)
    loss = jax.block_until_ready(loss)

    ref = _reference(y_pred, y_true)
    assert jnp.isfinite(loss), loss
    assert abs(float(loss) - float(ref)) < 1e-5, (float(loss), float(ref))
    print("KERNEL_OK")
</pallas_src>

<mosaic_0001>
module attributes {stable_mosaic.version = 11 : i64} {
  func.func @_cldice_partials_kernel(%arg0: i32, %arg1: memref<1x4x16x128xf32, #tpu.memory_space<vmem>>, %arg2: memref<1x16x128xf32, #tpu.memory_space<vmem>>, %arg3: memref<1x8x128xf32, #tpu.memory_space<vmem>>) attributes {dimension_semantics = [#tpu.dimension_semantics<parallel>], iteration_bounds = array<i64: 2>, scalar_prefetch = 0 : i64, scratch_operands = 0 : i64, tpu.core_type = #tpu.core_type<tc>, window_params = [{transform_indices = @transform_0, window_bounds = array<i64: 1, 4, 16, 128>}, {transform_indices = @transform_1, window_bounds = array<i64: 1, 16, 128>}, {transform_indices = @transform_2, window_bounds = array<i64: 1, 8, 128>}]} {
    %0 = tpu.iota {dimensions = array<i32: 0>} : vector<16x128xi32>
    %1 = tpu.iota {dimensions = array<i32: 1>} : vector<16x128xi32>
    %c1_i32 = arith.constant 1 : i32
    %2 = tpu.dynamic_rotate %0 by %c1_i32 dim 0 : vector<16x128xi32>, i32 -> vector<16x128xi32>
    %3 = arith.subi %2, %0 : vector<16x128xi32>
    %4 = math.absi %3 : vector<16x128xi32>
    %c1_i32_0 = arith.constant 1 : i32
    %5 = vector.broadcast %c1_i32_0 : i32 to vector<16x128xi32>
    %6 = arith.cmpi ne, %4, %5 : vector<16x128xi32>
    %7 = arith.extui %6 : vector<16x128xi1> to vector<16x128xi32>
    %8 = arith.sitofp %7 : vector<16x128xi32> to vector<16x128xf32>
    %9 = vector.extract_strided_slice %8 {offsets = [0, 0], sizes = [16, 1], strides = [1, 1]} : vector<16x128xf32> to vector<16x1xf32>
    %c15_i32 = arith.constant 15 : i32
    %10 = tpu.dynamic_rotate %0 by %c15_i32 dim 0 : vector<16x128xi32>, i32 -> vector<16x128xi32>
    %11 = arith.subi %10, %0 : vector<16x128xi32>
    %12 = math.absi %11 : vector<16x128xi32>
    %c1_i32_1 = arith.constant 1 : i32
    %13 = vector.broadcast %c1_i32_1 : i32 to vector<16x128xi32>
    %14 = arith.cmpi ne, %12, %13 : vector<16x128xi32>
    %15 = arith.extui %14 : vector<16x128xi1> to vector<16x128xi32>
    %16 = arith.sitofp %15 : vector<16x128xi32> to vector<16x128xf32>
    %17 = vector.extract_strided_slice %16 {offsets = [0, 0], sizes = [16, 1], strides = [1, 1]} : vector<16x128xf32> to vector<16x1xf32>
    %c1_i32_2 = arith.constant 1 : i32
    %18 = tpu.dynamic_rotate %1 by %c1_i32_2 dim 1 : vector<16x128xi32>, i32 -> vector<16x128xi32>
    %19 = arith.subi %18, %1 : vector<16x128xi32>
    %20 = math.absi %19 : vector<16x128xi32>
    %c1_i32_3 = arith.constant 1 : i32
    %21 = vector.broadcast %c1_i32_3 : i32 to vector<16x128xi32>
    %22 = arith.cmpi ne, %20, %21 : vector<16x128xi32>
    %23 = arith.extui %22 : vector<16x128xi1> to vector<16x128xi32>
    %24 = arith.sitofp %23 : vector<16x128xi32> to vector<16x128xf32>
    %25 = vector.extract_strided_slice %24 {offsets = [0, 0], sizes = [1, 128], strides = [1, 1]} : vector<16x128xf32> to vector<1x128xf32>
    %c127_i32 = arith.constant 127 : i32
    %26 = tpu.dynamic_rotate %1 by %c127_i32 dim 1 : vector<16x128xi32>, i32 -> vector<16x128xi32>
    %27 = arith.subi %26, %1 : vector<16x128xi32>
    %28 = math.absi %27 : vector<16x128xi32>
    %c1_i32_4 = arith.constant 1 : i32
    %29 = vector.broadcast %c1_i32_4 : i32 to vector<16x128xi32>
    %30 = arith.cmpi ne, %28, %29 : vector<16x128xi32>
    %31 = arith.extui %30 : vector<16x128xi1> to vector<16x128xi32>
    %32 = arith.sitofp %31 : vector<16x128xi32> to vector<16x128xf32>
    %33 = vector.extract_strided_slice %32 {offsets = [0, 0], sizes = [1, 128], strides = [1, 1]} : vector<16x128xf32> to vector<1x128xf32>
    %cst = arith.constant 1.000000e+00 : f32
    %34 = vector.broadcast %cst : f32 to vector<16x1xf32>
    %35 = arith.subf %34, %9 : vector<16x1xf32>
    %cst_5 = arith.constant 1.000000e+00 : f32
    %36 = vector.broadcast %cst_5 : f32 to vector<16x1xf32>
    %37 = arith.subf %36, %17 : vector<16x1xf32>
    %cst_6 = arith.constant 1.000000e+00 : f32
    %38 = vector.broadcast %cst_6 : f32 to vector<1x128xf32>
    %39 = arith.subf %38, %25 : vector<1x128xf32>
    %cst_7 = arith.constant 1.000000e+00 : f32
    %40 = vector.broadcast %cst_7 : f32 to vector<1x128xf32>
    %41 = arith.subf %40, %33 : vector<1x128xf32>
    %cst_8 = arith.constant 1.000000e+00 : f32
    %42 = vector.broadcast %cst_8 : f32 to vector<128x128xf32>
    %c0 = arith.constant 0 : index
    %c0_9 = arith.constant 0 : index
    %c0_10 = arith.constant 0 : index
    %43 = vector.load %arg2[%c0, %c0_9, %c0_10] : memref<1x16x128xf32, #tpu.memory_space<vmem>>, vector<1x16x128xf32>
    %44 = vector.shape_cast %43 : vector<1x16x128xf32> to vector<16x128xf32>
    %c1_i32_11 = arith.constant 1 : i32
    %45 = tpu.dynamic_rotate %44 by %c1_i32_11 dim 0 : vector<16x128xf32>, i32 -> vector<16x128xf32>
    %46 = vector.broadcast %9 : vector<16x1xf32> to vector<16x128xf32>
    %47 = arith.maximumf %45, %46 : vector<16x128xf32>
    %c15_i32_12 = arith.constant 15 : i32
    %48 = tpu.dynamic_rotate %44 by %c15_i32_12 dim 0 : vector<16x128xf32>, i32 -> vector<16x128xf32>
    %49 = vector.broadcast %17 : vector<16x1xf32> to vector<16x128xf32>
    %50 = arith.maximumf %48, %49 : vector<16x128xf32>
    %c1_i32_13 = arith.constant 1 : i32
    %51 = tpu.dynamic_rotate %44 by %c1_i32_13 dim 1 : vector<16x128xf32>, i32 -> vector<16x128xf32>
    %52 = vector.broadcast %25 : vector<1x128xf32> to vector<16x128xf32>
    %53 = arith.maximumf %51, %52 : vector<16x128xf32>
    %c127_i32_14 = arith.constant 127 : i32
    %54 = tpu.dynamic_rotate %44 by %c127_i32_14 dim 1 : vector<16x128xf32>, i32 -> vector<16x128xf32>
    %55 = vector.broadcast %33 : vector<1x128xf32> to vector<16x128xf32>
    %56 = arith.maximumf %54, %55 : vector<16x128xf32>
    %57 = arith.minimumf %47, %50 : vector<16x128xf32>
    %58 = arith.minimumf %53, %56 : vector<16x128xf32>
    %59 = arith.minimumf %57, %58 : vector<16x128xf32>
    %60 = arith.minimumf %59, %44 : vector<16x128xf32>
    %c1_i32_15 = arith.constant 1 : i32
    %61 = tpu.dynamic_rotate %60 by %c1_i32_15 dim 0 : vector<16x128xf32>, i32 -> vector<16x128xf32>
    %62 = vector.broadcast %35 : vector<16x1xf32> to vector<16x128xf32>
    %63 = arith.minimumf %61, %62 : vector<16x128xf32>
    %c15_i32_16 = arith.constant 15 : i32
    %64 = tpu.dynamic_rotate %60 by %c15_i32_16 dim 0 : vector<16x128xf32>, i32 -> vector<16x128xf32>
    %65 = vector.broadcast %37 : vector<16x1xf32> to vector<16x128xf32>
    %66 = arith.minimumf %64, %65 : vector<16x128xf32>
    %67 = arith.maximumf %63, %66 : vector<16x128xf32>
    %68 = arith.maximumf %67, %60 : vector<16x128xf32>
    %c1_i32_17 = arith.constant 1 : i32
    %69 = tpu.dynamic_rotate %68 by %c1_i32_17 dim 1 : vector<16x128xf32>, i32 -> vector<16x128xf32>
    %70 = vector.broadcast %39 : vector<1x128xf32> to vector<16x128xf32>
    %71 = arith.minimumf %69, %70 : vector<16x128xf32>
    %c127_i32_18 = arith.constant 127 : i32
    %72 = tpu.dynamic_rotate %68 by %c127_i32_18 dim 1 : vector<16x128xf32>, i32 -> vector<16x128xf32>
    %73 = vector.broadcast %41 : vector<1x128xf32> to vector<16x128xf32>
    %74 = arith.minimumf %72, %73 : vector<16x128xf32>
    %75 = arith.maximumf %71, %74 : vector<16x128xf32>
    %76 = arith.maximumf %75, %68 : vector<16x128xf32>
    %77 = arith.subf %44, %76 : vector<16x128xf32>
    %cst_19 = arith.constant 0.000000e+00 : f32
    %78 = vector.broadcast %cst_19 : f32 to vector<16x128xf32>
    %79 = arith.maximumf %77, %78 : vector<16x128xf32>
    %c1_i32_20 = arith.constant 1 : i32
    %80 = tpu.dynamic_rotate %60 by %c1_i32_20 dim 0 : vector<16x128xf32>, i32 -> vector<16x128xf32>
    %81 = vector.broadcast %9 : vector<16x1xf32> to vector<16x128xf32>
    %82 = arith.maximumf %80, %81 : vector<16x128xf32>
    %c15_i32_21 = arith.constant 15 : i32
    %83 = tpu.dynamic_rotate %60 by %c15_i32_21 dim 0 : vector<16x128xf32>, i32 -> vector<16x128xf32>
    %84 = vector.broadcast %17 : vector<16x1xf32> to vector<16x128xf32>
    %85 = arith.maximumf %83, %84 : vector<16x128xf32>
    %c1_i32_22 = arith.constant 1 : i32
    %86 = tpu.dynamic_rotate %60 by %c1_i32_22 dim 1 : vector<16x128xf32>, i32 -> vector<16x128xf32>
    %87 = vector.broadcast %25 : vector<1x128xf32> to vector<16x128xf32>
    %88 = arith.maximumf %86, %87 : vector<16x128xf32>
    %c127_i32_23 = arith.constant 127 : i32
    %89 = tpu.dynamic_rotate %60 by %c127_i32_23 dim 1 : vector<16x128xf32>, i32 -> vector<16x128xf32>
    %90 = vector.broadcast %33 : vector<1x128xf32> to vector<16x128xf32>
    %91 = arith.maximumf %89, %90 : vector<16x128xf32>
    %92 = arith.minimumf %82, %85 : vector<16x128xf32>
    %93 = arith.minimumf %88, %91 : vector<16x128xf32>
    %94 = arith.minimumf %92, %93 : vector<16x128xf32>
    %95 = arith.minimumf %94, %60 : vector<16x128xf32>
    %c1_i32_24 = arith.constant 1 : i32
    %96 = tpu.dynamic_rotate %95 by %c1_i32_24 dim 0 : vector<16x128xf32>, i32 -> vector<16x128xf32>
    %97 = vector.broadcast %35 : vector<16x1xf32> to vector<16x128xf32>
    %98 = arith.minimumf %96, %97 : vector<16x128xf32>
    %c15_i32_25 = arith.constant 15 : i32
    %99 = tpu.dynamic_rotate %95 by %c15_i32_25 dim 0 : vector<16x128xf32>, i32 -> vector<16x128xf32>
    %100 = vector.broadcast %37 : vector<16x1xf32> to vector<16x128xf32>
    %101 = arith.minimumf %99, %100 : vector<16x128xf32>
    %102 = arith.maximumf %98, %101 : vector<16x128xf32>
    %103 = arith.maximumf %102, %95 : vector<16x128xf32>
    %c1_i32_26 = arith.constant 1 : i32
    %104 = tpu.dynamic_rotate %103 by %c1_i32_26 dim 1 : vector<16x128xf32>, i32 -> vector<16x128xf32>
    %105 = vector.broadcast %39 : vector<1x128xf32> to vector<16x128xf32>
    %106 = arith.minimumf %104, %105 : vector<16x128xf32>
    %c127_i32_27 = arith.constant 127 : i32
    %107 = tpu.dynamic_rotate %103 by %c127_i32_27 dim 1 : vector<16x128xf32>, i32 -> vector<16x128xf32>
    %108 = vector.broadcast %41 : vector<1x128xf32> to vector<16x128xf32>
    %109 = arith.minimumf %107, %108 : vector<16x128xf32>
    %110 = arith.maximumf %106, %109 : vector<16x128xf32>
    %111 = arith.maximumf %110, %103 : vector<16x128xf32>
    %112 = arith.subf %60, %111 : vector<16x128xf32>
    %cst_28 = arith.constant 0.000000e+00 : f32
    %113 = vector.broadcast %cst_28 : f32 to vector<16x128xf32>
    %114 = arith.maximumf %112, %113 : vector<16x128xf32>
    %115 = arith.maximumf %79, %114 : vector<16x128xf32>
    %c1_i32_29 = arith.constant 1 : i32
    %116 = tpu.dynamic_rotate %95 by %c1_i32_29 dim 0 : vector<16x128xf32>, i32 -> vector<16x128xf32>
    %117 = vector.broadcast %9 : vector<16x1xf32> to vector<16x128xf32>
    %118 = arith.maximumf %116, %117 : vector<16x128xf32>
    %c15_i32_30 = arith.constant 15 : i32
    %119 = tpu.dynamic_rotate %95 by %c15_i32_30 dim 0 : vector<16x128xf32>, i32 -> vector<16x128xf32>
    %120 = vector.broadcast %17 : vector<16x1xf32> to vector<16x128xf32>
    %121 = arith.maximumf %119, %120 : vector<16x128xf32>
    %c1_i32_31 = arith.constant 1 : i32
    %122 = tpu.dynamic_rotate %95 by %c1_i32_31 dim 1 : vector<16x128xf32>, i32 -> vector<16x128xf32>
    %123 = vector.broadcast %25 : vector<1x128xf32> to vector<16x128xf32>
    %124 = arith.maximumf %122, %123 : vector<16x128xf32>
    %c127_i32_32 = arith.constant 127 : i32
    %125 = tpu.dynamic_rotate %95 by %c127_i32_32 dim 1 : vector<16x128xf32>, i32 -> vector<16x128xf32>
    %126 = vector.broadcast %33 : vector<1x128xf32> to vector<16x128xf32>
    %127 = arith.maximumf %125, %126 : vector<16x128xf32>
    %128 = arith.minimumf %118, %121 : vector<16x128xf32>
    %129 = arith.minimumf %124, %127 : vector<16x128xf32>
    %130 = arith.minimumf %128, %129 : vector<16x128xf32>
    %131 = arith.minimumf %130, %95 : vector<16x128xf32>
    %c1_i32_33 = arith.constant 1 : i32
    %132 = tpu.dynamic_rotate %131 by %c1_i32_33 dim 0 : vector<16x128xf32>, i32 -> vector<16x128xf32>
    %133 = vector.broadcast %35 : vector<16x1xf32> to vector<16x128xf32>
    %134 = arith.minimumf %132, %133 : vector<16x128xf32>
    %c15_i32_34 = arith.constant 15 : i32
    %135 = tpu.dynamic_rotate %131 by %c15_i32_34 dim 0 : vector<16x128xf32>, i32 -> vector<16x128xf32>
    %136 = vector.broadcast %37 : vector<16x1xf32> to vector<16x128xf32>
    %137 = arith.minimumf %135, %136 : vector<16x128xf32>
    %138 = arith.maximumf %134, %137 : vector<16x128xf32>
    %139 = arith.maximumf %138, %131 : vector<16x128xf32>
    %c1_i32_35 = arith.constant 1 : i32
    %140 = tpu.dynamic_rotate %139 by %c1_i32_35 dim 1 : vector<16x128xf32>, i32 -> vector<16x128xf32>
    %141 = vector.broadcast %39 : vector<1x128xf32> to vector<16x128xf32>
    %142 = arith.minimumf %140, %141 : vector<16x128xf32>
    %c127_i32_36 = arith.constant 127 : i32
    %143 = tpu.dynamic_rotate %139 by %c127_i32_36 dim 1 : vector<16x128xf32>, i32 -> vector<16x128xf32>
    %144 = vector.broadcast %41 : vector<1x128xf32> to vector<16x128xf32>
    %145 = arith.minimumf %143, %144 : vector<16x128xf32>
    %146 = arith.maximumf %142, %145 : vector<16x128xf32>
    %147 = arith.maximumf %146, %139 : vector<16x128xf32>
    %148 = arith.subf %95, %147 : vector<16x128xf32>
    %cst_37 = arith.constant 0.000000e+00 : f32
    %149 = vector.broadcast %cst_37 : f32 to vector<16x128xf32>
    %150 = arith.maximumf %148, %149 : vector<16x128xf32>
    %151 = arith.maximumf %115, %150 : vector<16x128xf32>
    %c1_i32_38 = arith.constant 1 : i32
    %152 = tpu.dynamic_rotate %131 by %c1_i32_38 dim 0 : vector<16x128xf32>, i32 -> vector<16x128xf32>
    %153 = vector.broadcast %9 : vector<16x1xf32> to vector<16x128xf32>
    %154 = arith.maximumf %152, %153 : vector<16x128xf32>
    %c15_i32_39 = arith.constant 15 : i32
    %155 = tpu.dynamic_rotate %131 by %c15_i32_39 dim 0 : vector<16x128xf32>, i32 -> vector<16x128xf32>
    %156 = vector.broadcast %17 : vector<16x1xf32> to vector<16x128xf32>
    %157 = arith.maximumf %155, %156 : vector<16x128xf32>
    %c1_i32_40 = arith.constant 1 : i32
    %158 = tpu.dynamic_rotate %131 by %c1_i32_40 dim 1 : vector<16x128xf32>, i32 -> vector<16x128xf32>
    %159 = vector.broadcast %25 : vector<1x128xf32> to vector<16x128xf32>
    %160 = arith.maximumf %158, %159 : vector<16x128xf32>
    %c127_i32_41 = arith.constant 127 : i32
    %161 = tpu.dynamic_rotate %131 by %c127_i32_41 dim 1 : vector<16x128xf32>, i32 -> vector<16x128xf32>
    %162 = vector.broadcast %33 : vector<1x128xf32> to vector<16x128xf32>
    %163 = arith.maximumf %161, %162 : vector<16x128xf32>
    %164 = arith.minimumf %154, %157 : vector<16x128xf32>
    %165 = arith.minimumf %160, %163 : vector<16x128xf32>
    %166 = arith.minimumf %164, %165 : vector<16x128xf32>
    %167 = arith.minimumf %166, %131 : vector<16x128xf32>
    %c1_i32_42 = arith.constant 1 : i32
    %168 = tpu.dynamic_rotate %167 by %c1_i32_42 dim 0 : vector<16x128xf32>, i32 -> vector<16x128xf32>
    %169 = vector.broadcast %35 : vector<16x1xf32> to vector<16x128xf32>
    %170 = arith.minimumf %168, %169 : vector<16x128xf32>
    %c15_i32_43 = arith.constant 15 : i32
    %171 = tpu.dynamic_rotate %167 by %c15_i32_43 dim 0 : vector<16x128xf32>, i32 -> vector<16x128xf32>
    %172 = vector.broadcast %37 : vector<16x1xf32> to vector<16x128xf32>
    %173 = arith.minimumf %171, %172 : vector<16x128xf32>
    %174 = arith.maximumf %170, %173 : vector<16x128xf32>
    %175 = arith.maximumf %174, %167 : vector<16x128xf32>
    %c1_i32_44 = arith.constant 1 : i32
    %176 = tpu.dynamic_rotate %175 by %c1_i32_44 dim 1 : vector<16x128xf32>, i32 -> vector<16x128xf32>
    %177 = vector.broadcast %39 : vector<1x128xf32> to vector<16x128xf32>
    %178 = arith.minimumf %176, %177 : vector<16x128xf32>
    %c127_i32_45 = arith.constant 127 : i32
    %179 = tpu.dynamic_rotate %175 by %c127_i32_45 dim 1 : vector<16x128xf32>, i32 -> vector<16x128xf32>
    %180 = vector.broadcast %41 : vector<1x128xf32> to vector<16x128xf32>
    %181 = arith.minimumf %179, %180 : vector<16x128xf32>
    %182 = arith.maximumf %178, %181 : vector<16x128xf32>
    %183 = arith.maximumf %182, %175 : vector<16x128xf32>
    %184 = arith.subf %131, %183 : vector<16x128xf32>
    %cst_46 = arith.constant 0.000000e+00 : f32
    %185 = vector.broadcast %cst_46 : f32 to vector<16x128xf32>
    %186 = arith.maximumf %184, %185 : vector<16x128xf32>
    %187 = arith.maximumf %151, %186 : vector<16x128xf32>
    %c0_47 = arith.constant 0 : index
    %c1 = arith.constant 1 : index
    %c0_48 = arith.constant 0 : index
    %c0_49 = arith.constant 0 : index
    %188 = vector.load %arg1[%c0_47, %c1, %c0_48, %c0_49] : memref<1x4x16x128xf32, #tpu.memory_space<vmem>>, vector<1x1x16x128xf32>
    %189 = vector.shape_cast %188 : vector<1x1x16x128xf32> to vector<16x128xf32>
    %cst_50 = arith.constant 5.000000e-01 : f32
    %190 = vector.broadcast %cst_50 : f32 to vector<16x128xf32>
    %191 = arith.cmpf ogt, %189, %190 : vector<16x128xf32>
    %192 = arith.extui %191 : vector<16x128xi1> to vector<16x128xi32>
    %193 = arith.sitofp %192 : vector<16x128xi32> to vector<16x128xf32>
    %c1_i32_51 = arith.constant 1 : i32
    %194 = tpu.dynamic_rotate %193 by %c1_i32_51 dim 0 : vector<16x128xf32>, i32 -> vector<16x128xf32>
    %195 = vector.broadcast %9 : vector<16x1xf32> to vector<16x128xf32>
    %196 = arith.maximumf %194, %195 : vector<16x128xf32>
    %c15_i32_52 = arith.constant 15 : i32
    %197 = tpu.dynamic_rotate %193 by %c15_i32_52 dim 0 : vector<16x128xf32>, i32 -> vector<16x128xf32>
    %198 = vector.broadcast %17 : vector<16x1xf32> to vector<16x128xf32>
    %199 = arith.maximumf %197, %198 : vector<16x128xf32>
    %c1_i32_53 = arith.constant 1 : i32
    %200 = tpu.dynamic_rotate %193 by %c1_i32_53 dim 1 : vector<16x128xf32>, i32 -> vector<16x128xf32>
    %201 = vector.broadcast %25 : vector<1x128xf32> to vector<16x128xf32>
    %202 = arith.maximumf %200, %201 : vector<16x128xf32>
    %c127_i32_54 = arith.constant 127 : i32
    %203 = tpu.dynamic_rotate %193 by %c127_i32_54 dim 1 : vector<16x128xf32>, i32 -> vector<16x128xf32>
    %204 = vector.broadcast %33 : vector<1x128xf32> to vector<16x128xf32>
    %205 = arith.maximumf %203, %204 : vector<16x128xf32>
    %206 = arith.minimumf %196, %199 : vector<16x128xf32>
    %207 = arith.minimumf %202, %205 : vector<16x128xf32>
    %208 = arith.minimumf %206, %207 : vector<16x128xf32>
    %209 = arith.minimumf %208, %193 : vector<16x128xf32>
    %c1_i32_55 = arith.constant 1 : i32
    %210 = tpu.dynamic_rotate %209 by %c1_i32_55 dim 0 : vector<16x128xf32>, i32 -> vector<16x128xf32>
    %211 = vector.broadcast %35 : vector<16x1xf32> to vector<16x128xf32>
    %212 = arith.minimumf %210, %211 : vector<16x128xf32>
    %c15_i32_56 = arith.constant 15 : i32
    %213 = tpu.dynamic_rotate %209 by %c15_i32_56 dim 0 : vector<16x128xf32>, i32 -> vector<16x128xf32>
    %214 = vector.broadcast %37 : vector<16x1xf32> to vector<16x128xf32>
    %215 = arith.minimumf %213, %214 : vector<16x128xf32>
    %216 = arith.maximumf %212, %215 : vector<16x128xf32>
    %217 = arith.maximumf %216, %209 : vector<16x128xf32>
    %c1_i32_57 = arith.constant 1 : i32
    %218 = tpu.dynamic_rotate %217 by %c1_i32_57 dim 1 : vector<16x128xf32>, i32 -> vector<16x128xf32>
    %219 = vector.broadcast %39 : vector<1x128xf32> to vector<16x128xf32>
    %220 = arith.minimumf %218, %219 : vector<16x128xf32>
    %c127_i32_58 = arith.constant 127 : i32
    %221 = tpu.dynamic_rotate %217 by %c127_i32_58 dim 1 : vector<16x128xf32>, i32 -> vector<16x128xf32>
    %222 = vector.broadcast %41 : vector<1x128xf32> to vector<16x128xf32>
    %223 = arith.minimumf %221, %222 : vector<16x128xf32>
    %224 = arith.maximumf %220, %223 : vector<16x128xf32>
    %225 = arith.maximumf %224, %217 : vector<16x128xf32>
    %226 = arith.subf %193, %225 : vector<16x128xf32>
    %cst_59 = arith.constant 0.000000e+00 : f32
    %227 = vector.broadcast %cst_59 : f32 to vector<16x128xf32>
    %228 = arith.maximumf %226, %227 : vector<16x128xf32>
    %c1_i32_60 = arith.constant 1 : i32
    %229 = tpu.dynamic_rotate %209 by %c1_i32_60 dim 0 : vector<16x128xf32>, i32 -> vector<16x128xf32>
    %230 = vector.broadcast %9 : vector<16x1xf32> to vector<16x128xf32>
    %231 = arith.maximumf %229, %230 : vector<16x128xf32>
    %c15_i32_61 = arith.constant 15 : i32
    %232 = tpu.dynamic_rotate %209 by %c15_i32_61 dim 0 : vector<16x128xf32>, i32 -> vector<16x128xf32>
    %233 = vector.broadcast %17 : vector<16x1xf32> to vector<16x128xf32>
    %234 = arith.maximumf %232, %233 : vector<16x128xf32>
    %c1_i32_62 = arith.constant 1 : i32
    %235 = tpu.dynamic_rotate %209 by %c1_i32_62 dim 1 : vector<16x128xf32>, i32 -> vector<16x128xf32>
    %236 = vector.broadcast %25 : vector<1x128xf32> to vector<16x128xf32>
    %237 = arith.maximumf %235, %236 : vector<16x128xf32>
    %c127_i32_63 = arith.constant 127 : i32
    %238 = tpu.dynamic_rotate %209 by %c127_i32_63 dim 1 : vector<16x128xf32>, i32 -> vector<16x128xf32>
    %239 = vector.broadcast %33 : vector<1x128xf32> to vector<16x128xf32>
    %240 = arith.maximumf %238, %239 : vector<16x128xf32>
    %241 = arith.minimumf %231, %234 : vector<16x128xf32>
    %242 = arith.minimumf %237, %240 : vector<16x128xf32>
    %243 = arith.minimumf %241, %242 : vector<16x128xf32>
    %244 = arith.minimumf %243, %209 : vector<16x128xf32>
    %c1_i32_64 = arith.constant 1 : i32
    %245 = tpu.dynamic_rotate %244 by %c1_i32_64 dim 0 : vector<16x128xf32>, i32 -> vector<16x128xf32>
    %246 = vector.broadcast %35 : vector<16x1xf32> to vector<16x128xf32>
    %247 = arith.minimumf %245, %246 : vector<16x128xf32>
    %c15_i32_65 = arith.constant 15 : i32
    %248 = tpu.dynamic_rotate %244 by %c15_i32_65 dim 0 : vector<16x128xf32>, i32 -> vector<16x128xf32>
    %249 = vector.broadcast %37 : vector<16x1xf32> to vector<16x128xf32>
    %250 = arith.minimumf %248, %249 : vector<16x128xf32>
    %251 = arith.maximumf %247, %250 : vector<16x128xf32>
    %252 = arith.maximumf %251, %244 : vector<16x128xf32>
    %c1_i32_66 = arith.constant 1 : i32
    %253 = tpu.dynamic_rotate %252 by %c1_i32_66 dim 1 : vector<16x128xf32>, i32 -> vector<16x128xf32>
    %254 = vector.broadcast %39 : vector<1x128xf32> to vector<16x128xf32>
    %255 = arith.minimumf %253, %254 : vector<16x128xf32>
    %c127_i32_67 = arith.constant 127 : i32
    %256 = tpu.dynamic_rotate %252 by %c127_i32_67 dim 1 : vector<16x128xf32>, i32 -> vector<16x128xf32>
    %257 = vector.broadcast %41 : vector<1x128xf32> to vector<16x128xf32>
    %258 = arith.minimumf %256, %257 : vector<16x128xf32>
    %259 = arith.maximumf %255, %258 : vector<16x128xf32>
    %260 = arith.maximumf %259, %252 : vector<16x128xf32>
    %261 = arith.subf %209, %260 : vector<16x128xf32>
    %cst_68 = arith.constant 0.000000e+00 : f32
    %262 = vector.broadcast %cst_68 : f32 to vector<16x128xf32>
    %263 = arith.maximumf %261, %262 : vector<16x128xf32>
    %264 = arith.maximumf %228, %263 : vector<16x128xf32>
    %c1_i32_69 = arith.constant 1 : i32
    %265 = tpu.dynamic_rotate %244 by %c1_i32_69 dim 0 : vector<16x128xf32>, i32 -> vector<16x128xf32>
    %266 = vector.broadcast %9 : vector<16x1xf32> to vector<16x128xf32>
    %267 = arith.maximumf %265, %266 : vector<16x128xf32>
    %c15_i32_70 = arith.constant 15 : i32
    %268 = tpu.dynamic_rotate %244 by %c15_i32_70 dim 0 : vector<16x128xf32>, i32 -> vector<16x128xf32>
    %269 = vector.broadcast %17 : vector<16x1xf32> to vector<16x128xf32>
    %270 = arith.maximumf %268, %269 : vector<16x128xf32>
    %c1_i32_71 = arith.constant 1 : i32
    %271 = tpu.dynamic_rotate %244 by %c1_i32_71 dim 1 : vector<16x128xf32>, i32 -> vector<16x128xf32>
    %272 = vector.broadcast %25 : vector<1x128xf32> to vector<16x128xf32>
    %273 = arith.maximumf %271, %272 : vector<16x128xf32>
    %c127_i32_72 = arith.constant 127 : i32
    %274 = tpu.dynamic_rotate %244 by %c127_i32_72 dim 1 : vector<16x128xf32>, i32 -> vector<16x128xf32>
    %275 = vector.broadcast %33 : vector<1x128xf32> to vector<16x128xf32>
    %276 = arith.maximumf %274, %275 : vector<16x128xf32>
    %277 = arith.minimumf %267, %270 : vector<16x128xf32>
    %278 = arith.minimumf %273, %276 : vector<16x128xf32>
    %279 = arith.minimumf %277, %278 : vector<16x128xf32>
    %280 = arith.minimumf %279, %244 : vector<16x128xf32>
    %c1_i32_73 = arith.constant 1 : i32
    %281 = tpu.dynamic_rotate %280 by %c1_i32_73 dim 0 : vector<16x128xf32>, i32 -> vector<16x128xf32>
    %282 = vector.broadcast %35 : vector<16x1xf32> to vector<16x128xf32>
    %283 = arith.minimumf %281, %282 : vector<16x128xf32>
    %c15_i32_74 = arith.constant 15 : i32
    %284 = tpu.dynamic_rotate %280 by %c15_i32_74 dim 0 : vector<16x128xf32>, i32 -> vector<16x128xf32>
    %285 = vector.broadcast %37 : vector<16x1xf32> to vector<16x128xf32>
    %286 = arith.minimumf %284, %285 : vector<16x128xf32>
    %287 = arith.maximumf %283, %286 : vector<16x128xf32>
    %288 = arith.maximumf %287, %280 : vector<16x128xf32>
    %c1_i32_75 = arith.constant 1 : i32
    %289 = tpu.dynamic_rotate %288 by %c1_i32_75 dim 1 : vector<16x128xf32>, i32 -> vector<16x128xf32>
    %290 = vector.broadcast %39 : vector<1x128xf32> to vector<16x128xf32>
    %291 = arith.minimumf %289, %290 : vector<16x128xf32>
    %c127_i32_76 = arith.constant 127 : i32
    %292 = tpu.dynamic_rotate %288 by %c127_i32_76 dim 1 : vector<16x128xf32>, i32 -> vector<16x128xf32>
    %293 = vector.broadcast %41 : vector<1x128xf32> to vector<16x128xf32>
    %294 = arith.minimumf %292, %293 : vector<16x128xf32>
    %295 = arith.maximumf %291, %294 : vector<16x128xf32>
    %296 = arith.maximumf %295, %288 : vector<16x128xf32>
    %297 = arith.subf %244, %296 : vector<16x128xf32>
    %cst_77 = arith.constant 0.000000e+00 : f32
    %298 = vector.broadcast %cst_77 : f32 to vector<16x128xf32>
    %299 = arith.maximumf %297, %298 : vector<16x128xf32>
    %300 = arith.maximumf %264, %299 : vector<16x128xf32>
    %c1_i32_78 = arith.constant 1 : i32
    %301 = tpu.dynamic_rotate %280 by %c1_i32_78 dim 0 : vector<16x128xf32>, i32 -> vector<16x128xf32>
    %302 = vector.broadcast %9 : vector<16x1xf32> to vector<16x128xf32>
    %303 = arith.maximumf %301, %302 : vector<16x128xf32>
    %c15_i32_79 = arith.constant 15 : i32
    %304 = tpu.dynamic_rotate %280 by %c15_i32_79 dim 0 : vector<16x128xf32>, i32 -> vector<16x128xf32>
    %305 = vector.broadcast %17 : vector<16x1xf32> to vector<16x128xf32>
    %306 = arith.maximumf %304, %305 : vector<16x128xf32>
    %c1_i32_80 = arith.constant 1 : i32
    %307 = tpu.dynamic_rotate %280 by %c1_i32_80 dim 1 : vector<16x128xf32>, i32 -> vector<16x128xf32>
    %308 = vector.broadcast %25 : vector<1x128xf32> to vector<16x128xf32>
    %309 = arith.maximumf %307, %308 : vector<16x128xf32>
    %c127_i32_81 = arith.constant 127 : i32
    %310 = tpu.dynamic_rotate %280 by %c127_i32_81 dim 1 : vector<16x128xf32>, i32 -> vector<16x128xf32>
    %311 = vector.broadcast %33 : vector<1x128xf32> to vector<16x128xf32>
    %312 = arith.maximumf %310, %311 : vector<16x128xf32>
    %313 = arith.minimumf %303, %306 : vector<16x128xf32>
    %314 = arith.minimumf %309, %312 : vector<16x128xf32>
    %315 = arith.minimumf %313, %314 : vector<16x128xf32>
    %316 = arith.minimumf %315, %280 : vector<16x128xf32>
    %c1_i32_82 = arith.constant 1 : i32
    %317 = tpu.dynamic_rotate %316 by %c1_i32_82 dim 0 : vector<16x128xf32>, i32 -> vector<16x128xf32>
    %318 = vector.broadcast %35 : vector<16x1xf32> to vector<16x128xf32>
    %319 = arith.minimumf %317, %318 : vector<16x128xf32>
    %c15_i32_83 = arith.constant 15 : i32
    %320 = tpu.dynamic_rotate %316 by %c15_i32_83 dim 0 : vector<16x128xf32>, i32 -> vector<16x128xf32>
    %321 = vector.broadcast %37 : vector<16x1xf32> to vector<16x128xf32>
    %322 = arith.minimumf %320, %321 : vector<16x128xf32>
    %323 = arith.maximumf %319, %322 : vector<16x128xf32>
    %324 = arith.maximumf %323, %316 : vector<16x128xf32>
    %c1_i32_84 = arith.constant 1 : i32
    %325 = tpu.dynamic_rotate %324 by %c1_i32_84 dim 1 : vector<16x128xf32>, i32 -> vector<16x128xf32>
    %326 = vector.broadcast %39 : vector<1x128xf32> to vector<16x128xf32>
    %327 = arith.minimumf %325, %326 : vector<16x128xf32>
    %c127_i32_85 = arith.constant 127 : i32
    %328 = tpu.dynamic_rotate %324 by %c127_i32_85 dim 1 : vector<16x128xf32>, i32 -> vector<16x128xf32>
    %329 = vector.broadcast %41 : vector<1x128xf32> to vector<16x128xf32>
    %330 = arith.minimumf %328, %329 : vector<16x128xf32>
    %331 = arith.maximumf %327, %330 : vector<16x128xf32>
    %332 = arith.maximumf %331, %324 : vector<16x128xf32>
    %333 = arith.subf %280, %332 : vector<16x128xf32>
    %cst_86 = arith.constant 0.000000e+00 : f32
    %334 = vector.broadcast %cst_86 : f32 to vector<16x128xf32>
    %335 = arith.maximumf %333, %334 : vector<16x128xf32>
    %336 = arith.maximumf %300, %335 : vector<16x128xf32>
    %337 = arith.mulf %44, %193 : vector<16x128xf32>
    %cst_87 = arith.constant dense<0.000000e+00> : vector<16x128xf32>
    %338 = tpu.matmul %337, %42, %cst_87 {dimension_numbers = #tpu.dot_dimension_numbers<[1], [0], [0], [1], [0, 0, 1, 1], [], []>} : vector<16x128xf32>, vector<128x128xf32>, vector<16x128xf32> -> vector<16x128xf32>
    %339 = vector.extract_strided_slice %338 {offsets = [0, 0], sizes = [16, 1], strides = [1, 1]} : vector<16x128xf32> to vector<16x1xf32>
    %340 = vector.shape_cast %339 : vector<16x1xf32> to vector<1x16x1xf32>
    %cst_88 = arith.constant dense<0.000000e+00> : vector<1xf32>
    %341 = vector.multi_reduction <add>, %340, %cst_88 [1, 2] : vector<1x16x1xf32> to vector<1xf32>
    %342 = vector.shape_cast %341 : vector<1xf32> to vector<1x1x1xf32>
    %343 = vector.extract %342[0, 0, 0] : f32 from vector<1x1x1xf32>
    %cst_89 = arith.constant 0.000000e+00 : f32
    %344 = arith.addf %cst_89, %343 : f32
    %cst_90 = arith.constant dense<0.000000e+00> : vector<16x128xf32>
    %345 = tpu.matmul %193, %42, %cst_90 {dimension_numbers = #tpu.dot_dimension_numbers<[1], [0], [0], [1], [0, 0, 1, 1], [], []>} : vector<16x128xf32>, vector<128x128xf32>, vector<16x128xf32> -> vector<16x128xf32>
    %346 = vector.extract_strided_slice %345 {offsets = [0, 0], sizes = [16, 1], strides = [1, 1]} : vector<16x128xf32> to vector<16x1xf32>
    %347 = vector.shape_cast %346 : vector<16x1xf32> to vector<1x16x1xf32>
    %cst_91 = arith.constant dense<0.000000e+00> : vector<1xf32>
    %348 = vector.multi_reduction <add>, %347, %cst_91 [1, 2] : vector<1x16x1xf32> to vector<1xf32>
    %349 = vector.shape_cast %348 : vector<1xf32> to vector<1x1x1xf32>
    %350 = vector.extract %349[0, 0, 0] : f32 from vector<1x1x1xf32>
    %cst_92 = arith.constant 0.000000e+00 : f32
    %351 = arith.addf %cst_92, %350 : f32
    %352 = arith.mulf %336, %44 : vector<16x128xf32>
    %cst_93 = arith.constant dense<0.000000e+00> : vector<16x128xf32>
    %353 = tpu.matmul %352, %42, %cst_93 {dimension_numbers = #tpu.dot_dimension_numbers<[1], [0], [0], [1], [0, 0, 1, 1], [], []>} : vector<16x128xf32>, vector<128x128xf32>, vector<16x128xf32> -> vector<16x128xf32>
    %354 = vector.extract_strided_slice %353 {offsets = [0, 0], sizes = [16, 1], strides = [1, 1]} : vector<16x128xf32> to vector<16x1xf32>
    %355 = vector.shape_cast %354 : vector<16x1xf32> to vector<1x16x1xf32>
    %cst_94 = arith.constant dense<0.000000e+00> : vector<1xf32>
    %356 = vector.multi_reduction <add>, %355, %cst_94 [1, 2] : vector<1x16x1xf32> to vector<1xf32>
    %357 = vector.shape_cast %356 : vector<1xf32> to vector<1x1x1xf32>
    %358 = vector.extract %357[0, 0, 0] : f32 from vector<1x1x1xf32>
    %cst_95 = arith.constant 0.000000e+00 : f32
    %359 = arith.addf %cst_95, %358 : f32
    %cst_96 = arith.constant dense<0.000000e+00> : vector<16x128xf32>
    %360 = tpu.matmul %336, %42, %cst_96 {dimension_numbers = #tpu.dot_dimension_numbers<[1], [0], [0], [1], [0, 0, 1, 1], [], []>} : vector<16x128xf32>, vector<128x128xf32>, vector<16x128xf32> -> vector<16x128xf32>
    %361 = vector.extract_strided_slice %360 {offsets = [0, 0], sizes = [16, 1], strides = [1, 1]} : vector<16x128xf32> to vector<16x1xf32>
    %362 = vector.shape_cast %361 : vector<16x1xf32> to vector<1x16x1xf32>
    %cst_97 = arith.constant dense<0.000000e+00> : vector<1xf32>
    %363 = vector.multi_reduction <add>, %362, %cst_97 [1, 2] : vector<1x16x1xf32> to vector<1xf32>
    %364 = vector.shape_cast %363 : vector<1xf32> to vector<1x1x1xf32>
    %365 = vector.extract %364[0, 0, 0] : f32 from vector<1x1x1xf32>
    %cst_98 = arith.constant 0.000000e+00 : f32
    %366 = arith.addf %cst_98, %365 : f32
    %367 = arith.mulf %187, %193 : vector<16x128xf32>
    %cst_99 = arith.constant dense<0.000000e+00> : vector<16x128xf32>
    %368 = tpu.matmul %367, %42, %cst_99 {dimension_numbers = #tpu.dot_dimension_numbers<[1], [0], [0], [1], [0, 0, 1, 1], [], []>} : vector<16x128xf32>, vector<128x128xf32>, vector<16x128xf32> -> vector<16x128xf32>
    %369 = vector.extract_strided_slice %368 {offsets = [0, 0], sizes = [16, 1], strides = [1, 1]} : vector<16x128xf32> to vector<16x1xf32>
    %370 = vector.shape_cast %369 : vector<16x1xf32> to vector<1x16x1xf32>
    %cst_100 = arith.constant dense<0.000000e+00> : vector<1xf32>
    %371 = vector.multi_reduction <add>, %370, %cst_100 [1, 2] : vector<1x16x1xf32> to vector<1xf32>
    %372 = vector.shape_cast %371 : vector<1xf32> to vector<1x1x1xf32>
    %373 = vector.extract %372[0, 0, 0] : f32 from vector<1x1x1xf32>
    %cst_101 = arith.constant 0.000000e+00 : f32
    %374 = arith.addf %cst_101, %373 : f32
    %c0_102 = arith.constant 0 : index
    %c2 = arith.constant 2 : index
    %c0_103 = arith.constant 0 : index
    %c0_104 = arith.constant 0 : index
    %375 = vector.load %arg1[%c0_102, %c2, %c0_103, %c0_104] : memref<1x4x16x128xf32, #tpu.memory_space<vmem>>, vector<1x1x16x128xf32>
    %376 = vector.shape_cast %375 : vector<1x1x16x128xf32> to vector<16x128xf32>
    %cst_105 = arith.constant 5.000000e-01 : f32
    %377 = vector.broadcast %cst_105 : f32 to vector<16x128xf32>
    %378 = arith.cmpf ogt, %376, %377 : vector<16x128xf32>
    %379 = arith.extui %378 : vector<16x128xi1> to vector<16x128xi32>
    %380 = arith.sitofp %379 : vector<16x128xi32> to vector<16x128xf32>
    %c1_i32_106 = arith.constant 1 : i32
    %381 = tpu.dynamic_rotate %380 by %c1_i32_106 dim 0 : vector<16x128xf32>, i32 -> vector<16x128xf32>
    %382 = vector.broadcast %9 : vector<16x1xf32> to vector<16x128xf32>
    %383 = arith.maximumf %381, %382 : vector<16x128xf32>
    %c15_i32_107 = arith.constant 15 : i32
    %384 = tpu.dynamic_rotate %380 by %c15_i32_107 dim 0 : vector<16x128xf32>, i32 -> vector<16x128xf32>
    %385 = vector.broadcast %17 : vector<16x1xf32> to vector<16x128xf32>
    %386 = arith.maximumf %384, %385 : vector<16x128xf32>
    %c1_i32_108 = arith.constant 1 : i32
    %387 = tpu.dynamic_rotate %380 by %c1_i32_108 dim 1 : vector<16x128xf32>, i32 -> vector<16x128xf32>
    %388 = vector.broadcast %25 : vector<1x128xf32> to vector<16x128xf32>
    %389 = arith.maximumf %387, %388 : vector<16x128xf32>
    %c127_i32_109 = arith.constant 127 : i32
    %390 = tpu.dynamic_rotate %380 by %c127_i32_109 dim 1 : vector<16x128xf32>, i32 -> vector<16x128xf32>
    %391 = vector.broadcast %33 : vector<1x128xf32> to vector<16x128xf32>
    %392 = arith.maximumf %390, %391 : vector<16x128xf32>
    %393 = arith.minimumf %383, %386 : vector<16x128xf32>
    %394 = arith.minimumf %389, %392 : vector<16x128xf32>
    %395 = arith.minimumf %393, %394 : vector<16x128xf32>
    %396 = arith.minimumf %395, %380 : vector<16x128xf32>
    %c1_i32_110 = arith.constant 1 : i32
    %397 = tpu.dynamic_rotate %396 by %c1_i32_110 dim 0 : vector<16x128xf32>, i32 -> vector<16x128xf32>
    %398 = vector.broadcast %35 : vector<16x1xf32> to vector<16x128xf32>
    %399 = arith.minimumf %397, %398 : vector<16x128xf32>
    %c15_i32_111 = arith.constant 15 : i32
    %400 = tpu.dynamic_rotate %396 by %c15_i32_111 dim 0 : vector<16x128xf32>, i32 -> vector<16x128xf32>
    %401 = vector.broadcast %37 : vector<16x1xf32> to vector<16x128xf32>
    %402 = arith.minimumf %400, %401 : vector<16x128xf32>
    %403 = arith.maximumf %399, %402 : vector<16x128xf32>
    %404 = arith.maximumf %403, %396 : vector<16x128xf32>
    %c1_i32_112 = arith.constant 1 : i32
    %405 = tpu.dynamic_rotate %404 by %c1_i32_112 dim 1 : vector<16x128xf32>, i32 -> vector<16x128xf32>
    %406 = vector.broadcast %39 : vector<1x128xf32> to vector<16x128xf32>
    %407 = arith.minimumf %405, %406 : vector<16x128xf32>
    %c127_i32_113 = arith.constant 127 : i32
    %408 = tpu.dynamic_rotate %404 by %c127_i32_113 dim 1 : vector<16x128xf32>, i32 -> vector<16x128xf32>
    %409 = vector.broadcast %41 : vector<1x128xf32> to vector<16x128xf32>
    %410 = arith.minimumf %408, %409 : vector<16x128xf32>
    %411 = arith.maximumf %407, %410 : vector<16x128xf32>
    %412 = arith.maximumf %411, %404 : vector<16x128xf32>
    %413 = arith.subf %380, %412 : vector<16x128xf32>
    %cst_114 = arith.constant 0.000000e+00 : f32
    %414 = vector.broadcast %cst_114 : f32 to vector<16x128xf32>
    %415 = arith.maximumf %413, %414 : vector<16x128xf32>
    %c1_i32_115 = arith.constant 1 : i32
    %416 = tpu.dynamic_rotate %396 by %c1_i32_115 dim 0 : vector<16x128xf32>, i32 -> vector<16x128xf32>
    %417 = vector.broadcast %9 : vector<16x1xf32> to vector<16x128xf32>
    %418 = arith.maximumf %416, %417 : vector<16x128xf32>
    %c15_i32_116 = arith.constant 15 : i32
    %419 = tpu.dynamic_rotate %396 by %c15_i32_116 dim 0 : vector<16x128xf32>, i32 -> vector<16x128xf32>
    %420 = vector.broadcast %17 : vector<16x1xf32> to vector<16x128xf32>
    %421 = arith.maximumf %419, %420 : vector<16x128xf32>
    %c1_i32_117 = arith.constant 1 : i32
    %422 = tpu.dynamic_rotate %396 by %c1_i32_117 dim 1 : vector<16x128xf32>, i32 -> vector<16x128xf32>
    %423 = vector.broadcast %25 : vector<1x128xf32> to vector<16x128xf32>
    %424 = arith.maximumf %422, %423 : vector<16x128xf32>
    %c127_i32_118 = arith.constant 127 : i32
    %425 = tpu.dynamic_rotate %396 by %c127_i32_118 dim 1 : vector<16x128xf32>, i32 -> vector<16x128xf32>
    %426 = vector.broadcast %33 : vector<1x128xf32> to vector<16x128xf32>
    %427 = arith.maximumf %425, %426 : vector<16x128xf32>
    %428 = arith.minimumf %418, %421 : vector<16x128xf32>
    %429 = arith.minimumf %424, %427 : vector<16x128xf32>
    %430 = arith.minimumf %428, %429 : vector<16x128xf32>
    %431 = arith.minimumf %430, %396 : vector<16x128xf32>
    %c1_i32_119 = arith.constant 1 : i32
    %432 = tpu.dynamic_rotate %431 by %c1_i32_119 dim 0 : vector<16x128xf32>, i32 -> vector<16x128xf32>
    %433 = vector.broadcast %35 : vector<16x1xf32> to vector<16x128xf32>
    %434 = arith.minimumf %432, %433 : vector<16x128xf32>
    %c15_i32_120 = arith.constant 15 : i32
    %435 = tpu.dynamic_rotate %431 by %c15_i32_120 dim 0 : vector<16x128xf32>, i32 -> vector<16x128xf32>
    %436 = vector.broadcast %37 : vector<16x1xf32> to vector<16x128xf32>
    %437 = arith.minimumf %435, %436 : vector<16x128xf32>
    %438 = arith.maximumf %434, %437 : vector<16x128xf32>
    %439 = arith.maximumf %438, %431 : vector<16x128xf32>
    %c1_i32_121 = arith.constant 1 : i32
    %440 = tpu.dynamic_rotate %439 by %c1_i32_121 dim 1 : vector<16x128xf32>, i32 -> vector<16x128xf32>
    %441 = vector.broadcast %39 : vector<1x128xf32> to vector<16x128xf32>
    %442 = arith.minimumf %440, %441 : vector<16x128xf32>
    %c127_i32_122 = arith.constant 127 : i32
    %443 = tpu.dynamic_rotate %439 by %c127_i32_122 dim 1 : vector<16x128xf32>, i32 -> vector<16x128xf32>
    %444 = vector.broadcast %41 : vector<1x128xf32> to vector<16x128xf32>
    %445 = arith.minimumf %443, %444 : vector<16x128xf32>
    %446 = arith.maximumf %442, %445 : vector<16x128xf32>
    %447 = arith.maximumf %446, %439 : vector<16x128xf32>
    %448 = arith.subf %396, %447 : vector<16x128xf32>
    %cst_123 = arith.constant 0.000000e+00 : f32
    %449 = vector.broadcast %cst_123 : f32 to vector<16x128xf32>
    %450 = arith.maximumf %448, %449 : vector<16x128xf32>
    %451 = arith.maximumf %415, %450 : vector<16x128xf32>
    %c1_i32_124 = arith.constant 1 : i32
    %452 = tpu.dynamic_rotate %431 by %c1_i32_124 dim 0 : vector<16x128xf32>, i32 -> vector<16x128xf32>
    %453 = vector.broadcast %9 : vector<16x1xf32> to vector<16x128xf32>
    %454 = arith.maximumf %452, %453 : vector<16x128xf32>
    %c15_i32_125 = arith.constant 15 : i32
    %455 = tpu.dynamic_rotate %431 by %c15_i32_125 dim 0 : vector<16x128xf32>, i32 -> vector<16x128xf32>
    %456 = vector.broadcast %17 : vector<16x1xf32> to vector<16x128xf32>
    %457 = arith.maximumf %455, %456 : vector<16x128xf32>
    %c1_i32_126 = arith.constant 1 : i32
    %458 = tpu.dynamic_rotate %431 by %c1_i32_126 dim 1 : vector<16x128xf32>, i32 -> vector<16x128xf32>
    %459 = vector.broadcast %25 : vector<1x128xf32> to vector<16x128xf32>
    %460 = arith.maximumf %458, %459 : vector<16x128xf32>
    %c127_i32_127 = arith.constant 127 : i32
    %461 = tpu.dynamic_rotate %431 by %c127_i32_127 dim 1 : vector<16x128xf32>, i32 -> vector<16x128xf32>
    %462 = vector.broadcast %33 : vector<1x128xf32> to vector<16x128xf32>
    %463 = arith.maximumf %461, %462 : vector<16x128xf32>
    %464 = arith.minimumf %454, %457 : vector<16x128xf32>
    %465 = arith.minimumf %460, %463 : vector<16x128xf32>
    %466 = arith.minimumf %464, %465 : vector<16x128xf32>
    %467 = arith.minimumf %466, %431 : vector<16x128xf32>
    %c1_i32_128 = arith.constant 1 : i32
    %468 = tpu.dynamic_rotate %467 by %c1_i32_128 dim 0 : vector<16x128xf32>, i32 -> vector<16x128xf32>
    %469 = vector.broadcast %35 : vector<16x1xf32> to vector<16x128xf32>
    %470 = arith.minimumf %468, %469 : vector<16x128xf32>
    %c15_i32_129 = arith.constant 15 : i32
    %471 = tpu.dynamic_rotate %467 by %c15_i32_129 dim 0 : vector<16x128xf32>, i32 -> vector<16x128xf32>
    %472 = vector.broadcast %37 : vector<16x1xf32> to vector<16x128xf32>
    %473 = arith.minimumf %471, %472 : vector<16x128xf32>
    %474 = arith.maximumf %470, %473 : vector<16x128xf32>
    %475 = arith.maximumf %474, %467 : vector<16x128xf32>
    %c1_i32_130 = arith.constant 1 : i32
    %476 = tpu.dynamic_rotate %475 by %c1_i32_130 dim 1 : vector<16x128xf32>, i32 -> vector<16x128xf32>
    %477 = vector.broadcast %39 : vector<1x128xf32> to vector<16x128xf32>
    %478 = arith.minimumf %476, %477 : vector<16x128xf32>
    %c127_i32_131 = arith.constant 127 : i32
    %479 = tpu.dynamic_rotate %475 by %c127_i32_131 dim 1 : vector<16x128xf32>, i32 -> vector<16x128xf32>
    %480 = vector.broadcast %41 : vector<1x128xf32> to vector<16x128xf32>
    %481 = arith.minimumf %479, %480 : vector<16x128xf32>
    %482 = arith.maximumf %478, %481 : vector<16x128xf32>
    %483 = arith.maximumf %482, %475 : vector<16x128xf32>
    %484 = arith.subf %431, %483 : vector<16x128xf32>
    %cst_132 = arith.constant 0.000000e+00 : f32
    %485 = vector.broadcast %cst_132 : f32 to vector<16x128xf32>
    %486 = arith.maximumf %484, %485 : vector<16x128xf32>
    %487 = arith.maximumf %451, %486 : vector<16x128xf32>
    %c1_i32_133 = arith.constant 1 : i32
    %488 = tpu.dynamic_rotate %467 by %c1_i32_133 dim 0 : vector<16x128xf32>, i32 -> vector<16x128xf32>
    %489 = vector.broadcast %9 : vector<16x1xf32> to vector<16x128xf32>
    %490 = arith.maximumf %488, %489 : vector<16x128xf32>
    %c15_i32_134 = arith.constant 15 : i32
    %491 = tpu.dynamic_rotate %467 by %c15_i32_134 dim 0 : vector<16x128xf32>, i32 -> vector<16x128xf32>
    %492 = vector.broadcast %17 : vector<16x1xf32> to vector<16x128xf32>
    %493 = arith.maximumf %491, %492 : vector<16x128xf32>
    %c1_i32_135 = arith.constant 1 : i32
    %494 = tpu.dynamic_rotate %467 by %c1_i32_135 dim 1 : vector<16x128xf32>, i32 -> vector<16x128xf32>
    %495 = vector.broadcast %25 : vector<1x128xf32> to vector<16x128xf32>
    %496 = arith.maximumf %494, %495 : vector<16x128xf32>
    %c127_i32_136 = arith.constant 127 : i32
    %497 = tpu.dynamic_rotate %467 by %c127_i32_136 dim 1 : vector<16x128xf32>, i32 -> vector<16x128xf32>
    %498 = vector.broadcast %33 : vector<1x128xf32> to vector<16x128xf32>
    %499 = arith.maximumf %497, %498 : vector<16x128xf32>
    %500 = arith.minimumf %490, %493 : vector<16x128xf32>
    %501 = arith.minimumf %496, %499 : vector<16x128xf32>
    %502 = arith.minimumf %500, %501 : vector<16x128xf32>
    %503 = arith.minimumf %502, %467 : vector<16x128xf32>
    %c1_i32_137 = arith.constant 1 : i32
    %504 = tpu.dynamic_rotate %503 by %c1_i32_137 dim 0 : vector<16x128xf32>, i32 -> vector<16x128xf32>
    %505 = vector.broadcast %35 : vector<16x1xf32> to vector<16x128xf32>
    %506 = arith.minimumf %504, %505 : vector<16x128xf32>
    %c15_i32_138 = arith.constant 15 : i32
    %507 = tpu.dynamic_rotate %503 by %c15_i32_138 dim 0 : vector<16x128xf32>, i32 -> vector<16x128xf32>
    %508 = vector.broadcast %37 : vector<16x1xf32> to vector<16x128xf32>
    %509 = arith.minimumf %507, %508 : vector<16x128xf32>
    %510 = arith.maximumf %506, %509 : vector<16x128xf32>
    %511 = arith.maximumf %510, %503 : vector<16x128xf32>
    %c1_i32_139 = arith.constant 1 : i32
    %512 = tpu.dynamic_rotate %511 by %c1_i32_139 dim 1 : vector<16x128xf32>, i32 -> vector<16x128xf32>
    %513 = vector.broadcast %39 : vector<1x128xf32> to vector<16x128xf32>
    %514 = arith.minimumf %512, %513 : vector<16x128xf32>
    %c127_i32_140 = arith.constant 127 : i32
    %515 = tpu.dynamic_rotate %511 by %c127_i32_140 dim 1 : vector<16x128xf32>, i32 -> vector<16x128xf32>
    %516 = vector.broadcast %41 : vector<1x128xf32> to vector<16x128xf32>
    %517 = arith.minimumf %515, %516 : vector<16x128xf32>
    %518 = arith.maximumf %514, %517 : vector<16x128xf32>
    %519 = arith.maximumf %518, %511 : vector<16x128xf32>
    %520 = arith.subf %467, %519 : vector<16x128xf32>
    %cst_141 = arith.constant 0.000000e+00 : f32
    %521 = vector.broadcast %cst_141 : f32 to vector<16x128xf32>
    %522 = arith.maximumf %520, %521 : vector<16x128xf32>
    %523 = arith.maximumf %487, %522 : vector<16x128xf32>
    %524 = arith.mulf %44, %380 : vector<16x128xf32>
    %cst_142 = arith.constant dense<0.000000e+00> : vector<16x128xf32>
    %525 = tpu.matmul %524, %42, %cst_142 {dimension_numbers = #tpu.dot_dimension_numbers<[1], [0], [0], [1], [0, 0, 1, 1], [], []>} : vector<16x128xf32>, vector<128x128xf32>, vector<16x128xf32> -> vector<16x128xf32>
    %526 = vector.extract_strided_slice %525 {offsets = [0, 0], sizes = [16, 1], strides = [1, 1]} : vector<16x128xf32> to vector<16x1xf32>
    %527 = vector.shape_cast %526 : vector<16x1xf32> to vector<1x16x1xf32>
    %cst_143 = arith.constant dense<0.000000e+00> : vector<1xf32>
    %528 = vector.multi_reduction <add>, %527, %cst_143 [1, 2] : vector<1x16x1xf32> to vector<1xf32>
    %529 = vector.shape_cast %528 : vector<1xf32> to vector<1x1x1xf32>
    %530 = vector.extract %529[0, 0, 0] : f32 from vector<1x1x1xf32>
    %531 = arith.addf %344, %530 : f32
    %cst_144 = arith.constant dense<0.000000e+00> : vector<16x128xf32>
    %532 = tpu.matmul %380, %42, %cst_144 {dimension_numbers = #tpu.dot_dimension_numbers<[1], [0], [0], [1], [0, 0, 1, 1], [], []>} : vector<16x128xf32>, vector<128x128xf32>, vector<16x128xf32> -> vector<16x128xf32>
    %533 = vector.extract_strided_slice %532 {offsets = [0, 0], sizes = [16, 1], strides = [1, 1]} : vector<16x128xf32> to vector<16x1xf32>
    %534 = vector.shape_cast %533 : vector<16x1xf32> to vector<1x16x1xf32>
    %cst_145 = arith.constant dense<0.000000e+00> : vector<1xf32>
    %535 = vector.multi_reduction <add>, %534, %cst_145 [1, 2] : vector<1x16x1xf32> to vector<1xf32>
    %536 = vector.shape_cast %535 : vector<1xf32> to vector<1x1x1xf32>
    %537 = vector.extract %536[0, 0, 0] : f32 from vector<1x1x1xf32>
    %538 = arith.addf %351, %537 : f32
    %539 = arith.mulf %523, %44 : vector<16x128xf32>
    %cst_146 = arith.constant dense<0.000000e+00> : vector<16x128xf32>
    %540 = tpu.matmul %539, %42, %cst_146 {dimension_numbers = #tpu.dot_dimension_numbers<[1], [0], [0], [1], [0, 0, 1, 1], [], []>} : vector<16x128xf32>, vector<128x128xf32>, vector<16x128xf32> -> vector<16x128xf32>
    %541 = vector.extract_strided_slice %540 {offsets = [0, 0], sizes = [16, 1], strides = [1, 1]} : vector<16x128xf32> to vector<16x1xf32>
    %542 = vector.shape_cast %541 : vector<16x1xf32> to vector<1x16x1xf32>
    %cst_147 = arith.constant dense<0.000000e+00> : vector<1xf32>
    %543 = vector.multi_reduction <add>, %542, %cst_147 [1, 2] : vector<1x16x1xf32> to vector<1xf32>
    %544 = vector.shape_cast %543 : vector<1xf32> to vector<1x1x1xf32>
    %545 = vector.extract %544[0, 0, 0] : f32 from vector<1x1x1xf32>
    %546 = arith.addf %359, %545 : f32
    %cst_148 = arith.constant dense<0.000000e+00> : vector<16x128xf32>
    %547 = tpu.matmul %523, %42, %cst_148 {dimension_numbers = #tpu.dot_dimension_numbers<[1], [0], [0], [1], [0, 0, 1, 1], [], []>} : vector<16x128xf32>, vector<128x128xf32>, vector<16x128xf32> -> vector<16x128xf32>
    %548 = vector.extract_strided_slice %547 {offsets = [0, 0], sizes = [16, 1], strides = [1, 1]} : vector<16x128xf32> to vector<16x1xf32>
    %549 = vector.shape_cast %548 : vector<16x1xf32> to vector<1x16x1xf32>
    %cst_149 = arith.constant dense<0.000000e+00> : vector<1xf32>
    %550 = vector.multi_reduction <add>, %549, %cst_149 [1, 2] : vector<1x16x1xf32> to vector<1xf32>
    %551 = vector.shape_cast %550 : vector<1xf32> to vector<1x1x1xf32>
    %552 = vector.extract %551[0, 0, 0] : f32 from vector<1x1x1xf32>
    %553 = arith.addf %366, %552 : f32
    %554 = arith.mulf %187, %380 : vector<16x128xf32>
    %cst_150 = arith.constant dense<0.000000e+00> : vector<16x128xf32>
    %555 = tpu.matmul %554, %42, %cst_150 {dimension_numbers = #tpu.dot_dimension_numbers<[1], [0], [0], [1], [0, 0, 1, 1], [], []>} : vector<16x128xf32>, vector<128x128xf32>, vector<16x128xf32> -> vector<16x128xf32>
    %556 = vector.extract_strided_slice %555 {offsets = [0, 0], sizes = [16, 1], strides = [1, 1]} : vector<16x128xf32> to vector<16x1xf32>
    %557 = vector.shape_cast %556 : vector<16x1xf32> to vector<1x16x1xf32>
    %cst_151 = arith.constant dense<0.000000e+00> : vector<1xf32>
    %558 = vector.multi_reduction <add>, %557, %cst_151 [1, 2] : vector<1x16x1xf32> to vector<1xf32>
    %559 = vector.shape_cast %558 : vector<1xf32> to vector<1x1x1xf32>
    %560 = vector.extract %559[0, 0, 0] : f32 from vector<1x1x1xf32>
    %561 = arith.addf %374, %560 : f32
    %c0_152 = arith.constant 0 : index
    %c3 = arith.constant 3 : index
    %c0_153 = arith.constant 0 : index
    %c0_154 = arith.constant 0 : index
    %562 = vector.load %arg1[%c0_152, %c3, %c0_153, %c0_154] : memref<1x4x16x128xf32, #tpu.memory_space<vmem>>, vector<1x1x16x128xf32>
    %563 = vector.shape_cast %562 : vector<1x1x16x128xf32> to vector<16x128xf32>
    %cst_155 = arith.constant 5.000000e-01 : f32
    %564 = vector.broadcast %cst_155 : f32 to vector<16x128xf32>
    %565 = arith.cmpf ogt, %563, %564 : vector<16x128xf32>
    %566 = arith.extui %565 : vector<16x128xi1> to vector<16x128xi32>
    %567 = arith.sitofp %566 : vector<16x128xi32> to vector<16x128xf32>
    %c1_i32_156 = arith.constant 1 : i32
    %568 = tpu.dynamic_rotate %567 by %c1_i32_156 dim 0 : vector<16x128xf32>, i32 -> vector<16x128xf32>
    %569 = vector.broadcast %9 : vector<16x1xf32> to vector<16x128xf32>
    %570 = arith.maximumf %568, %569 : vector<16x128xf32>
    %c15_i32_157 = arith.constant 15 : i32
    %571 = tpu.dynamic_rotate %567 by %c15_i32_157 dim 0 : vector<16x128xf32>, i32 -> vector<16x128xf32>
    %572 = vector.broadcast %17 : vector<16x1xf32> to vector<16x128xf32>
    %573 = arith.maximumf %571, %572 : vector<16x128xf32>
    %c1_i32_158 = arith.constant 1 : i32
    %574 = tpu.dynamic_rotate %567 by %c1_i32_158 dim 1 : vector<16x128xf32>, i32 -> vector<16x128xf32>
    %575 = vector.broadcast %25 : vector<1x128xf32> to vector<16x128xf32>
    %576 = arith.maximumf %574, %575 : vector<16x128xf32>
    %c127_i32_159 = arith.constant 127 : i32
    %577 = tpu.dynamic_rotate %567 by %c127_i32_159 dim 1 : vector<16x128xf32>, i32 -> vector<16x128xf32>
    %578 = vector.broadcast %33 : vector<1x128xf32> to vector<16x128xf32>
    %579 = arith.maximumf %577, %578 : vector<16x128xf32>
    %580 = arith.minimumf %570, %573 : vector<16x128xf32>
    %581 = arith.minimumf %576, %579 : vector<16x128xf32>
    %582 = arith.minimumf %580, %581 : vector<16x128xf32>
    %583 = arith.minimumf %582, %567 : vector<16x128xf32>
    %c1_i32_160 = arith.constant 1 : i32
    %584 = tpu.dynamic_rotate %583 by %c1_i32_160 dim 0 : vector<16x128xf32>, i32 -> vector<16x128xf32>
    %585 = vector.broadcast %35 : vector<16x1xf32> to vector<16x128xf32>
    %586 = arith.minimumf %584, %585 : vector<16x128xf32>
    %c15_i32_161 = arith.constant 15 : i32
    %587 = tpu.dynamic_rotate %583 by %c15_i32_161 dim 0 : vector<16x128xf32>, i32 -> vector<16x128xf32>
    %588 = vector.broadcast %37 : vector<16x1xf32> to vector<16x128xf32>
    %589 = arith.minimumf %587, %588 : vector<16x128xf32>
    %590 = arith.maximumf %586, %589 : vector<16x128xf32>
    %591 = arith.maximumf %590, %583 : vector<16x128xf32>
    %c1_i32_162 = arith.constant 1 : i32
    %592 = tpu.dynamic_rotate %591 by %c1_i32_162 dim 1 : vector<16x128xf32>, i32 -> vector<16x128xf32>
    %593 = vector.broadcast %39 : vector<1x128xf32> to vector<16x128xf32>
    %594 = arith.minimumf %592, %593 : vector<16x128xf32>
    %c127_i32_163 = arith.constant 127 : i32
    %595 = tpu.dynamic_rotate %591 by %c127_i32_163 dim 1 : vector<16x128xf32>, i32 -> vector<16x128xf32>
    %596 = vector.broadcast %41 : vector<1x128xf32> to vector<16x128xf32>
    %597 = arith.minimumf %595, %596 : vector<16x128xf32>
    %598 = arith.maximumf %594, %597 : vector<16x128xf32>
    %599 = arith.maximumf %598, %591 : vector<16x128xf32>
    %600 = arith.subf %567, %599 : vector<16x128xf32>
    %cst_164 = arith.constant 0.000000e+00 : f32
    %601 = vector.broadcast %cst_164 : f32 to vector<16x128xf32>
    %602 = arith.maximumf %600, %601 : vector<16x128xf32>
    %c1_i32_165 = arith.constant 1 : i32
    %603 = tpu.dynamic_rotate %583 by %c1_i32_165 dim 0 : vector<16x128xf32>, i32 -> vector<16x128xf32>
    %604 = vector.broadcast %9 : vector<16x1xf32> to vector<16x128xf32>
    %605 = arith.maximumf %603, %604 : vector<16x128xf32>
    %c15_i32_166 = arith.constant 15 : i32
    %606 = tpu.dynamic_rotate %583 by %c15_i32_166 dim 0 : vector<16x128xf32>, i32 -> vector<16x128xf32>
    %607 = vector.broadcast %17 : vector<16x1xf32> to vector<16x128xf32>
    %608 = arith.maximumf %606, %607 : vector<16x128xf32>
    %c1_i32_167 = arith.constant 1 : i32
    %609 = tpu.dynamic_rotate %583 by %c1_i32_167 dim 1 : vector<16x128xf32>, i32 -> vector<16x128xf32>
    %610 = vector.broadcast %25 : vector<1x128xf32> to vector<16x128xf32>
    %611 = arith.maximumf %609, %610 : vector<16x128xf32>
    %c127_i32_168 = arith.constant 127 : i32
    %612 = tpu.dynamic_rotate %583 by %c127_i32_168 dim 1 : vector<16x128xf32>, i32 -> vector<16x128xf32>
    %613 = vector.broadcast %33 : vector<1x128xf32> to vector<16x128xf32>
    %614 = arith.maximumf %612, %613 : vector<16x128xf32>
    %615 = arith.minimumf %605, %608 : vector<16x128xf32>
    %616 = arith.minimumf %611, %614 : vector<16x128xf32>
    %617 = arith.minimumf %615, %616 : vector<16x128xf32>
    %618 = arith.minimumf %617, %583 : vector<16x128xf32>
    %c1_i32_169 = arith.constant 1 : i32
    %619 = tpu.dynamic_rotate %618 by %c1_i32_169 dim 0 : vector<16x128xf32>, i32 -> vector<16x128xf32>
    %620 = vector.broadcast %35 : vector<16x1xf32> to vector<16x128xf32>
    %621 = arith.minimumf %619, %620 : vector<16x128xf32>
    %c15_i32_170 = arith.constant 15 : i32
    %622 = tpu.dynamic_rotate %618 by %c15_i32_170 dim 0 : vector<16x128xf32>, i32 -> vector<16x128xf32>
    %623 = vector.broadcast %37 : vector<16x1xf32> to vector<16x128xf32>
    %624 = arith.minimumf %622, %623 : vector<16x128xf32>
    %625 = arith.maximumf %621, %624 : vector<16x128xf32>
    %626 = arith.maximumf %625, %618 : vector<16x128xf32>
    %c1_i32_171 = arith.constant 1 : i32
    %627 = tpu.dynamic_rotate %626 by %c1_i32_171 dim 1 : vector<16x128xf32>, i32 -> vector<16x128xf32>
    %628 = vector.broadcast %39 : vector<1x128xf32> to vector<16x128xf32>
    %629 = arith.minimumf %627, %628 : vector<16x128xf32>
    %c127_i32_172 = arith.constant 127 : i32
    %630 = tpu.dynamic_rotate %626 by %c127_i32_172 dim 1 : vector<16x128xf32>, i32 -> vector<16x128xf32>
    %631 = vector.broadcast %41 : vector<1x128xf32> to vector<16x128xf32>
    %632 = arith.minimumf %630, %631 : vector<16x128xf32>
    %633 = arith.maximumf %629, %632 : vector<16x128xf32>
    %634 = arith.maximumf %633, %626 : vector<16x128xf32>
    %635 = arith.subf %583, %634 : vector<16x128xf32>
    %cst_173 = arith.constant 0.000000e+00 : f32
    %636 = vector.broadcast %cst_173 : f32 to vector<16x128xf32>
    %637 = arith.maximumf %635, %636 : vector<16x128xf32>
    %638 = arith.maximumf %602, %637 : vector<16x128xf32>
    %c1_i32_174 = arith.constant 1 : i32
    %639 = tpu.dynamic_rotate %618 by %c1_i32_174 dim 0 : vector<16x128xf32>, i32 -> vector<16x128xf32>
    %640 = vector.broadcast %9 : vector<16x1xf32> to vector<16x128xf32>
    %641 = arith.maximumf %639, %640 : vector<16x128xf32>
    %c15_i32_175 = arith.constant 15 : i32
    %642 = tpu.dynamic_rotate %618 by %c15_i32_175 dim 0 : vector<16x128xf32>, i32 -> vector<16x128xf32>
    %643 = vector.broadcast %17 : vector<16x1xf32> to vector<16x128xf32>
    %644 = arith.maximumf %642, %643 : vector<16x128xf32>
    %c1_i32_176 = arith.constant 1 : i32
    %645 = tpu.dynamic_rotate %618 by %c1_i32_176 dim 1 : vector<16x128xf32>, i32 -> vector<16x128xf32>
    %646 = vector.broadcast %25 : vector<1x128xf32> to vector<16x128xf32>
    %647 = arith.maximumf %645, %646 : vector<16x128xf32>
    %c127_i32_177 = arith.constant 127 : i32
    %648 = tpu.dynamic_rotate %618 by %c127_i32_177 dim 1 : vector<16x128xf32>, i32 -> vector<16x128xf32>
    %649 = vector.broadcast %33 : vector<1x128xf32> to vector<16x128xf32>
    %650 = arith.maximumf %648, %649 : vector<16x128xf32>
    %651 = arith.minimumf %641, %644 : vector<16x128xf32>
    %652 = arith.minimumf %647, %650 : vector<16x128xf32>
    %653 = arith.minimumf %651, %652 : vector<16x128xf32>
    %654 = arith.minimumf %653, %618 : vector<16x128xf32>
    %c1_i32_178 = arith.constant 1 : i32
    %655 = tpu.dynamic_rotate %654 by %c1_i32_178 dim 0 : vector<16x128xf32>, i32 -> vector<16x128xf32>
    %656 = vector.broadcast %35 : vector<16x1xf32> to vector<16x128xf32>
    %657 = arith.minimumf %655, %656 : vector<16x128xf32>
    %c15_i32_179 = arith.constant 15 : i32
    %658 = tpu.dynamic_rotate %654 by %c15_i32_179 dim 0 : vector<16x128xf32>, i32 -> vector<16x128xf32>
    %659 = vector.broadcast %37 : vector<16x1xf32> to vector<16x128xf32>
    %660 = arith.minimumf %658, %659 : vector<16x128xf32>
    %661 = arith.maximumf %657, %660 : vector<16x128xf32>
    %662 = arith.maximumf %661, %654 : vector<16x128xf32>
    %c1_i32_180 = arith.constant 1 : i32
    %663 = tpu.dynamic_rotate %662 by %c1_i32_180 dim 1 : vector<16x128xf32>, i32 -> vector<16x128xf32>
    %664 = vector.broadcast %39 : vector<1x128xf32> to vector<16x128xf32>
    %665 = arith.minimumf %663, %664 : vector<16x128xf32>
    %c127_i32_181 = arith.constant 127 : i32
    %666 = tpu.dynamic_rotate %662 by %c127_i32_181 dim 1 : vector<16x128xf32>, i32 -> vector<16x128xf32>
    %667 = vector.broadcast %41 : vector<1x128xf32> to vector<16x128xf32>
    %668 = arith.minimumf %666, %667 : vector<16x128xf32>
    %669 = arith.maximumf %665, %668 : vector<16x128xf32>
    %670 = arith.maximumf %669, %662 : vector<16x128xf32>
    %671 = arith.subf %618, %670 : vector<16x128xf32>
    %cst_182 = arith.constant 0.000000e+00 : f32
    %672 = vector.broadcast %cst_182 : f32 to vector<16x128xf32>
    %673 = arith.maximumf %671, %672 : vector<16x128xf32>
    %674 = arith.maximumf %638, %673 : vector<16x128xf32>
    %c1_i32_183 = arith.constant 1 : i32
    %675 = tpu.dynamic_rotate %654 by %c1_i32_183 dim 0 : vector<16x128xf32>, i32 -> vector<16x128xf32>
    %676 = vector.broadcast %9 : vector<16x1xf32> to vector<16x128xf32>
    %677 = arith.maximumf %675, %676 : vector<16x128xf32>
    %c15_i32_184 = arith.constant 15 : i32
    %678 = tpu.dynamic_rotate %654 by %c15_i32_184 dim 0 : vector<16x128xf32>, i32 -> vector<16x128xf32>
    %679 = vector.broadcast %17 : vector<16x1xf32> to vector<16x128xf32>
    %680 = arith.maximumf %678, %679 : vector<16x128xf32>
    %c1_i32_185 = arith.constant 1 : i32
    %681 = tpu.dynamic_rotate %654 by %c1_i32_185 dim 1 : vector<16x128xf32>, i32 -> vector<16x128xf32>
    %682 = vector.broadcast %25 : vector<1x128xf32> to vector<16x128xf32>
    %683 = arith.maximumf %681, %682 : vector<16x128xf32>
    %c127_i32_186 = arith.constant 127 : i32
    %684 = tpu.dynamic_rotate %654 by %c127_i32_186 dim 1 : vector<16x128xf32>, i32 -> vector<16x128xf32>
    %685 = vector.broadcast %33 : vector<1x128xf32> to vector<16x128xf32>
    %686 = arith.maximumf %684, %685 : vector<16x128xf32>
    %687 = arith.minimumf %677, %680 : vector<16x128xf32>
    %688 = arith.minimumf %683, %686 : vector<16x128xf32>
    %689 = arith.minimumf %687, %688 : vector<16x128xf32>
    %690 = arith.minimumf %689, %654 : vector<16x128xf32>
    %c1_i32_187 = arith.constant 1 : i32
    %691 = tpu.dynamic_rotate %690 by %c1_i32_187 dim 0 : vector<16x128xf32>, i32 -> vector<16x128xf32>
    %692 = vector.broadcast %35 : vector<16x1xf32> to vector<16x128xf32>
    %693 = arith.minimumf %691, %692 : vector<16x128xf32>
    %c15_i32_188 = arith.constant 15 : i32
    %694 = tpu.dynamic_rotate %690 by %c15_i32_188 dim 0 : vector<16x128xf32>, i32 -> vector<16x128xf32>
    %695 = vector.broadcast %37 : vector<16x1xf32> to vector<16x128xf32>
    %696 = arith.minimumf %694, %695 : vector<16x128xf32>
    %697 = arith.maximumf %693, %696 : vector<16x128xf32>
    %698 = arith.maximumf %697, %690 : vector<16x128xf32>
    %c1_i32_189 = arith.constant 1 : i32
    %699 = tpu.dynamic_rotate %698 by %c1_i32_189 dim 1 : vector<16x128xf32>, i32 -> vector<16x128xf32>
    %700 = vector.broadcast %39 : vector<1x128xf32> to vector<16x128xf32>
    %701 = arith.minimumf %699, %700 : vector<16x128xf32>
    %c127_i32_190 = arith.constant 127 : i32
    %702 = tpu.dynamic_rotate %698 by %c127_i32_190 dim 1 : vector<16x128xf32>, i32 -> vector<16x128xf32>
    %703 = vector.broadcast %41 : vector<1x128xf32> to vector<16x128xf32>
    %704 = arith.minimumf %702, %703 : vector<16x128xf32>
    %705 = arith.maximumf %701, %704 : vector<16x128xf32>
    %706 = arith.maximumf %705, %698 : vector<16x128xf32>
    %707 = arith.subf %654, %706 : vector<16x128xf32>
    %cst_191 = arith.constant 0.000000e+00 : f32
    %708 = vector.broadcast %cst_191 : f32 to vector<16x128xf32>
    %709 = arith.maximumf %707, %708 : vector<16x128xf32>
    %710 = arith.maximumf %674, %709 : vector<16x128xf32>
    %711 = arith.mulf %44, %567 : vector<16x128xf32>
    %cst_192 = arith.constant dense<0.000000e+00> : vector<16x128xf32>
    %712 = tpu.matmul %711, %42, %cst_192 {dimension_numbers = #tpu.dot_dimension_numbers<[1], [0], [0], [1], [0, 0, 1, 1], [], []>} : vector<16x128xf32>, vector<128x128xf32>, vector<16x128xf32> -> vector<16x128xf32>
    %713 = vector.extract_strided_slice %712 {offsets = [0, 0], sizes = [16, 1], strides = [1, 1]} : vector<16x128xf32> to vector<16x1xf32>
    %714 = vector.shape_cast %713 : vector<16x1xf32> to vector<1x16x1xf32>
    %cst_193 = arith.constant dense<0.000000e+00> : vector<1xf32>
    %715 = vector.multi_reduction <add>, %714, %cst_193 [1, 2] : vector<1x16x1xf32> to vector<1xf32>
    %716 = vector.shape_cast %715 : vector<1xf32> to vector<1x1x1xf32>
    %717 = vector.extract %716[0, 0, 0] : f32 from vector<1x1x1xf32>
    %718 = arith.addf %531, %717 : f32
    %cst_194 = arith.constant dense<0.000000e+00> : vector<16x128xf32>
    %719 = tpu.matmul %567, %42, %cst_194 {dimension_numbers = #tpu.dot_dimension_numbers<[1], [0], [0], [1], [0, 0, 1, 1], [], []>} : vector<16x128xf32>, vector<128x128xf32>, vector<16x128xf32> -> vector<16x128xf32>
    %720 = vector.extract_strided_slice %719 {offsets = [0, 0], sizes = [16, 1], strides = [1, 1]} : vector<16x128xf32> to vector<16x1xf32>
    %721 = vector.shape_cast %720 : vector<16x1xf32> to vector<1x16x1xf32>
    %cst_195 = arith.constant dense<0.000000e+00> : vector<1xf32>
    %722 = vector.multi_reduction <add>, %721, %cst_195 [1, 2] : vector<1x16x1xf32> to vector<1xf32>
    %723 = vector.shape_cast %722 : vector<1xf32> to vector<1x1x1xf32>
    %724 = vector.extract %723[0, 0, 0] : f32 from vector<1x1x1xf32>
    %725 = arith.addf %538, %724 : f32
    %726 = arith.mulf %710, %44 : vector<16x128xf32>
    %cst_196 = arith.constant dense<0.000000e+00> : vector<16x128xf32>
    %727 = tpu.matmul %726, %42, %cst_196 {dimension_numbers = #tpu.dot_dimension_numbers<[1], [0], [0], [1], [0, 0, 1, 1], [], []>} : vector<16x128xf32>, vector<128x128xf32>, vector<16x128xf32> -> vector<16x128xf32>
    %728 = vector.extract_strided_slice %727 {offsets = [0, 0], sizes = [16, 1], strides = [1, 1]} : vector<16x128xf32> to vector<16x1xf32>
    %729 = vector.shape_cast %728 : vector<16x1xf32> to vector<1x16x1xf32>
    %cst_197 = arith.constant dense<0.000000e+00> : vector<1xf32>
    %730 = vector.multi_reduction <add>, %729, %cst_197 [1, 2] : vector<1x16x1xf32> to vector<1xf32>
    %731 = vector.shape_cast %730 : vector<1xf32> to vector<1x1x1xf32>
    %732 = vector.extract %731[0, 0, 0] : f32 from vector<1x1x1xf32>
    %733 = arith.addf %546, %732 : f32
    %cst_198 = arith.constant dense<0.000000e+00> : vector<16x128xf32>
    %734 = tpu.matmul %710, %42, %cst_198 {dimension_numbers = #tpu.dot_dimension_numbers<[1], [0], [0], [1], [0, 0, 1, 1], [], []>} : vector<16x128xf32>, vector<128x128xf32>, vector<16x128xf32> -> vector<16x128xf32>
    %735 = vector.extract_strided_slice %734 {offsets = [0, 0], sizes = [16, 1], strides = [1, 1]} : vector<16x128xf32> to vector<16x1xf32>
    %736 = vector.shape_cast %735 : vector<16x1xf32> to vector<1x16x1xf32>
    %cst_199 = arith.constant dense<0.000000e+00> : vector<1xf32>
    %737 = vector.multi_reduction <add>, %736, %cst_199 [1, 2] : vector<1x16x1xf32> to vector<1xf32>
    %738 = vector.shape_cast %737 : vector<1xf32> to vector<1x1x1xf32>
    %739 = vector.extract %738[0, 0, 0] : f32 from vector<1x1x1xf32>
    %740 = arith.addf %553, %739 : f32
    %741 = arith.mulf %187, %567 : vector<16x128xf32>
    %cst_200 = arith.constant dense<0.000000e+00> : vector<16x128xf32>
    %742 = tpu.matmul %741, %42, %cst_200 {dimension_numbers = #tpu.dot_dimension_numbers<[1], [0], [0], [1], [0, 0, 1, 1], [], []>} : vector<16x128xf32>, vector<128x128xf32>, vector<16x128xf32> -> vector<16x128xf32>
    %743 = vector.extract_strided_slice %742 {offsets = [0, 0], sizes = [16, 1], strides = [1, 1]} : vector<16x128xf32> to vector<16x1xf32>
    %744 = vector.shape_cast %743 : vector<16x1xf32> to vector<1x16x1xf32>
    %cst_201 = arith.constant dense<0.000000e+00> : vector<1xf32>
    %745 = vector.multi_reduction <add>, %744, %cst_201 [1, 2] : vector<1x16x1xf32> to vector<1xf32>
    %746 = vector.shape_cast %745 : vector<1xf32> to vector<1x1x1xf32>
    %747 = vector.extract %746[0, 0, 0] : f32 from vector<1x1x1xf32>
    %748 = arith.addf %561, %747 : f32
    %749 = tpu.iota {dimensions = array<i32: 1>} : vector<8x128xi32>
    %cst_202 = arith.constant 0.000000e+00 : f32
    %750 = vector.broadcast %cst_202 : f32 to vector<8x128xf32>
    %c0_i32 = arith.constant 0 : i32
    %751 = vector.broadcast %c0_i32 : i32 to vector<8x128xi32>
    %752 = arith.cmpi eq, %749, %751 : vector<8x128xi32>
    %753 = vector.broadcast %718 : f32 to vector<8x128xf32>
    %754 = arith.select %752, %753, %750 : vector<8x128xi1>, vector<8x128xf32>
    %c1_i32_203 = arith.constant 1 : i32
    %755 = vector.broadcast %c1_i32_203 : i32 to vector<8x128xi32>
    %756 = arith.cmpi eq, %749, %755 : vector<8x128xi32>
    %757 = vector.broadcast %725 : f32 to vector<8x128xf32>
    %758 = arith.select %756, %757, %754 : vector<8x128xi1>, vector<8x128xf32>
    %c2_i32 = arith.constant 2 : i32
    %759 = vector.broadcast %c2_i32 : i32 to vector<8x128xi32>
    %760 = arith.cmpi eq, %749, %759 : vector<8x128xi32>
    %761 = vector.broadcast %733 : f32 to vector<8x128xf32>
    %762 = arith.select %760, %761, %758 : vector<8x128xi1>, vector<8x128xf32>
    %c3_i32 = arith.constant 3 : i32
    %763 = vector.broadcast %c3_i32 : i32 to vector<8x128xi32>
    %764 = arith.cmpi eq, %749, %763 : vector<8x128xi32>
    %765 = vector.broadcast %740 : f32 to vector<8x128xf32>
    %766 = arith.select %764, %765, %762 : vector<8x128xi1>, vector<8x128xf32>
    %c4_i32 = arith.constant 4 : i32
    %767 = vector.broadcast %c4_i32 : i32 to vector<8x128xi32>
    %768 = arith.cmpi eq, %749, %767 : vector<8x128xi32>
    %769 = vector.broadcast %748 : f32 to vector<8x128xf32>
    %770 = arith.select %768, %769, %766 : vector<8x128xi1>, vector<8x128xf32>
    %c0_204 = arith.constant 0 : index
    %c0_205 = arith.constant 0 : index
    %c0_206 = arith.constant 0 : index
    %771 = vector.load %arg3[%c0_204, %c0_205, %c0_206] : memref<1x8x128xf32, #tpu.memory_space<vmem>>, vector<1x8x128xf32>
    %772 = vector.shape_cast %771 : vector<1x8x128xf32> to vector<8x128xf32>
    %773 = vector.shape_cast %770 : vector<8x128xf32> to vector<1x8x128xf32>
    tpu.vector_store %arg3[%c0_204, %c0_205, %c0_206], %773 {strides = array<i32>} : memref<1x8x128xf32, #tpu.memory_space<vmem>>, vector<1x8x128xf32>,
    return
  }
  func.func @transform_0(%arg0: i32) -> (i32, i32, i32, i32) {
    %c0_i32 = arith.constant 0 : i32
    %c0_i32_0 = arith.constant 0 : i32
    %c0_i32_1 = arith.constant 0 : i32
    %c0_i32_2 = arith.constant 0 : i32
    return %arg0, %c0_i32, %c0_i32_0, %c0_i32_1 : i32, i32, i32, i32
  }
  func.func @transform_1(%arg0: i32) -> (i32, i32, i32) {
    %c0_i32 = arith.constant 0 : i32
    %c0_i32_0 = arith.constant 0 : i32
    %c0_i32_1 = arith.constant 0 : i32
    return %arg0, %c0_i32, %c0_i32_0 : i32, i32, i32
  }
  func.func @transform_2(%arg0: i32) -> (i32, i32, i32) {
    %c0_i32 = arith.constant 0 : i32
    %c0_i32_0 = arith.constant 0 : i32
    %c0_i32_1 = arith.constant 0 : i32
    return %arg0, %c0_i32, %c0_i32_0 : i32, i32, i32
  }
}

</mosaic_0001>

<bundles_post_ra>
// kernel: soft_dice_cldice_loss.1
= control target key start
LH: loop header
LB: loop body
LE: loop exit
PB: predicated region body
PF: predicated region fallthrough
CT: control target
= control target key end

     0   :  { %7 = vsyncpa [#allocation3], 0  ;;  %s6074_s0 = inlined_call_operand.hbm [shape: f32[2,4,16,128], index: 0, kind: input, shape index: {}]   ;;  %s6075_s1 = inlined_call_operand.hbm [shape: f32[2,16,128], index: 1, kind: input, shape index: {}]   ;;  %s6076_s2 = inlined_call_operand.vmem [shape: f32[2,8,128], index: 2, kind: output, shape index: {}]  }
   0x1   :  { %9 = vsyncpa [#allocation3 + $0x1], 0 }
   0x2   :  { %10 = vsyncpa [#allocation5], 0 }
   0x3   :  { %12 = vsyncpa [#allocation5 + $0x1], 0  ;;  %s3992_s9 = smov 0   ;;  %s3994_s10 = smov 0  }
   0x4   :  { %s3996_s11 = smov 0   ;;  %s3998_s12 = smov 0  }
   0x5 LB: > { %s4011_s13 = sadd.s32 4294967295, %s3966_s12   ;;  %s4014_s14 = sadd.s32 1, %s3966_s12   ;;  %s3966_s12 = sphi %s3998_s12, %s6281_s12   ;;  %s3962_s11 = sphi %s3996_s11, %s6280_s11   ;;  %s3958_s10 = sphi %s3994_s10, %s6279_s10   ;;  %s3954_s9 = sphi %s3992_s9, %s6278_s9  }
   0x6   : > { %s22_s15 = ssub.s32 %s3966_s12, %s4014_s14  ;;  %s25_s16 = sadd.s32 1, %s3962_s11 }
   0x7   : > { %p23_p0 = scmp.eq.s32.totalorder %s22_s15, 0  ;;  %p32_p1 = scmp.ne.s32.totalorder %s3962_s11, %s3958_s10 }
   0x8   : > { %p33_p2 = scmp.eq.s32.totalorder %s3966_s12, 0  ;;  %p38_p3 = scmp.ne.s32.totalorder %s3958_s10, %s3954_s9 }
   0x9   : > { %s4024_s17 = scalar_select %p23_p0, %s3962_s11, %s25_s16  }
   0xa   : > { %p34_p4 = por %p33_p2, %p32_p1  ;;  %p39_p5 = scmp.eq.s32.totalorder %s4011_s13, 0 }
   0xb   : > { %p3696_p6 = scmp.lt.s32.totalorder %s3966_s12, 2  ;;  %s4033_s19 = sand.u32 1, %s3962_s11  }
   0xc   : > { %p4028_p7 = por %p39_p5, %p38_p3  ;;  %s2816_s20 = sshll.u32 %s4033_s19, 6 }
   0xd   : > { %s2858_s21 = sshll.u32 %s3966_s12, 10  ;;  %s118_s25 = scalar_lea.vmem [#allocation2], %s2816_s20 }
   0xe   : > { %s6152_s18 = scalar_select %p4028_p7, 1, 0 }
   0xf   : > { %s4040_s24 = scalar_lea.hbm %s6074_s0, %s2858_s21  ;;  %s125_s26 = sshll.u32 %s118_s25, 4  ;;  %s4042_s26 = int_to_ptr.vmem [resolvable:$true] %s125_s26 }
  0x10   : > { %p4044_p8 = pnand %p3696_p6, %p34_p4  ;;  %s115_s28 = scalar_lea.sflag [#allocation3], %s4033_s19 }
  0x11   : > { %s3872_s29 = scalar_lea.hbm %s4040_s24, 1024  ;;  %s3877_s4 = scalar_lea.hbm %s6074_s0, 2048 }
  0x12   : > { %p3873_p10 = scmp.ne.s32.totalorder %s4040_s24, %s3872_s29  ;;  %p3874_p11 = pneg %p4044_p8 }
  0x13   : > { %p3878_p0 = scmp.lt.s32.totalorder %s4040_s24, %s6074_s0  ;;  %p3879_p1 = scmp.lt.s32.totalorder %s3877_s4, %s3872_s29 }
  0x14   : > { %p3875_p12 = pnand %p3874_p11, %p3873_p10 }
  0x15   : > { %p3880_p2 = por %p3879_p1, %p3878_p0 }
  0x16   : > { %p3876_p13 = pneg %p3875_p12 }
  0x18   : > { %p3881_p3 = pnand %p3880_p2, %p3876_p13 }
  0x1a   : > { %3884 = shalt.err (!%p3881_p3)
}
  0x1b   : > { %s3885_s7 = scalar_lea.vmem %s4042_s26, 1024  ;;  %s3968_s8 = smov [#allocation2]  }
  0x1c   : > { %p3886_p4 = scmp.ne.s32.totalorder %s4042_s26, %s3885_s7  ;;  %s3890_s9 = sshll.u32 %s3968_s8, 4  ;;  %s3891_s9 = int_to_ptr.vmem [resolvable:$false] %s3890_s9 }
  0x1d   : > { %s3892_s15 = scalar_lea.vmem %s3891_s9, 2048  ;;  %p3893_p10 = scmp.lt.s32.totalorder %s4042_s26, %s3891_s9 }
  0x1e   : > { %p3888_p5 = pnand %p3886_p4, %p3874_p11  ;;  %p3894_p12 = scmp.lt.s32.totalorder %s3892_s15, %s3885_s7 }
  0x20   : > { %p3889_p6 = pneg %p3888_p5  ;;  %p3895_p9 = por %p3894_p12, %p3893_p10 }
  0x22   : > { %p3896_p0 = pnand %p3895_p9, %p3889_p6 }
  0x24   : > { %3899 = shalt.err (!%p3896_p0)
}
  0x25   : > { %s3969_s16 = smov 128   ;;  %s3970_s20 = smov 8  }
  0x26   : > { %3692 = dma.hbm_to_vmem [thread:$0]  (!%p4044_p8), %s4040_s24, 1024, %s4042_s26, %s115_s28, %s3969_s16, %s3969_s16, %s3970_s20  }
  0x27   : > { %p154_p9 = scmp.lt.s32.totalorder %s3966_s12, 3  ;;  %s2819_s21 = sshll.u32 %s4033_s19, 4 }
  0x28   : > { %s2859_s22 = sshll.u32 %s3966_s12, 8  ;;  %p6154_p13 = scmp.ge.s32.totalorder %s3966_s12, 1 }
  0x29   : > { %s4091_s30 = scalar_lea.hbm %s6075_s1, %s2859_s22  ;;  %s139_s3 = scalar_lea.vmem [#allocation4], %s2819_s21 }
  0x2a   : > { %p4084_p1 = pnand %p6154_p13, %p154_p9  ;;  %s146_s4 = sshll.u32 %s139_s3, 4  ;;  %s4093_s4 = int_to_ptr.vmem [resolvable:$true] %s146_s4 }
  0x2b   : > { %s136_s24 = scalar_lea.sflag [#allocation5], %s4033_s19  ;;  %s3900_s26 = scalar_lea.hbm %s4091_s30, 256 }
  0x2c   : > { %p3901_p2 = scmp.ne.s32.totalorder %s4091_s30, %s3900_s26  ;;  %s3905_s5 = scalar_lea.hbm %s6075_s1, 512 }
  0x2d   : > { %p3906_p5 = scmp.lt.s32.totalorder %s4091_s30, %s6075_s1  ;;  %p3907_p6 = scmp.lt.s32.totalorder %s3905_s5, %s3900_s26 }
  0x2e   : > { %p3903_p3 = pnand %p3901_p2, %p3874_p11 }
  0x2f   : > { %p3908_p10 = por %p3907_p6, %p3906_p5 }
  0x30   : > { %p3904_p4 = pneg %p3903_p3 }
  0x32   : > { %p3909_p12 = pnand %p3908_p10, %p3904_p4 }
  0x34   : > { %3912 = shalt.err (!%p3909_p12)
}
  0x35   : > { %s3913_s19 = scalar_lea.vmem %s4093_s4, 256  ;;  %s3971_s8 = smov [#allocation4]  }
  0x36   : > { %p3914_p0 = scmp.ne.s32.totalorder %s4093_s4, %s3913_s19  ;;  %s3918_s9 = sshll.u32 %s3971_s8, 4  ;;  %s3919_s9 = int_to_ptr.vmem [resolvable:$false] %s3918_s9 }
  0x37   : > { %s3920_s15 = scalar_lea.vmem %s3919_s9, 512  ;;  %p3921_p2 = scmp.lt.s32.totalorder %s4093_s4, %s3919_s9 }
  0x38   : > { %p3916_p9 = pnand %p3914_p0, %p3874_p11  ;;  %p3922_p3 = scmp.lt.s32.totalorder %s3920_s15, %s3913_s19 }
  0x3a   : > { %p3917_p13 = pneg %p3916_p9  ;;  %p3923_p7 = por %p3922_p3, %p3921_p2 }
  0x3c   : > { %p3924_p5 = pnand %p3923_p7, %p3917_p13 }
  0x3e   : > { %3927 = shalt.err (!%p3924_p5)
}
  0x3f   : > { %3695 = dma.hbm_to_vmem [thread:$0]  (!%p4044_p8), %s4091_s30, 256, %s4093_s4, %s136_s24, %s3969_s16, %s3969_s16, %s3970_s20  }
  0x40   : > { %158 = sbr.rel (%p4084_p1) target bundleno = 1467 (0x5bb), region = 28 }
  0x45   : > { %s160_s21 = sand.u32 1, %s3958_s10   ;;  %p6156_p7 = scmp.ne.s32.totalorder %s6152_s18, 0 }
  0x46   : > { %s2823_s22 = sshll.u32 %s160_s21, 6  ;;  %s161_s25 = scalar_lea.sflag [#allocation3], %s160_s21 }
  0x47   : > { %s4124_s29 = scalar_lea.vmem [#allocation2], %s2823_s22 }
  0x48   : > { %3945 = dma.done.wait (%p6156_p7), %s161_s25, 1024  }
  0x49   : > { %3947 = vsyncadd (%p6156_p7), %s161_s25, 4294966272  ;;  %s2824_s27 = sshll.u32 %s160_s21, 4  ;;  %s170_s3 = scalar_lea.sflag [#allocation5], %s160_s21 }
  0x4a   : > { %s4130_s26 = scalar_lea.vmem [#allocation4], %s2824_s27 }
  0x4b   : > { %3949 = dma.done.wait (%p6156_p7), %s170_s3, 256  }
  0x4c   : > { %3951 = vsyncadd (%p6156_p7), %s170_s3, 4294967040  ;;  %v202_v0 = vlaneseq  ;;  %v3972_v1 = vmov 0   ;;  %s3973_s16 = smov 1   ;;  %v4148_v9 = vld [vmem:[%s4124_s29 + $0x10] sm:$0xff]  ;;  %v4151_v10 = vld [vmem:[%s4124_s29 + $0x18] sm:$0xff]  ;;  %s3974_s18 = smov 127  }
  0x4d   : > { %3736 = vset.pattern.permute.xlu1 %v3972_v1  ;;  %3807 = vset.pattern.permute.xlu0 %v3972_v1  ;;  %vm584_vm2 = vcmp.gt.f32.partialorder %v4148_v9, 0.5  ;;  %vm585_vm3 = vcmp.gt.f32.partialorder %v4151_v10, 0.5  ;;  %v3975_v23 = vmov 0.0   ;;  %v4195_v36 = vld [vmem:[%s4130_s26] sm:$0xff]  ;;  %v4205_v38 = vld [vmem:[%s4130_s26 + $0x8] sm:$0xff]  ;;  %vm921_vm14 = vcmask 7168  }
  0x4e   : > { %v4136_v2 = vand.u32 127, %v202_v0  ;;  %v4138_v3 = vshrl.u32 %v202_v0, 7  ;;  %v4170_v24 = vsel %vm584_vm2, 1.0, %v3975_v23  ;;  %v4175_v25 = vsel %vm585_vm3, 1.0, %v3975_v23  ;;  %p198_p8 = scmp.lt.s32.totalorder %s4011_s13, 1 }
  0x4f   : > { %6158 = vst [vmem:[#allocation9_spill] sm:$0xff] %v4170_v24  ;;  %6159 = vst [vmem:[#allocation10_spill] sm:$0xff] %v4175_v25  ;;  %v3747_v30 = vpack.i.bf16 %v4175_v25, %v4170_v24  ;;  %v597_v56 = vrot.slane %v4175_v25, 1  ;;  %v596_v57 = vrot.slane %v4170_v24, 1  ;;  %v591_v59 = vrot.slane %v4175_v25, 7 }
  0x50   : > { %6157 = vst [vmem:[#allocation8_spill] sm:$0xff] %v4136_v2  ;;  %245 = vrot.lane.b32.xlu0 %v4136_v2, %s3973_s16  ;;  %v204_v4 = vadd.s32 8, %v4138_v3  ;;  %v207_v5 = vrot.slane %v4138_v3, 7  ;;  %vm209_vm0 = vcmp.lt.s32.totalorder %v4138_v3, 1  ;;  %vm228_vm1 = vcmp.lt.s32.totalorder %v4138_v3, 7  ;;  %s6283_s13 = smov (!%p198_p8, %s4011_s13), 1 }
  0x51   : > { %v226_v6 = vrot.slane %v4138_v3, 1  ;;  %v309_v47 = vsub.s32 0, %v4138_v3  ;;  %v590_v60 = vrot.slane %v4170_v24, 7  ;;  %v272_v63 = vrot.slane %v4205_v38, 7 }
  0x52   : > { %v208_v7 = vrot.slane %v204_v4, 7  ;;  %v227_v8 = vrot.slane %v204_v4, 1  ;;  %v598_v0 = vsel %vm228_vm1, %v596_v57, %v597_v56 }
  0x54   : > { %v210_v11 = vsel %vm209_vm0, %v207_v5, %v208_v7  ;;  %v211_v12 = vsel %vm209_vm0, %v208_v7, %v207_v5  ;;  %254 = vrot.lane.b32.xlu0 %v4136_v2, %s3974_s18  ;;  %v229_v13 = vsel %vm228_vm1, %v226_v6, %v227_v8  ;;  %v230_v14 = vsel %vm228_vm1, %v227_v8, %v226_v6 }
  0x55   : > { %v212_v15 = vsub.s32 %v211_v12, %v4138_v3  ;;  %v213_v16 = vsub.s32 %v210_v11, %v204_v4  ;;  %v231_v17 = vsub.s32 %v229_v13, %v4138_v3  ;;  %v232_v18 = vsub.s32 %v230_v14, %v204_v4 }
  0x56   : > { %v599_v6 = vsel %vm228_vm1, %v597_v56, %v596_v57  ;;  %v288_v12 = vrot.slane %v4205_v38, 1  ;;  %v271_v13 = vrot.slane %v4195_v36, 7 }
  0x57   : > { %v215_v19 = vsub.s32 0, %v212_v15  ;;  %v218_v20 = vsub.s32 0, %v213_v16  ;;  %v234_v21 = vsub.s32 0, %v231_v17  ;;  %v237_v22 = vsub.s32 0, %v232_v18 }
  0x58   : > { %3748 = vrot.lane.b32.xlu0 %v3747_v30, %s3973_s16 }
  0x59   : > { %v2826_v26 = vmin.u32 %v215_v19, %v212_v15  ;;  %v2827_v27 = vmin.u32 %v218_v20, %v213_v16  ;;  %v2830_v28 = vmin.u32 %v234_v21, %v231_v17  ;;  %v2831_v29 = vmin.u32 %v237_v22, %v232_v18 }
  0x5a   : > { %v287_v15 = vrot.slane %v4195_v36, 1  ;;  %v592_v17 = vsel %vm209_vm0, %v590_v60, %v591_v59  ;;  %v593_v18 = vsel %vm209_vm0, %v591_v59, %v590_v60 }
  0x5b   : > { %vm220_vm4 = vcmp.ne.s32.totalorder %v2826_v26, 1  ;;  %vm221_vm5 = vcmp.ne.s32.totalorder %v2827_v27, 1  ;;  %vm239_vm6 = vcmp.ne.s32.totalorder %v2830_v28, 1  ;;  %vm240_vm7 = vcmp.ne.s32.totalorder %v2831_v29, 1 }
  0x5c   : > { %v4180_v31 = vsel %vm220_vm4, 1.0, %v3975_v23  ;;  %v4183_v32 = vsel %vm221_vm5, 1.0, %v3975_v23  ;;  %v4186_v33 = vsel %vm239_vm6, 1.0, %v3975_v23  ;;  %v4189_v34 = vsel %vm240_vm7, 1.0, %v3975_v23  ;;  %303 = vrot.lane.b32.xlu0 %v4195_v36, %s3973_s16 }
  0x5d   : > { %v3737_v35 = vpack.i.bf16 %v4183_v32, %v4180_v31  ;;  %v3742_v37 = vpack.i.bf16 %v4189_v34, %v4186_v33 }
  0x5f   : > { %3738 = vperm.xlu1 %3736, %v3737_v35  }
  0x60   : > { %313 = vrot.lane.b32.xlu0 %v4195_v36, %s3974_s18 }
  0x63   : > { %3743 = vperm.xlu1 %3736, %v3742_v37   ;;  %v4257_v37 = vld [vmem:[%s4124_s29 + $0x20] sm:$0xff] }
  0x64   : > { %6165 = vst [vmem:[#allocation16_spill] sm:$0xff] %v4257_v37  ;;  %vm1294_vm10 = vcmp.gt.f32.partialorder %v4257_v37, 0.5 }
  0x67   : > { %3753 = vrot.lane.b32.xlu1 %v3747_v30, %s3974_s18 }
  0x6b   : > { %305 = vrot.lane.b32.xlu1 %v4205_v38, %s3973_s16 }
  0x6f   : > { %315 = vrot.lane.b32.xlu1 %v4205_v38, %s3974_s18 }
  0xc2   : > { %v246_v39 = vpop.permute.xlu0 %245 }
  0xc3   : > { %v247_v40 = vsub.s32 %v246_v39, %v4136_v2  ;;  %v274_v39 = vsel %vm209_vm0, %v272_v63, %v271_v13 }
  0xc5   : > { %v249_v41 = vsub.s32 0, %v247_v40 }
  0xc6   : > { %v255_v42 = vpop.permute.xlu0 %254 }
  0xc7   : > { %v2834_v43 = vmin.u32 %v249_v41, %v247_v40  ;;  %v256_v44 = vsub.s32 %v255_v42, %v4136_v2  ;;  %v289_v40 = vsel %vm228_vm1, %v287_v15, %v288_v12  ;;  %v290_v42 = vsel %vm228_vm1, %v288_v12, %v287_v15 }
  0xc9   : > { %vm251_vm8 = vcmp.ne.s32.totalorder %v2834_v43, 1  ;;  %v258_v45 = vsub.s32 0, %v256_v44  ;;  %v4266_v43 = vld [vmem:[%s4124_s29 + $0x28] sm:$0xff] }
  0xca   : > { %v2835_v46 = vsel %vm251_vm8, 1.0, %v3975_v23  ;;  %v3749_v55 = vpop.permute.xlu0 %3748  ;;  %6166 = vst [vmem:[#allocation17_spill] sm:$0xff] %v4266_v43  ;;  %vm1295_vm11 = vcmp.gt.f32.partialorder %v4266_v43, 0.5 }
  0xcb   : > { %v267_v48 = vsub.f32 1.0, %v2835_v46  ;;  %v2836_v49 = vmin.u32 %v258_v45, %v256_v44  ;;  %v4231_v1 = vrot.slane %v2835_v46, %v309_v47  ;;  %v3751_v4 = vunpack.i.h.bf16 %v3749_v55 }
  0xcc   : > { %v3750_v5 = vunpack.i.l.bf16 %v3749_v55 }
  0xcd   : > { %v4215_v50 = vrot.slane %v267_v48, %v309_v47  ;;  %vm260_vm9 = vcmp.ne.s32.totalorder %v2836_v49, 1  ;;  %v607_v26 = vmax.f32 %v3751_v4, %v4231_v1  ;;  %v273_v49 = vsel %vm209_vm0, %v271_v13, %v272_v63 }
  0xce   : > { %v2837_v51 = vsel %vm260_vm9, 1.0, %v3975_v23  ;;  %v304_v11 = vpop.permute.xlu0 %303  ;;  %v606_v27 = vmax.f32 %v3750_v5, %v4231_v1 }
  0xcf   : > { %6160 = vst [vmem:[#allocation11_spill] sm:$0xff] %v4215_v50  ;;  %v268_v52 = vsub.f32 1.0, %v2837_v51  ;;  %v4241_v14 = vrot.slane %v2837_v51, %v309_v47  ;;  %v311_v55 = vmax.f32 %v304_v11, %v4231_v1  ;;  %v4294_v11 = vsel %vm1295_vm11, 1.0, %v3975_v23 }
  0xd0   : > { %6169 = vst [vmem:[#allocation20_spill] sm:$0xff] %v4294_v11 }
  0xd1   : > { %v4218_v53 = vrot.slane %v268_v52, %v309_v47 }
  0xd2   : > { %v314_v44 = vpop.permute.xlu0 %313 }
  0xd3   : > { %6161 = vst [vmem:[#allocation12_spill] sm:$0xff] %v4218_v53  ;;  %v321_v57 = vmax.f32 %v314_v44, %v4241_v14 }
  0xda   : > { %v3739_v54 = vpop.permute.xlu1 %3738 }
  0xdb   : > { %v4235_v7 = vunpack.i.h.bf16 %v3739_v54  ;;  %v4237_v8 = vunpack.i.l.bf16 %v3739_v54 }
  0xdd   : > { %6163 = vst [vmem:[#allocation14_spill] sm:$0xff] %v4235_v7  ;;  %6164 = vst [vmem:[#allocation15_spill] sm:$0xff] %v4237_v8  ;;  %v594_v29 = vmax.f32 %v593_v18, %v4237_v8  ;;  %v595_v30 = vmax.f32 %v592_v17, %v4235_v7  ;;  %v285_v56 = vmax.f32 %v274_v39, %v4237_v8  ;;  %v4327_v39 = vld [vmem:[%s4124_s29 + $0x30] sm:$0xff] }
  0xde   : > { %v3744_v58 = vpop.permute.xlu1 %3743  ;;  %v286_v5 = vmax.f32 %v273_v49, %v4235_v7  ;;  %v325_v17 = vmin.f32 %v311_v55, %v321_v57  ;;  %6172 = vst [vmem:[#allocation23_spill] sm:$0xff] %v4327_v39  ;;  %vm2003_vm12 = vcmp.gt.f32.partialorder %v4327_v39, 0.5 }
  0xdf   : > { %v4224_v61 = vunpack.i.h.bf16 %v3744_v58  ;;  %v4226_v62 = vunpack.i.l.bf16 %v3744_v58 }
  0xe1   : > { %6162 = vst [vmem:[#allocation13_spill] sm:$0xff] %v4226_v62  ;;  %v600_v21 = vmax.f32 %v598_v0, %v4226_v62  ;;  %v601_v22 = vmax.f32 %v599_v6, %v4224_v61  ;;  %v301_v51 = vmax.f32 %v289_v40, %v4226_v62  ;;  %v302_v59 = vmax.f32 %v290_v42, %v4224_v61 }
  0xe2   : > { %v3754_v16 = vpop.permute.xlu1 %3753  ;;  %v4289_v6 = vsel %vm1294_vm10, 1.0, %v3975_v23 }
  0xe3   : > { %v3756_v19 = vunpack.i.h.bf16 %v3754_v16  ;;  %v3755_v20 = vunpack.i.l.bf16 %v3754_v16  ;;  %v614_v45 = vmin.f32 %v594_v29, %v600_v21  ;;  %v615_v46 = vmin.f32 %v595_v30, %v601_v22  ;;  %6168 = vst [vmem:[#allocation19_spill] sm:$0xff] %v4289_v6 }
  0xe4   : > { %v323_v12 = vmin.f32 %v285_v56, %v301_v51  ;;  %v3772_v16 = vpack.i.bf16 %v4294_v11, %v4289_v6  ;;  %v324_v18 = vmin.f32 %v286_v5, %v302_v59  ;;  %v4365_v56 = vsel %vm2003_vm12, 1.0, %v3975_v23 }
  0xe5   : > { %v613_v28 = vmax.f32 %v3756_v19, %v4241_v14  ;;  %v612_v35 = vmax.f32 %v3755_v20, %v4241_v14  ;;  %6174 = vst [vmem:[#allocation25_spill] sm:$0xff] %v4365_v56 }
  0xe6   : > { %v306_v41 = vpop.permute.xlu1 %305  ;;  %v327_v19 = vmin.f32 %v323_v12, %v325_v17 }
  0xe7   : > { %v616_v47 = vmin.f32 %v606_v27, %v612_v35  ;;  %v617_v48 = vmin.f32 %v607_v26, %v613_v28  ;;  %v312_v0 = vmax.f32 %v306_v41, %v4231_v1  ;;  %v1306_v26 = vrot.slane %v4289_v6, 1 }
  0xe8   : > { %v4305_v21 = vmin.f32 %v327_v19, %v4195_v36  ;;  %v1307_v36 = vrot.slane %v4294_v11, 1  ;;  %v1301_v27 = vrot.slane %v4294_v11, 7 }
  0xe9   : > { %v618_v52 = vmin.f32 %v614_v45, %v616_v47  ;;  %v619_v54 = vmin.f32 %v615_v46, %v617_v48  ;;  %v4338_v45 = vld [vmem:[%s4124_s29 + $0x38] sm:$0xff] }
  0xea   : > { %v316_v58 = vpop.permute.xlu1 %315  ;;  %6170 = vst [vmem:[#allocation21_spill] sm:$0xff] %v4305_v21  ;;  %v1308_v40 = vsel %vm228_vm1, %v1306_v26, %v1307_v36  ;;  %v1309_v41 = vsel %vm228_vm1, %v1307_v36, %v1306_v26  ;;  %6173 = vst [vmem:[#allocation24_spill] sm:$0xff] %v4338_v45  ;;  %vm2004_vm13 = vcmp.gt.f32.partialorder %v4338_v45, 0.5 }
  0xeb   : > { %v4278_v60 = vmin.f32 %v618_v52, %v4170_v24  ;;  %v4281_v63 = vmin.f32 %v619_v54, %v4175_v25  ;;  %v322_v4 = vmax.f32 %v316_v58, %v4241_v14  ;;  %v1310_v51 = vmax.f32 %v1308_v40, %v4226_v62 }
  0xec   : > { %v1311_v52 = vmax.f32 %v1309_v41, %v4224_v61  ;;  %v331_v40 = vrot.slane %v4305_v21, 7 }
  0xed   : > { %6167 = vst [vmem:[#allocation18_spill] sm:$0xff] %v4278_v60  ;;  %v326_v13 = vmin.f32 %v312_v0, %v322_v4  ;;  %v3762_v15 = vpack.i.bf16 %v4281_v63, %v4278_v60  ;;  %v622_v28 = vrot.slane %v4278_v60, 7  ;;  %v623_v29 = vrot.slane %v4281_v63, 7 }
  0xee   : > { %v628_v30 = vrot.slane %v4278_v60, 1  ;;  %v629_v35 = vrot.slane %v4281_v63, 1 }
  0xef   : > { %3763 = vrot.lane.b32.xlu1 %v3762_v15, %s3974_s18  ;;  %3758 = vrot.lane.b32.xlu0 %v3762_v15, %s3973_s16  ;;  %v328_v20 = vmin.f32 %v324_v18, %v326_v13  ;;  %v4343_v46 = vsel %vm209_vm0, %v622_v28, %v623_v29  ;;  %v4347_v47 = vsel %vm209_vm0, %v623_v29, %v622_v28 }
  0xf0   : > { %v4351_v48 = vsel %vm228_vm1, %v628_v30, %v629_v35  ;;  %v4355_v49 = vsel %vm228_vm1, %v629_v35, %v628_v30  ;;  %v658_v58 = vmax.f32 %v4347_v47, %v4237_v8  ;;  %v659_v59 = vmax.f32 %v4343_v46, %v4235_v7 }
  0xf1   : > { %v4308_v22 = vmin.f32 %v328_v20, %v4205_v38  ;;  %v1300_v38 = vrot.slane %v4289_v6, 7  ;;  %v660_v0 = vmax.f32 %v4351_v48, %v4226_v62  ;;  %v661_v4 = vmax.f32 %v4355_v49, %v4224_v61 }
  0xf2   : > { %v4379_v20 = vsel %vm2004_vm13, 1.0, %v3975_v23 }
  0xf3   : > { %3773 = vrot.lane.b32.xlu1 %v3772_v16, %s3974_s18  ;;  %3768 = vrot.lane.b32.xlu0 %v3772_v16, %s3973_s16  ;;  %6171 = vst [vmem:[#allocation22_spill] sm:$0xff] %v4308_v22  ;;  %v1302_v42 = vsel %vm209_vm0, %v1300_v38, %v1301_v27  ;;  %v1303_v44 = vsel %vm209_vm0, %v1301_v27, %v1300_v38  ;;  %v332_v19 = vrot.slane %v4308_v22, 7  ;;  %6175 = vst [vmem:[#allocation26_spill] sm:$0xff] %v4379_v20 }
  0xf4   : > { %v1304_v54 = vmax.f32 %v1303_v44, %v4237_v8  ;;  %v1305_v55 = vmax.f32 %v1302_v42, %v4235_v7  ;;  %v674_v28 = vmin.f32 %v658_v58, %v660_v0  ;;  %v675_v29 = vmin.f32 %v659_v59, %v661_v4 }
  0xf5   : > { %v348_v41 = vrot.slane %v4308_v22, 1 }
  0xf6   : > { %v1324_v17 = vmin.f32 %v1304_v54, %v1310_v51  ;;  %v1325_v18 = vmin.f32 %v1305_v55, %v1311_v52  ;;  %v4389_v55 = vsel %vm209_vm0, %v332_v19, %v331_v40 }
  0xf7   : > { %399 = vrot.lane.b32.xlu0 %v4305_v21, %s3973_s16  ;;  %401 = vrot.lane.b32.xlu1 %v4308_v22, %s3973_s16  ;;  %6176 = vst [vmem:[#allocation27_spill] sm:$0xff] %v4389_v55 }
  0xfb   : > { %405 = vrot.lane.b32.xlu0 %v4305_v21, %s3974_s18  ;;  %407 = vrot.lane.b32.xlu1 %v4308_v22, %s3974_s18 }
 0x161   : > { %v3764_v57 = vpop.permute.xlu1 %3763  ;;  %v3759_v5 = vpop.permute.xlu0 %3758 }
 0x162   : > { %v3766_v12 = vunpack.i.h.bf16 %v3764_v57  ;;  %v3765_v13 = vunpack.i.l.bf16 %v3764_v57  ;;  %v3761_v15 = vunpack.i.h.bf16 %v3759_v5  ;;  %v3760_v16 = vunpack.i.l.bf16 %v3759_v5 }
 0x163   : > { %v347_v57 = vrot.slane %v4305_v21, 1 }
 0x164   : > { %v673_v26 = vmax.f32 %v3766_v12, %v4241_v14  ;;  %v672_v36 = vmax.f32 %v3765_v13, %v4241_v14  ;;  %v667_v38 = vmax.f32 %v3761_v15, %v4231_v1  ;;  %v666_v27 = vmax.f32 %v3760_v16, %v4231_v1 }
 0x165   : > { %v3774_v30 = vpop.permute.xlu1 %3773  ;;  %v3769_v35 = vpop.permute.xlu0 %3768  ;;  %v4398_v16 = vsel %vm228_vm1, %v347_v57, %v348_v41 }
 0x166   : > { %v677_v42 = vmin.f32 %v667_v38, %v673_v26  ;;  %v676_v44 = vmin.f32 %v666_v27, %v672_v36  ;;  %v3776_v23 = vunpack.i.h.bf16 %v3774_v30  ;;  %v3775_v51 = vunpack.i.l.bf16 %v3774_v30  ;;  %6177 = vst [vmem:[#allocation28_spill] sm:$0xff] %v4398_v16 }
 0x167   : > { %v3771_v52 = vunpack.i.h.bf16 %v3769_v35  ;;  %v3770_v54 = vunpack.i.l.bf16 %v3769_v35  ;;  %v4402_v26 = vsel %vm209_vm0, %v331_v40, %v332_v19  ;;  %v4412_v27 = vsel %vm228_vm1, %v348_v41, %v347_v57 }
 0x168   : > { %v679_v58 = vmin.f32 %v675_v29, %v677_v42  ;;  %v678_v59 = vmin.f32 %v674_v28, %v676_v44  ;;  %v1323_v0 = vmax.f32 %v3776_v23, %v4241_v14  ;;  %v1322_v4 = vmax.f32 %v3775_v51, %v4241_v14  ;;  %6178 = vst [vmem:[#allocation29_spill] sm:$0xff] %v4402_v26 }
 0x169   : > { %v1317_v5 = vmax.f32 %v3771_v52, %v4231_v1  ;;  %v1316_v12 = vmax.f32 %v3770_v54, %v4231_v1  ;;  %v400_v13 = vpop.permute.xlu0 %399  ;;  %v402_v15 = vpop.permute.xlu1 %401  ;;  %6180 = vst [vmem:[#allocation31_spill] sm:$0xff] %v4412_v27  ;;  %v3787_v28 = vpack.i.bf16 %v4379_v20, %v4365_v56  ;;  %v395_v35 = vmax.f32 %v4389_v55, %v4237_v8 }
 0x16a   : > { %v4405_v36 = vmin.f32 %v679_v58, %v4281_v63  ;;  %v4408_v38 = vmin.f32 %v678_v59, %v4278_v60  ;;  %v397_v19 = vmax.f32 %v4398_v16, %v4226_v62  ;;  %v396_v40 = vmax.f32 %v4402_v26, %v4235_v7 }
 0x16b   : > { %v1327_v29 = vmin.f32 %v1317_v5, %v1323_v0  ;;  %v1326_v30 = vmin.f32 %v1316_v12, %v1322_v4  ;;  %v403_v23 = vmax.f32 %v400_v13, %v4231_v1  ;;  %v398_v54 = vmax.f32 %v4412_v27, %v4224_v61 }
 0x16c   : > { %6179 = vst [vmem:[#allocation30_spill] sm:$0xff] %v4408_v38  ;;  %v3777_v42 = vpack.i.bf16 %v4405_v36, %v4408_v38  ;;  %v404_v57 = vmax.f32 %v402_v15, %v4231_v1  ;;  %v411_v5 = vmin.f32 %v395_v35, %v397_v19  ;;  %v265_v35 = vsub.f32 1.0, %v4186_v33 }
 0x16d   : > { %v1329_v44 = vmin.f32 %v1325_v18, %v1327_v29  ;;  %v1328_v41 = vmin.f32 %v1324_v17, %v1326_v30  ;;  %v406_v51 = vpop.permute.xlu0 %405  ;;  %v408_v52 = vpop.permute.xlu1 %407  ;;  %v412_v12 = vmin.f32 %v396_v40, %v398_v54  ;;  %v2015_v19 = vrot.slane %v4365_v56, 1 }
 0x16e   : > { %v409_v58 = vmax.f32 %v406_v51, %v4241_v14  ;;  %v410_v59 = vmax.f32 %v408_v52, %v4241_v14  ;;  %3778 = vrot.lane.b32.xlu0 %v3777_v42, %s3973_s16  ;;  %3783 = vrot.lane.b32.xlu1 %v3777_v42, %s3974_s18  ;;  %v2016_v40 = vrot.slane %v4379_v20, 1  ;;  %v2009_v51 = vrot.slane %v4365_v56, 7 }
 0x16f   : > { %v4433_v18 = vmin.f32 %v1329_v44, %v4294_v11  ;;  %v4436_v17 = vmin.f32 %v1328_v41, %v4289_v6  ;;  %v682_v44 = vrot.slane %v4408_v38, 7  ;;  %v683_v41 = vrot.slane %v4405_v36, 7 }
 0x170   : > { %v413_v0 = vmin.f32 %v403_v23, %v409_v58  ;;  %v414_v4 = vmin.f32 %v404_v57, %v410_v59  ;;  %v689_v23 = vrot.slane %v4405_v36, 1  ;;  %v2010_v52 = vrot.slane %v4379_v20, 7 }
 0x171   : > { %6181 = vst [vmem:[#allocation32_spill] sm:$0xff] %v4433_v18  ;;  %6182 = vst [vmem:[#allocation33_spill] sm:$0xff] %v4436_v17  ;;  %v3797_v29 = vpack.i.bf16 %v4433_v18, %v4436_v17  ;;  %v2017_v33 = vsel %vm228_vm1, %v2015_v19, %v2016_v40  ;;  %v2018_v54 = vsel %vm228_vm1, %v2016_v40, %v2015_v19 }
 0x172   : > { %3788 = vrot.lane.b32.xlu0 %v3787_v28, %s3973_s16  ;;  %3793 = vrot.lane.b32.xlu1 %v3787_v28, %s3974_s18  ;;  %v415_v13 = vmin.f32 %v411_v5, %v413_v0  ;;  %v416_v15 = vmin.f32 %v412_v12, %v414_v4  ;;  %v263_v28 = vsub.f32 1.0, %v4180_v31  ;;  %v688_v31 = vrot.slane %v4408_v38, 1 }
 0x173   : > { %v4474_v57 = vsel %vm209_vm0, %v682_v44, %v683_v41  ;;  %v4478_v58 = vsel %vm209_vm0, %v683_v41, %v682_v44  ;;  %v2011_v4 = vsel %vm209_vm0, %v2009_v51, %v2010_v52  ;;  %v2012_v5 = vsel %vm209_vm0, %v2010_v52, %v2009_v51 }
 0x174   : > { %v4445_v30 = vmin.f32 %v415_v13, %v4305_v21  ;;  %v4448_v42 = vmin.f32 %v416_v15, %v4308_v22  ;;  %v4482_v59 = vsel %vm228_vm1, %v688_v31, %v689_v23  ;;  %v4486_v0 = vsel %vm228_vm1, %v689_v23, %v688_v31 }
 0x175   : > { %v2019_v12 = vmax.f32 %v2017_v33, %v4226_v62  ;;  %v2020_v13 = vmax.f32 %v2018_v54, %v4224_v61  ;;  %v720_v15 = vmax.f32 %v4478_v58, %v4237_v8  ;;  %v722_v19 = vmax.f32 %v4482_v59, %v4226_v62 }
 0x176   : > { %3798 = vrot.lane.b32.xlu0 %v3797_v29, %s3973_s16  ;;  %3803 = vrot.lane.b32.xlu1 %v3797_v29, %s3974_s18  ;;  %6183 = vst [vmem:[#allocation34_spill] sm:$0xff] %v4445_v30  ;;  %6184 = vst [vmem:[#allocation35_spill] sm:$0xff] %v4448_v42  ;;  %v721_v29 = vmax.f32 %v4474_v57, %v4235_v7  ;;  %v723_v40 = vmax.f32 %v4486_v0, %v4224_v61  ;;  %v1338_v44 = vrot.slane %v4436_v17, 1 }
 0x177   : > { %v1339_v41 = vrot.slane %v4433_v18, 1  ;;  %v2013_v31 = vmax.f32 %v2012_v5, %v4237_v8  ;;  %v2014_v23 = vmax.f32 %v2011_v4, %v4235_v7  ;;  %v736_v45 = vmin.f32 %v720_v15, %v722_v19 }
 0x178   : > { %v737_v39 = vmin.f32 %v721_v29, %v723_v40  ;;  %v419_v29 = vrot.slane %v4445_v30, 7  ;;  %v425_v11 = vrot.slane %v4445_v30, 1  ;;  %v426_v6 = vrot.slane %v4448_v42, 1 }
 0x179   : > { %v2033_v52 = vmin.f32 %v2013_v31, %v2019_v12  ;;  %v2034_v33 = vmin.f32 %v2014_v23, %v2020_v13  ;;  %v4519_v5 = vsel %vm228_vm1, %v1338_v44, %v1339_v41  ;;  %v4523_v31 = vsel %vm228_vm1, %v1339_v41, %v1338_v44 }
 0x17a   : > { %461 = vrot.lane.b32.xlu0 %v4445_v30, %s3973_s16  ;;  %463 = vrot.lane.b32.xlu1 %v4448_v42, %s3973_s16  ;;  %6187 = vst [vmem:[#allocation38_spill] sm:$0xff] %v4519_v5  ;;  %6188 = vst [vmem:[#allocation39_spill] sm:$0xff] %v4523_v31  ;;  %v1370_v41 = vmax.f32 %v4519_v5, %v4226_v62 }
 0x17e   : > { %467 = vrot.lane.b32.xlu0 %v4445_v30, %s3974_s18  ;;  %469 = vrot.lane.b32.xlu1 %v4448_v42, %s3974_s18 }
 0x182   : > { %337 = vperm.xlu0 %3807, %v263_v28   ;;  %353 = vperm.xlu1 %3736, %v265_v35   ;;  %v1332_v28 = vrot.slane %v4436_v17, 7  ;;  %v1333_v35 = vrot.slane %v4433_v18, 7 }
 0x184   : > { %v4511_v54 = vsel %vm209_vm0, %v1333_v35, %v1332_v28  ;;  %v4515_v37 = vsel %vm209_vm0, %v1332_v28, %v1333_v35  ;;  %v420_v28 = vrot.slane %v4448_v42, 7 }
 0x185   : > { %6185 = vst [vmem:[#allocation36_spill] sm:$0xff] %v4511_v54  ;;  %6186 = vst [vmem:[#allocation37_spill] sm:$0xff] %v4515_v37  ;;  %v1368_v15 = vmax.f32 %v4511_v54, %v4237_v8  ;;  %v1369_v44 = vmax.f32 %v4515_v37, %v4235_v7 }
 0x186   : > { %v4543_v22 = vsel %vm209_vm0, %v420_v28, %v419_v29 }
 0x1e0   : > { %v3779_v2 = vpop.permute.xlu0 %3778  ;;  %v3784_v43 = vpop.permute.xlu1 %3783 }
 0x1e1   : > { %v3781_v4 = vunpack.i.h.bf16 %v3779_v2  ;;  %v3780_v51 = vunpack.i.l.bf16 %v3779_v2  ;;  %v3786_v12 = vunpack.i.h.bf16 %v3784_v43  ;;  %v3785_v13 = vunpack.i.l.bf16 %v3784_v43 }
 0x1e3   : > { %v729_v35 = vmax.f32 %v3781_v4, %v4231_v1  ;;  %v728_v19 = vmax.f32 %v3780_v51, %v4231_v1  ;;  %v735_v40 = vmax.f32 %v3786_v12, %v4241_v14  ;;  %v734_v2 = vmax.f32 %v3785_v13, %v4241_v14 }
 0x1e4   : > { %v3789_v43 = vpop.permute.xlu0 %3788  ;;  %v3794_v23 = vpop.permute.xlu1 %3793  ;;  %v1371_v13 = vmax.f32 %v4523_v31, %v4224_v61 }
 0x1e5   : > { %v739_v54 = vmin.f32 %v729_v35, %v735_v40  ;;  %v738_v4 = vmin.f32 %v728_v19, %v734_v2  ;;  %v3791_v53 = vunpack.i.h.bf16 %v3789_v43  ;;  %v3790_v51 = vunpack.i.l.bf16 %v3789_v43 }
 0x1e6   : > { %v3796_v50 = vunpack.i.h.bf16 %v3794_v23  ;;  %v3795_v12 = vunpack.i.l.bf16 %v3794_v23  ;;  %v4551_v43 = vsel %vm228_vm1, %v425_v11, %v426_v6  ;;  %v4555_v23 = vsel %vm209_vm0, %v419_v29, %v420_v28 }
 0x1e7   : > { %v741_v37 = vmin.f32 %v737_v39, %v739_v54  ;;  %v740_v27 = vmin.f32 %v736_v45, %v738_v4  ;;  %v2026_v5 = vmax.f32 %v3791_v53, %v4231_v1  ;;  %v2025_v26 = vmax.f32 %v3790_v51, %v4231_v1 }
 0x1e8   : > { %v2032_v35 = vmax.f32 %v3796_v50, %v4241_v14  ;;  %v2031_v19 = vmax.f32 %v3795_v12, %v4241_v14  ;;  %v3799_v40 = vpop.permute.xlu0 %3798  ;;  %v3804_v2 = vpop.permute.xlu1 %3803 }
 0x1e9   : > { %v4558_v39 = vmin.f32 %v741_v37, %v4405_v36  ;;  %v4561_v53 = vmin.f32 %v740_v27, %v4408_v38  ;;  %v3801_v45 = vunpack.i.h.bf16 %v3799_v40  ;;  %v3800_v50 = vunpack.i.l.bf16 %v3799_v40 }
 0x1ea   : > { %v2036_v54 = vmin.f32 %v2026_v5, %v2032_v35  ;;  %v2035_v4 = vmin.f32 %v2025_v26, %v2031_v19  ;;  %v3806_v51 = vunpack.i.h.bf16 %v3804_v2  ;;  %v3805_v12 = vunpack.i.l.bf16 %v3804_v2 }
 0x1eb   : > { %6189 = vst [vmem:[#allocation40_spill] sm:$0xff] %v4558_v39  ;;  %v1377_v31 = vmax.f32 %v3801_v45, %v4231_v1  ;;  %v1376_v21 = vmax.f32 %v3800_v50, %v4231_v1  ;;  %v3808_v29 = vpack.i.bf16 %v4558_v39, %v4561_v53  ;;  %v1384_v40 = vmin.f32 %v1368_v15, %v1370_v41 }
 0x1ec   : > { %v2038_v28 = vmin.f32 %v2034_v33, %v2036_v54  ;;  %v2037_v16 = vmin.f32 %v2033_v52, %v2035_v4  ;;  %v1383_v37 = vmax.f32 %v3806_v51, %v4241_v14  ;;  %v1382_v27 = vmax.f32 %v3805_v12, %v4241_v14  ;;  %v462_v55 = vpop.permute.xlu0 %461  ;;  %v464_v25 = vpop.permute.xlu1 %463 }
 0x1ed   : > { %v1385_v5 = vmin.f32 %v1369_v44, %v1371_v13  ;;  %3809 = vrot.lane.b32.xlu0 %v3808_v29, %s3973_s16  ;;  %3814 = vrot.lane.b32.xlu1 %v3808_v29, %s3974_s18  ;;  %v4573_v26 = vsel %vm228_vm1, %v426_v6, %v425_v11  ;;  %v266_v35 = vsub.f32 1.0, %v4189_v34  ;;  %v457_v15 = vmax.f32 %v4543_v22, %v4237_v8 }
 0x1ee   : > { %v4577_v52 = vmin.f32 %v2038_v28, %v4379_v20  ;;  %v4580_v33 = vmin.f32 %v2037_v16, %v4365_v56  ;;  %v1387_v19 = vmin.f32 %v1377_v31, %v1383_v37  ;;  %v1386_v2 = vmin.f32 %v1376_v21, %v1382_v27 }
 0x1ef   : > { %v459_v44 = vmax.f32 %v4551_v43, %v4226_v62  ;;  %v458_v6 = vmax.f32 %v4555_v23, %v4235_v7  ;;  %v465_v34 = vmax.f32 %v462_v55, %v4231_v1  ;;  %v460_v16 = vmax.f32 %v4573_v26, %v4224_v61 }
 0x1f0   : > { %6190 = vst [vmem:[#allocation41_spill] sm:$0xff] %v4577_v52  ;;  %6191 = vst [vmem:[#allocation42_spill] sm:$0xff] %v4580_v33  ;;  %v1389_v11 = vmin.f32 %v1385_v5, %v1387_v19  ;;  %v1388_v41 = vmin.f32 %v1384_v40, %v1386_v2  ;;  %v468_v13 = vpop.permute.xlu0 %467  ;;  %v470_v45 = vpop.permute.xlu1 %469  ;;  %v466_v21 = vmax.f32 %v464_v25, %v4231_v1  ;;  %v6192_v54 = vsub.f32 1.0, %v4183_v32 }
 0x1f1   : > { %v471_v31 = vmax.f32 %v468_v13, %v4241_v14  ;;  %v472_v50 = vmax.f32 %v470_v45, %v4241_v14  ;;  %358 = vperm.xlu0 %3807, %v266_v35   ;;  %v3823_v4 = vpack.i.bf16 %v4577_v52, %v4580_v33  ;;  %v473_v25 = vmin.f32 %v457_v15, %v459_v44 }
 0x1f2   : > { %342 = vperm.xlu1 %3736, %v6192_v54   ;;  %v4599_v55 = vmin.f32 %v1389_v11, %v4433_v18  ;;  %v4602_v51 = vmin.f32 %v1388_v41, %v4436_v17  ;;  %v474_v28 = vmin.f32 %v458_v6, %v460_v16  ;;  %v2041_v41 = vrot.slane %v4580_v33, 7 }
 0x1f3   : > { %v475_v12 = vmin.f32 %v465_v34, %v471_v31  ;;  %v476_v29 = vmin.f32 %v466_v21, %v472_v50  ;;  %v2047_v16 = vrot.slane %v4580_v33, 1  ;;  %v2048_v21 = vrot.slane %v4577_v52, 1 }
 0x1f4   : > { %6193 = vst [vmem:[#allocation43_spill] sm:$0xff] %v4602_v51  ;;  %v3833_v27 = vpack.i.bf16 %v4599_v55, %v4602_v51  ;;  %v6107_v34 = vrot.slane %v4599_v55, 7  ;;  %v6104_v13 = vrot.slane %v4599_v55, 1  ;;  %v744_v9 = vrot.slane %v4561_v53, 7 }
 0x1f5   : > { %3824 = vrot.lane.b32.xlu0 %v3823_v4, %s3974_s18  ;;  %v477_v37 = vmin.f32 %v473_v25, %v475_v12  ;;  %v478_v32 = vmin.f32 %v474_v28, %v476_v29  ;;  %v4686_v29 = vsel %vm228_vm1, %v2047_v16, %v2048_v21  ;;  %v745_v10 = vrot.slane %v4558_v39, 7 }
 0x1f6   : > { %3819 = vrot.lane.b32.xlu1 %v3823_v4, %s3973_s16  ;;  %v6202_v17 = vrot.slane %v4602_v51, 1 }
 0x1f7   : > { %v4611_v40 = vmin.f32 %v477_v37, %v4445_v30  ;;  %v4614_v5 = vmin.f32 %v478_v32, %v4448_v42 }
 0x1f9   : > { %3834 = vrot.lane.b32.xlu0 %v3833_v27, %s3974_s18  ;;  %6194 = vst [vmem:[#allocation44_spill] sm:$0xff] %v4611_v40  ;;  %6195 = vst [vmem:[#allocation45_spill] sm:$0xff] %v4614_v5 }
 0x1fa   : > { %3829 = vrot.lane.b32.xlu1 %v3833_v27, %s3973_s16 }
 0x1fd   : > { %v4616_v35 = vpop.permute.xlu0 %337  ;;  %v4618_v19 = vpop.permute.xlu1 %353  ;;  %525 = vrot.lane.b32.xlu0 %v4614_v5, %s3973_s16 }
 0x1fe   : > { %523 = vrot.lane.b32.xlu1 %v4611_v40, %s3973_s16  ;;  %v626_v2 = vmin.f32 %v4347_v47, %v4616_v35  ;;  %v632_v15 = vmin.f32 %v4351_v48, %v4618_v19  ;;  %v686_v44 = vmin.f32 %v4478_v58, %v4616_v35  ;;  %v692_v6 = vmin.f32 %v4482_v59, %v4618_v19 }
 0x1ff   : > { %v6106_v47 = vrot.slane %v4602_v51, 7  ;;  %v2042_v58 = vrot.slane %v4577_v52, 7  ;;  %v6105_v59 = vrot.slane %v4602_v51, 1  ;;  %v2051_v37 = vmin.f32 %v4686_v29, %v4618_v19 }
 0x200   : > { %v634_v11 = vmax.f32 %v626_v2, %v632_v15  ;;  %v694_v45 = vmax.f32 %v686_v44, %v692_v6  ;;  %v6128_v2 = vmov 1.0   ;;  %v750_v15 = vrot.slane %v4561_v53, 1 }
 0x201   : > { %531 = vrot.lane.b32.xlu0 %v4614_v5, %s3974_s18  ;;  %v4657_v31 = vsel %vm209_vm0, %v6107_v34, %v6106_v47  ;;  %v4665_v50 = vsel %vm209_vm0, %v2042_v58, %v2041_v41  ;;  %v4673_v54 = vsel %vm228_vm1, %v6105_v59, %v6104_v13  ;;  %3165 = vmatprep.subr.mxu1 %v6128_v2  ;;  %v751_v44 = vrot.slane %v4558_v39, 1 }
 0x202   : > { %529 = vrot.lane.b32.xlu1 %v4611_v40, %s3974_s18  ;;  %v4640_v48 = vmax.f32 %v634_v11, %v4278_v60  ;;  %v1396_v4 = vmin.f32 %v4657_v31, %v4616_v35  ;;  %v4678_v12 = vmax.f32 %v694_v45, %v4408_v38  ;;  %v1402_v25 = vmin.f32 %v4673_v54, %v4618_v19 }
 0x203   : > { %v2045_v28 = vmin.f32 %v4665_v50, %v4616_v35  ;;  %3130 = vmatprep.subr.mxu0 %v6128_v2  ;;  %3166 = vmatpush3.msra.mxu1 %v6128_v2  ;;  %v4797_v45 = vsel %vm209_vm0, %v744_v9, %v745_v10  ;;  %v2079_v59 = vmax.f32 %v4686_v29, %v4226_v62  ;;  %v6200_v60 = vrot.slane %v4599_v55, 7 }
 0x204   : > { %v4698_v32 = vmax.f32 %v1396_v4, %v1402_v25  ;;  %3131 = vmatpush3.msra.mxu0 %v6128_v2  ;;  %3167 = vmatprep.subr.mxu1 %v6128_v2  ;;  %v4801_v4 = vsel %vm209_vm0, %v745_v10, %v744_v9  ;;  %v4806_v25 = vsel %vm228_vm1, %v750_v15, %v751_v44 }
 0x205   : > { %644 = vrot.lane.b32.xlu0 %v4640_v48, %s3974_s18  ;;  %v4700_v27 = vmax.f32 %v2045_v28, %v2051_v37  ;;  %3132 = vmatprep.subr.mxu0 %v6128_v2  ;;  %v4810_v28 = vsel %vm228_vm1, %v751_v44, %v750_v15  ;;  %v4818_v37 = vsel %vm209_vm0, %v2041_v41, %v2042_v58 }
 0x206   : > { %638 = vrot.lane.b32.xlu1 %v4640_v48, %s3973_s16  ;;  %6196 = vst [vmem:[#allocation46_spill] sm:$0xff] %v4698_v32  ;;  %3168 = vmatpush3.msra.mxu1 %v6128_v2  ;;  %6198 = vst [vmem:[#allocation48_spill] sm:$0xff] %v4818_v37  ;;  %v4826_v9 = vsel %vm228_vm1, %v2048_v21, %v2047_v16  ;;  %v782_v41 = vmax.f32 %v4801_v4, %v4237_v8 }
 0x207   : > { %6197 = vst [vmem:[#allocation47_spill] sm:$0xff] %v4700_v27  ;;  %3133 = vmatpush3.msra.mxu0 %v6128_v2  ;;  %3169 = vmatprep.subr.mxu1 %v6128_v2  ;;  %6199 = vst [vmem:[#allocation49_spill] sm:$0xff] %v4826_v9  ;;  %v783_v58 = vmax.f32 %v4797_v45, %v4235_v7  ;;  %v784_v16 = vmax.f32 %v4806_v25, %v4226_v62 }
 0x208   : > { %3134 = vmatprep.subr.mxu0 %v6128_v2  ;;  %3170 = vmatpush3.msra.mxu1 %v6128_v2  ;;  %v785_v21 = vmax.f32 %v4810_v28, %v4224_v61  ;;  %v2080_v47 = vmax.f32 %v4826_v9, %v4224_v61 }
 0x209   : > { %704 = vrot.lane.b32.xlu0 %v4678_v12, %s3974_s18  ;;  %3135 = vmatpush3.msra.mxu0 %v6128_v2 }
 0x20a   : > { %698 = vrot.lane.b32.xlu1 %v4678_v12, %s3973_s16  ;;  %3171 = vmatprep.subr.mxu1 %v6128_v2 }
 0x20b   : > { %3136 = vmatprep.subr.mxu0 %v6128_v2  ;;  %3172 = vmatpush3.msra.mxu1 %v6128_v2 }
 0x20c   : > { %3137 = vmatpush3.msra.mxu0 %v6128_v2  ;;  %3173 = vmatprep.subr.mxu1 %v6128_v2 }
 0x20d   : > { %3138 = vmatprep.subr.mxu0 %v6128_v2  ;;  %3174 = vmatpush3.msra.mxu1 %v6128_v2 }
 0x20e   : > { %3139 = vmatpush3.msra.mxu0 %v6128_v2  ;;  %3175 = vmatprep.subr.mxu1 %v6128_v2 }
 0x20f   : > { %3140 = vmatprep.subr.mxu0 %v6128_v2  ;;  %3176 = vmatpush3.msra.mxu1 %v6128_v2 }
 0x210   : > { %3141 = vmatpush3.msra.mxu0 %v6128_v2  ;;  %3177 = vmatprep.subr.mxu1 %v6128_v2 }
 0x211   : > { %3142 = vmatprep.subr.mxu0 %v6128_v2  ;;  %3178 = vmatpush3.msra.mxu1 %v6128_v2 }
 0x212   : > { %3143 = vmatpush3.msra.mxu0 %v6128_v2  ;;  %3179 = vmatprep.subr.mxu1 %v6128_v2 }
 0x213   : > { %3144 = vmatprep.subr.mxu0 %v6128_v2  ;;  %3180 = vmatpush3.msra.mxu1 %v6128_v2 }
 0x214   : > { %3145 = vmatpush3.msra.mxu0 %v6128_v2  ;;  %3181 = vmatprep.subr.mxu1 %v6128_v2 }
 0x215   : > { %3146 = vmatprep.subr.mxu0 %v6128_v2  ;;  %3182 = vmatpush3.msra.mxu1 %v6128_v2 }
 0x216   : > { %3147 = vmatpush3.msra.mxu0 %v6128_v2  ;;  %3183 = vmatprep.subr.mxu1 %v6128_v2 }
 0x217   : > { %3148 = vmatprep.subr.mxu0 %v6128_v2  ;;  %3184 = vmatpush3.msra.mxu1 %v6128_v2 }
 0x218   : > { %3149 = vmatpush3.msra.mxu0 %v6128_v2  ;;  %3185 = vmatprep.subr.mxu1 %v6128_v2 }
 0x219   : > { %3150 = vmatprep.subr.mxu0 %v6128_v2  ;;  %3186 = vmatpush3.msra.mxu1 %v6128_v2 }
 0x21a   : > { %3151 = vmatpush3.msra.mxu0 %v6128_v2  ;;  %3187 = vmatprep.subr.mxu1 %v6128_v2 }
 0x21b   : > { %3152 = vmatprep.subr.mxu0 %v6128_v2  ;;  %3188 = vmatpush3.msra.mxu1 %v6128_v2 }
 0x21c   : > { %3153 = vmatpush3.msra.mxu0 %v6128_v2  ;;  %3189 = vmatprep.subr.mxu1 %v6128_v2 }
 0x21d   : > { %3154 = vmatprep.subr.mxu0 %v6128_v2  ;;  %3190 = vmatpush3.msra.mxu1 %v6128_v2 }
 0x21e   : > { %3155 = vmatpush3.msra.mxu0 %v6128_v2  ;;  %3191 = vmatprep.subr.mxu1 %v6128_v2 }
 0x21f   : > { %3156 = vmatprep.subr.mxu0 %v6128_v2  ;;  %3192 = vmatpush3.msra.mxu1 %v6128_v2 }
 0x220   : > { %3157 = vmatpush3.msra.mxu0 %v6128_v2  ;;  %3193 = vmatprep.subr.mxu1 %v6128_v2 }
 0x221   : > { %3158 = vmatprep.subr.mxu0 %v6128_v2  ;;  %3194 = vmatpush3.msra.mxu1 %v6128_v2 }
 0x222   : > { %3159 = vmatpush3.msra.mxu0 %v6128_v2  ;;  %3195 = vmatprep.subr.mxu1 %v6128_v2 }
 0x223   : > { %3160 = vmatprep.subr.mxu0 %v6128_v2  ;;  %3196 = vmatpush3.msra.mxu1 %v6128_v2 }
 0x224   : > { %3197 = vmatprep.mubr.msk.f32.mxu1 %vm584_vm2, %v6128_v2  ;;  %3235 = vmatprep.subr.mxu1 %v6128_v2 }
 0x225   : > { %3161 = vmatpush3.msra.mxu0 %v6128_v2  ;;  %3198 = vmatmul.mubr.msk.f32.vlgmr.msra.gmra.mxu1 %vm585_vm3, %v6128_v2 }
 0x226   : > { %3200 = vmatprep.subr.mxu0 %v6128_v2  ;;  %3236 = vmatpush3.msra.mxu1 %v6128_v2 }
 0x227   : > { %3237 = vmatprep.subr.mxu1 %v6128_v2 }
 0x228   : > { %3238 = vmatpush3.msra.mxu1 %v6128_v2 }
 0x229   : > { %3239 = vmatprep.subr.mxu1 %v6128_v2 }
 0x22a   : > { %3240 = vmatpush3.msra.mxu1 %v6128_v2 }
 0x22b   : > { %3241 = vmatprep.subr.mxu1 %v6128_v2 }
 0x22c   : > { %3242 = vmatpush3.msra.mxu1 %v6128_v2 }
 0x22d   : > { %3243 = vmatprep.subr.mxu1 %v6128_v2 }
 0x22e   : > { %3244 = vmatpush3.msra.mxu1 %v6128_v2 }
 0x22f   : > { %3245 = vmatprep.subr.mxu1 %v6128_v2 }
 0x230   : > { %3246 = vmatpush3.msra.mxu1 %v6128_v2 }
 0x231   : > { %3247 = vmatprep.subr.mxu1 %v6128_v2 }
 0x232   : > { %3248 = vmatpush3.msra.mxu1 %v6128_v2 }
 0x233   : > { %3249 = vmatprep.subr.mxu1 %v6128_v2 }
 0x234   : > { %3250 = vmatpush3.msra.mxu1 %v6128_v2 }
 0x235   : > { %3251 = vmatprep.subr.mxu1 %v6128_v2 }
 0x236   : > { %3252 = vmatpush3.msra.mxu1 %v6128_v2 }
 0x237   : > { %3253 = vmatprep.subr.mxu1 %v6128_v2 }
 0x238   : > { %3254 = vmatpush3.msra.mxu1 %v6128_v2 }
 0x239   : > { %3255 = vmatprep.subr.mxu1 %v6128_v2 }
 0x23a   : > { %3256 = vmatpush3.msra.mxu1 %v6128_v2 }
 0x23b   : > { %3257 = vmatprep.subr.mxu1 %v6128_v2 }
 0x23c   : > { %3258 = vmatpush3.msra.mxu1 %v6128_v2 }
 0x23d   : > { %3259 = vmatprep.subr.mxu1 %v6128_v2 }
 0x23e   : > { %3260 = vmatpush3.msra.mxu1 %v6128_v2 }
 0x23f   : > { %3261 = vmatprep.subr.mxu1 %v6128_v2 }
 0x240   : > { %3262 = vmatpush3.msra.mxu1 %v6128_v2 }
 0x241   : > { %3263 = vmatprep.subr.mxu1 %v6128_v2 }
 0x242   : > { %3264 = vmatpush3.msra.mxu1 %v6128_v2 }
 0x243   : > { %3265 = vmatprep.subr.mxu1 %v6128_v2 }
 0x244   : > { %3266 = vmatpush3.msra.mxu1 %v6128_v2 }
 0x245   : > { %3305 = vmatprep.subr.mxu1 %v6128_v2 }
 0x25f   : > { %v3810_v6 = vpop.permute.xlu0 %3809  ;;  %v3815_v11 = vpop.permute.xlu1 %3814 }
 0x260   : > { %v3812_v10 = vunpack.i.h.bf16 %v3810_v6  ;;  %v3811_v15 = vunpack.i.l.bf16 %v3810_v6  ;;  %v3817_v44 = vunpack.i.h.bf16 %v3815_v11  ;;  %v3816_v13 = vunpack.i.l.bf16 %v3815_v11 }
 0x261   : > { %v2077_v6 = vmax.f32 %v4665_v50, %v4237_v8  ;;  %v2078_v11 = vmax.f32 %v4818_v37, %v4235_v7 }
 0x262   : > { %v791_v34 = vmax.f32 %v3812_v10, %v4231_v1  ;;  %v790_v20 = vmax.f32 %v3811_v15, %v4231_v1  ;;  %v797_v56 = vmax.f32 %v3817_v44, %v4241_v14  ;;  %v796_v27 = vmax.f32 %v3816_v13, %v4241_v14 }
 0x263   : > { %v798_v10 = vmin.f32 %v782_v41, %v784_v16  ;;  %v799_v44 = vmin.f32 %v783_v58, %v785_v21  ;;  %v2093_v37 = vmin.f32 %v2077_v6, %v2079_v59  ;;  %v2094_v32 = vmin.f32 %v2078_v11, %v2080_v47 }
 0x264   : > { %v801_v41 = vmin.f32 %v791_v34, %v797_v56  ;;  %v6203_v59 = vrot.slane %v4599_v55, 1 }
 0x26c   : > { %v4853_v50 = vpop.permute.xlu0 %358 }
 0x26d   : > { %v4855_v18 = vpop.permute.xlu1 %342  ;;  %v633_v9 = vmin.f32 %v4355_v49, %v4853_v50  ;;  %v693_v13 = vmin.f32 %v4486_v0, %v4853_v50 }
 0x26e   : > { %v627_v29 = vmin.f32 %v4343_v46, %v4855_v18  ;;  %v687_v15 = vmin.f32 %v4474_v57, %v4855_v18  ;;  %v6201_v46 = vrot.slane %v4602_v51, 7  ;;  %v800_v57 = vmin.f32 %v790_v20, %v796_v27 }
 0x26f   : > { %v1430_v20 = vmax.f32 %v4657_v31, %v4237_v8 }
 0x270   : > { %v635_v38 = vmax.f32 %v627_v29, %v633_v9  ;;  %v4874_v49 = vsel %vm209_vm0, %v6201_v46, %v6200_v60  ;;  %v3825_v16 = vpop.permute.xlu0 %3824  ;;  %v4883_v9 = vsel %vm228_vm1, %v6203_v59, %v6202_v17  ;;  %v695_v34 = vmax.f32 %v687_v15, %v693_v13 }
 0x271   : > { %v3820_v0 = vpop.permute.xlu1 %3819  ;;  %v3827_v58 = vunpack.i.h.bf16 %v3825_v16  ;;  %v3826_v60 = vunpack.i.l.bf16 %v3825_v16  ;;  %v1431_v47 = vmax.f32 %v4874_v49, %v4235_v7  ;;  %v802_v46 = vmin.f32 %v798_v10, %v800_v57 }
 0x272   : > { %v3822_v21 = vunpack.i.h.bf16 %v3820_v0  ;;  %v3821_v6 = vunpack.i.l.bf16 %v3820_v0  ;;  %v4888_v56 = vmax.f32 %v635_v38, %v4281_v63  ;;  %v803_v38 = vmin.f32 %v799_v44, %v801_v41 }
 0x273   : > { %v2092_v17 = vmax.f32 %v3827_v58, %v4241_v14  ;;  %v2091_v27 = vmax.f32 %v3826_v60, %v4241_v14  ;;  %v1432_v15 = vmax.f32 %v4673_v54, %v4226_v62  ;;  %v1433_v10 = vmax.f32 %v4883_v9, %v4224_v61 }
 0x274   : > { %v2086_v11 = vmax.f32 %v3822_v21, %v4231_v1  ;;  %v2085_v29 = vmax.f32 %v3821_v6, %v4231_v1  ;;  %640 = vrot.lane.b32.xlu1 %v4888_v56, %s3973_s16  ;;  %646 = vrot.lane.b32.xlu0 %v4888_v56, %s3974_s18  ;;  %v3835_v31 = vpop.permute.xlu0 %3834  ;;  %v4910_v57 = vmax.f32 %v695_v34, %v4405_v36 }
 0x275   : > { %v3830_v13 = vpop.permute.xlu1 %3829  ;;  %v3837_v59 = vunpack.i.h.bf16 %v3835_v31  ;;  %v3836_v58 = vunpack.i.l.bf16 %v3835_v31  ;;  %v804_v34 = vmin.f32 %v802_v46, %v4561_v53  ;;  %v1447_v31 = vmin.f32 %v1431_v47, %v1433_v10 }
 0x276   : > { %v2096_v16 = vmin.f32 %v2086_v11, %v2092_v17  ;;  %v2095_v0 = vmin.f32 %v2085_v29, %v2091_v27  ;;  %v3832_v44 = vunpack.i.h.bf16 %v3830_v13  ;;  %v3831_v41 = vunpack.i.l.bf16 %v3830_v13 }
 0x277   : > { %v1445_v6 = vmax.f32 %v3837_v59, %v4241_v14  ;;  %v1444_v54 = vmax.f32 %v3836_v58, %v4241_v14  ;;  %v4921_v11 = vmin.f32 %v803_v38, %v4558_v39  ;;  %v1446_v29 = vmin.f32 %v1430_v20, %v1432_v15 }
 0x278   : > { %v2098_v60 = vmin.f32 %v2094_v32, %v2096_v16  ;;  %v2097_v21 = vmin.f32 %v2093_v37, %v2095_v0  ;;  %v1439_v17 = vmax.f32 %v3832_v44, %v4231_v1  ;;  %v1438_v27 = vmax.f32 %v3831_v41, %v4231_v1  ;;  %700 = vrot.lane.b32.xlu1 %v4910_v57, %s3973_s16 }
 0x279   : > { %706 = vrot.lane.b32.xlu0 %v4910_v57, %s3974_s18  ;;  %v748_v59 = vmin.f32 %v4801_v4, %v4616_v35  ;;  %v754_v38 = vmin.f32 %v4806_v25, %v4618_v19  ;;  %v806_v20 = vrot.slane %v804_v34, 7  ;;  %v807_v47 = vrot.slane %v4921_v11, 7 }
 0x27a   : > { %v4924_v32 = vmin.f32 %v2098_v60, %v4577_v52  ;;  %v4927_v37 = vmin.f32 %v2097_v21, %v4580_v33  ;;  %v1449_v13 = vmin.f32 %v1439_v17, %v1445_v6  ;;  %v1448_v16 = vmin.f32 %v1438_v27, %v1444_v54  ;;  %v4959_v17 = vld [vmem:[%s4130_s26] sm:$0xff] }
 0x27b   : > { %v812_v46 = vrot.slane %v804_v34, 1  ;;  %v813_v15 = vrot.slane %v4921_v11, 1  ;;  %v756_v25 = vmax.f32 %v748_v59, %v754_v38  ;;  %v749_v60 = vmin.f32 %v4797_v45, %v4855_v18  ;;  %6204 = vst [vmem:[#allocation50_spill] sm:$0xff] %v4959_v17  ;;  %v6206_v59 = vld [vmem:[#allocation10_spill] sm:$0xff]  ;;  %v6208_v33 = vld [vmem:[#allocation28_spill] sm:$0xff] }
 0x27c   : > { %v3838_v0 = vpack.i.bf16 %v4924_v32, %v4927_v37  ;;  %v1451_v58 = vmin.f32 %v1447_v31, %v1449_v13  ;;  %v1450_v44 = vmin.f32 %v1446_v29, %v1448_v16  ;;  %v755_v21 = vmin.f32 %v4810_v28, %v4853_v50  ;;  %v524_v29 = vpop.permute.xlu1 %523  ;;  %v526_v28 = vpop.permute.xlu0 %525 }
 0x27d   : > { %v809_v6 = vsel %vm209_vm0, %v807_v47, %v806_v20  ;;  %v814_v54 = vsel %vm228_vm1, %v812_v46, %v813_v15  ;;  %v844_v27 = vmul.f32 %v4959_v17, %v4170_v24  ;;  %v4964_v45 = vmax.f32 %v756_v25, %v4561_v53 }
 0x27e   : > { %3839 = vrot.lane.b32.xlu1 %v3838_v0, %s3973_s16  ;;  %3844 = vrot.lane.b32.xlu0 %v3838_v0, %s3974_s18  ;;  %v4941_v10 = vmin.f32 %v1451_v58, %v4599_v55  ;;  %v4944_v4 = vmin.f32 %v1450_v44, %v4602_v51  ;;  %v757_v31 = vmax.f32 %v749_v60, %v755_v21  ;;  %v4969_v0 = vld [vmem:[%s4130_s26 + $0x8] sm:$0xff]  ;;  %v481_v25 = vrot.slane %v4611_v40, 7 }
 0x27f   : > { %v810_v13 = vmin.f32 %v809_v6, %v4616_v35  ;;  %v816_v16 = vmin.f32 %v814_v54, %v4618_v19  ;;  %3162 = vmatprep.mubr.f32.mxu0 %v844_v27  ;;  %6205 = vst [vmem:[#allocation51_spill] sm:$0xff] %v4969_v0  ;;  %v845_v38 = vmul.f32 %v4969_v0, %v6206_v59  ;;  %v487_v60 = vrot.slane %v4611_v40, 1 }
 0x280   : > { %v3848_v41 = vpack.i.bf16 %v4941_v10, %v4944_v4  ;;  %v808_v58 = vsel %vm209_vm0, %v806_v20, %v807_v47  ;;  %v815_v44 = vsel %vm228_vm1, %v813_v15, %v812_v46  ;;  %v488_v21 = vrot.slane %v4614_v5, 1  ;;  %v530_v6 = vpop.permute.xlu1 %529  ;;  %v532_v54 = vpop.permute.xlu0 %531 }
 0x281   : > { %3163 = vmatmul.mubr.f32.vlgmr.msra.gmra.mxu0 %v845_v38  ;;  %v4986_v20 = vmax.f32 %v757_v31, %v4558_v39  ;;  %v818_v47 = vmax.f32 %v810_v13, %v816_v16  ;;  %v811_v46 = vmin.f32 %v808_v58, %v4855_v18  ;;  %v817_v15 = vmin.f32 %v815_v44, %v4853_v50  ;;  %v6207_v44 = vld [vmem:[#allocation27_spill] sm:$0xff] }
 0x282   : > { %3849 = vrot.lane.b32.xlu1 %v3848_v41, %s3973_s16  ;;  %3854 = vrot.lane.b32.xlu0 %v3848_v41, %s3974_s18  ;;  %v482_v41 = vrot.slane %v4614_v5, 7  ;;  %v5002_v31 = vsel %vm228_vm1, %v487_v60, %v488_v21  ;;  %v5010_v16 = vsel %vm228_vm1, %v488_v21, %v487_v60  ;;  %v345_v52 = vmin.f32 %v6207_v44, %v4616_v35 }
 0x283   : > { %3201 = vmatpush3.msra.mxu0 %v6128_v2  ;;  %v5013_v38 = vmax.f32 %v818_v47, %v804_v34  ;;  %v819_v58 = vmax.f32 %v811_v46, %v817_v15  ;;  %v361_v0 = vmin.f32 %v6208_v33, %v4618_v19  ;;  %v521_v34 = vmax.f32 %v5002_v31, %v4226_v62 }
 0x284   : > { %3202 = vmatprep.subr.mxu0 %v6128_v2  ;;  %v4998_v27 = vsel %vm209_vm0, %v482_v41, %v481_v25  ;;  %v5006_v13 = vsel %vm209_vm0, %v481_v25, %v482_v41  ;;  %v533_v25 = vmax.f32 %v530_v6, %v4241_v14  ;;  %v534_v41 = vmax.f32 %v532_v54, %v4241_v14 }
 0x285   : > { %3203 = vmatpush3.msra.mxu0 %v6128_v2  ;;  %v519_v60 = vmax.f32 %v4998_v27, %v4237_v8  ;;  %v527_v33 = vmax.f32 %v524_v29, %v4231_v1  ;;  %v528_v21 = vmax.f32 %v526_v28, %v4231_v1  ;;  %v520_v47 = vmax.f32 %v5006_v13, %v4235_v7 }
 0x286   : > { %760 = vrot.lane.b32.xlu1 %v4964_v45, %s3973_s16  ;;  %766 = vrot.lane.b32.xlu0 %v4964_v45, %s3974_s18  ;;  %v522_v46 = vmax.f32 %v5010_v16, %v4224_v61  ;;  %v5039_v15 = vmax.f32 %v819_v58, %v4921_v11  ;;  %v363_v6 = vmax.f32 %v345_v52, %v361_v0  ;;  %v6211_v58 = vld [vmem:[#allocation29_spill] sm:$0xff] }
 0x287   : > { %3204 = vmatprep.subr.mxu0 %v6128_v2  ;;  %v423_v54 = vmin.f32 %v4543_v22, %v4616_v35  ;;  %v429_v29 = vmin.f32 %v4551_v43, %v4618_v19  ;;  %v537_v28 = vmin.f32 %v527_v33, %v533_v25  ;;  %v538_v44 = vmin.f32 %v528_v21, %v534_v41  ;;  %v6209_v22 = vld [vmem:[#allocation21_spill] sm:$0xff]  ;;  %v6212_v41 = vld [vmem:[#allocation31_spill] sm:$0xff] }
 0x288   : > { %3205 = vmatpush3.msra.mxu0 %v6128_v2  ;;  %v535_v11 = vmin.f32 %v519_v60, %v521_v34  ;;  %v536_v52 = vmin.f32 %v520_v47, %v522_v46  ;;  %v5053_v0 = vmax.f32 %v363_v6, %v6209_v22  ;;  %v346_v25 = vmin.f32 %v6211_v58, %v4855_v18 }
 0x289   : > { %3206 = vmatprep.subr.mxu0 %v6128_v2  ;;  %v431_v43 = vmax.f32 %v423_v54, %v429_v29  ;;  %v362_v33 = vmin.f32 %v6212_v41, %v4853_v50  ;;  %v424_v47 = vmin.f32 %v4555_v23, %v4855_v18  ;;  %v430_v46 = vmin.f32 %v4573_v26, %v4853_v50  ;;  %v6214_v23 = vld [vmem:[#allocation22_spill] sm:$0xff] }
 0x28a   : > { %762 = vrot.lane.b32.xlu1 %v4986_v20, %s3973_s16  ;;  %768 = vrot.lane.b32.xlu0 %v4986_v20, %s3974_s18  ;;  %6210 = vst [vmem:[#allocation10_spill] sm:$0xff] %v5053_v0  ;;  %v539_v21 = vmin.f32 %v535_v11, %v537_v28  ;;  %v540_v17 = vmin.f32 %v536_v52, %v538_v44 }
 0x28b   : > { %3207 = vmatpush3.msra.mxu0 %v6128_v2  ;;  %v5067_v60 = vmax.f32 %v431_v43, %v4445_v30  ;;  %v364_v34 = vmax.f32 %v346_v25, %v362_v33  ;;  %v432_v26 = vmax.f32 %v424_v47, %v430_v46  ;;  %v485_v28 = vmin.f32 %v4998_v27, %v4616_v35  ;;  %v6230_v30 = vld [vmem:[#allocation46_spill] sm:$0xff] }
 0x28c   : > { %3208 = vmatprep.subr.mxu0 %v6128_v2  ;;  %v541_v6 = vmin.f32 %v539_v21, %v4611_v40  ;;  %v542_v54 = vmin.f32 %v540_v17, %v4614_v5  ;;  %v491_v17 = vmin.f32 %v5002_v31, %v4618_v19  ;;  %v486_v58 = vmin.f32 %v5006_v13, %v4855_v18 }
 0x28d   : > { %3209 = vmatpush3.msra.mxu0 %v6128_v2  ;;  %6213 = vst [vmem:[#allocation27_spill] sm:$0xff] %v5067_v60  ;;  %v5083_v29 = vmax.f32 %v364_v34, %v6214_v23  ;;  %v5097_v27 = vmax.f32 %v432_v26, %v4448_v42  ;;  %v492_v25 = vmin.f32 %v5010_v16, %v4853_v50  ;;  %v1455_v42 = vrot.slane %v4941_v10, 7 }
 0x28e   : > { %822 = vrot.lane.b32.xlu1 %v5013_v38, %s3973_s16  ;;  %828 = vrot.lane.b32.xlu0 %v5013_v38, %s3974_s18  ;;  %v543_v44 = vrot.slane %v541_v6, 7  ;;  %v549_v11 = vrot.slane %v541_v6, 1  ;;  %v544_v52 = vrot.slane %v542_v54, 7  ;;  %v550_v43 = vrot.slane %v542_v54, 1 }
 0x28f   : > { %3210 = vmatprep.subr.mxu0 %v6128_v2  ;;  %6215 = vst [vmem:[#allocation28_spill] sm:$0xff] %v5083_v29  ;;  %6216 = vst [vmem:[#allocation29_spill] sm:$0xff] %v5097_v27  ;;  %v493_v31 = vmax.f32 %v485_v28, %v491_v17  ;;  %v494_v16 = vmax.f32 %v486_v58, %v492_v25 }
 0x290   : > { %3211 = vmatpush3.msra.mxu0 %v6128_v2  ;;  %v546_v41 = vsel %vm209_vm0, %v544_v52, %v543_v44  ;;  %v551_v33 = vsel %vm228_vm1, %v549_v11, %v550_v43  ;;  %v545_v47 = vsel %vm209_vm0, %v543_v44, %v544_v52  ;;  %v552_v46 = vsel %vm228_vm1, %v550_v43, %v549_v11 }
 0x291   : > { %3212 = vmatprep.subr.mxu0 %v6128_v2  ;;  %v5115_v13 = vmax.f32 %v493_v31, %v4611_v40  ;;  %v547_v21 = vmin.f32 %v546_v41, %v4616_v35  ;;  %v553_v34 = vmin.f32 %v551_v33, %v4618_v19  ;;  %v5131_v26 = vmax.f32 %v494_v16, %v4614_v5  ;;  %v645_v31 = vpop.permute.xlu0 %644  ;;  %v6221_v41 = vld [vmem:[#allocation11_spill] sm:$0xff]  ;;  %v6222_v16 = vld [vmem:[#allocation12_spill] sm:$0xff] }
 0x292   : > { %824 = vrot.lane.b32.xlu1 %v5039_v15, %s3973_s16  ;;  %830 = vrot.lane.b32.xlu0 %v5039_v15, %s3974_s18  ;;  %v548_v17 = vmin.f32 %v545_v47, %v4855_v18  ;;  %v554_v44 = vmin.f32 %v552_v46, %v4853_v50  ;;  %v2107_v47 = vrot.slane %v4927_v37, 1  ;;  %v2108_v46 = vrot.slane %v4924_v32, 1 }
 0x293   : > { %3213 = vmatpush3.msra.mxu0 %v6128_v2  ;;  %6217 = vst [vmem:[#allocation31_spill] sm:$0xff] %v5115_v13  ;;  %6218 = vst [vmem:[#allocation52_spill] sm:$0xff] %v5131_v26  ;;  %v555_v28 = vmax.f32 %v547_v21, %v553_v34  ;;  %v648_v21 = vmin.f32 %v645_v31, %v6222_v16  ;;  %v2102_v34 = vrot.slane %v4924_v32, 7 }
 0x294   : > { %3214 = vmatprep.subr.mxu0 %v6128_v2  ;;  %v556_v52 = vmax.f32 %v548_v17, %v554_v44  ;;  %v6223_v44 = vld [vmem:[#allocation36_spill] sm:$0xff] }
 0x295   : > { %3215 = vmatpush3.msra.mxu0 %v6128_v2  ;;  %v5142_v11 = vmax.f32 %v555_v28, %v541_v6  ;;  %v639_v6 = vpop.permute.xlu1 %638  ;;  %v705_v25 = vpop.permute.xlu0 %704 }
 0x296   : > { %367 = vrot.lane.b32.xlu1 %v5053_v0, %s3973_s16  ;;  %377 = vrot.lane.b32.xlu0 %v5053_v0, %s3974_s18  ;;  %v5151_v43 = vmax.f32 %v556_v52, %v542_v54  ;;  %v642_v33 = vmin.f32 %v639_v6, %v6221_v41  ;;  %v2101_v54 = vrot.slane %v4927_v37, 7  ;;  %v708_v17 = vmin.f32 %v705_v25, %v6222_v16 }
 0x297   : > { %3216 = vmatprep.subr.mxu0 %v6128_v2  ;;  %6219 = vst [vmem:[#allocation53_spill] sm:$0xff] %v5142_v11  ;;  %v1336_v52 = vmin.f32 %v6223_v44, %v4616_v35 }
 0x298   : > { %3217 = vmatpush3.msra.mxu0 %v6128_v2  ;;  %6220 = vst [vmem:[#allocation54_spill] sm:$0xff] %v5151_v43  ;;  %v5173_v40 = vsel %vm209_vm0, %v2102_v34, %v2101_v54  ;;  %v5181_v25 = vsel %vm209_vm0, %v2101_v54, %v2102_v34  ;;  %v1460_v34 = vrot.slane %v4944_v4, 1 }
 0x299   : > { %3218 = vmatprep.subr.mxu0 %v6128_v2  ;;  %v699_v58 = vpop.permute.xlu1 %698  ;;  %6225 = vst [vmem:[#allocation11_spill] sm:$0xff] %v5173_v40  ;;  %6227 = vst [vmem:[#allocation36_spill] sm:$0xff] %v5181_v25 }
 0x29a   : > { %435 = vrot.lane.b32.xlu1 %v5067_v60, %s3973_s16  ;;  %441 = vrot.lane.b32.xlu0 %v5067_v60, %s3974_s18  ;;  %v702_v28 = vmin.f32 %v699_v58, %v6221_v41 }
 0x29b   : > { %3219 = vmatpush3.msra.mxu0 %v6128_v2 }
 0x29c   : > { %3220 = vmatprep.subr.mxu0 %v6128_v2  ;;  %v710_v58 = vmax.f32 %v702_v28, %v708_v17  ;;  %v1461_v17 = vrot.slane %v4941_v10, 1 }
 0x29d   : > { %3221 = vmatpush3.msra.mxu0 %v6128_v2 }
 0x29e   : > { %369 = vrot.lane.b32.xlu1 %v5083_v29, %s3973_s16  ;;  %379 = vrot.lane.b32.xlu0 %v5083_v29, %s3974_s18  ;;  %v5210_v29 = vmax.f32 %v6230_v30, %v4602_v51  ;;  %v6231_v30 = vld [vmem:[#allocation18_spill] sm:$0xff] }
 0x29f   : > { %3222 = vmatprep.subr.mxu0 %v6128_v2 }
 0x2a0   : > { %3223 = vmatpush3.msra.mxu0 %v6128_v2 }
 0x2a1   : > { %3224 = vmatprep.subr.mxu0 %v6128_v2 }
 0x2a2   : > { %443 = vrot.lane.b32.xlu0 %v5097_v27, %s3974_s18  ;;  %437 = vrot.lane.b32.xlu1 %v5097_v27, %s3973_s16 }
 0x2a3   : > { %3225 = vmatpush3.msra.mxu0 %v6128_v2 }
 0x2a4   : > { %3226 = vmatprep.subr.mxu0 %v6128_v2 }
 0x2a5   : > { %3227 = vmatpush3.msra.mxu0 %v6128_v2 }
 0x2a6   : > { %503 = vrot.lane.b32.xlu0 %v5115_v13, %s3974_s18  ;;  %497 = vrot.lane.b32.xlu1 %v5115_v13, %s3973_s16 }
 0x2a7   : > { %3228 = vmatprep.subr.mxu0 %v6128_v2 }
 0x2a8   : > { %3229 = vmatpush3.msra.mxu0 %v6128_v2 }
 0x2a9   : > { %3230 = vmatprep.subr.mxu0 %v6128_v2 }
 0x2aa   : > { %505 = vrot.lane.b32.xlu0 %v5131_v26, %s3974_s18  ;;  %499 = vrot.lane.b32.xlu1 %v5131_v26, %s3973_s16 }
 0x2ab   : > { %3231 = vmatpush3.msra.mxu0 %v6128_v2 }
 0x2ac   : > { %3270 = vmatprep.subr.mxu0 %v6128_v2  ;;  %v6224_v2 = vld [vmem:[#allocation38_spill] sm:$0xff] }
 0x2ad   : > { %v1342_v6 = vmin.f32 %v6224_v2, %v4618_v19  ;;  %v5185_v2 = vsel %vm228_vm1, %v2108_v46, %v2107_v47 }
 0x2ae   : > { %565 = vrot.lane.b32.xlu0 %v5142_v11, %s3974_s18  ;;  %559 = vrot.lane.b32.xlu1 %v5142_v11, %s3973_s16  ;;  %v5177_v11 = vsel %vm228_vm1, %v2107_v47, %v2108_v46  ;;  %6228 = vst [vmem:[#allocation38_spill] sm:$0xff] %v5185_v2  ;;  %v712_v47 = vmax.f32 %v710_v58, %v4678_v12 }
 0x2af   : > { %6226 = vst [vmem:[#allocation12_spill] sm:$0xff] %v5177_v11  ;;  %v1344_v44 = vmax.f32 %v1336_v52, %v1342_v6  ;;  %v2141_v54 = vmax.f32 %v5177_v11, %v4226_v62  ;;  %v2140_v46 = vmax.f32 %v5181_v25, %v4235_v7  ;;  %v2142_v52 = vmax.f32 %v5185_v2, %v4224_v61 }
 0x2b0   : > { %v5221_v25 = vsel %vm228_vm1, %v1460_v34, %v1461_v17  ;;  %v5224_v51 = vsub.f32 %v6231_v30, %v712_v47 }
 0x2b2   : > { %567 = vrot.lane.b32.xlu0 %v5151_v43, %s3974_s18  ;;  %561 = vrot.lane.b32.xlu1 %v5151_v43, %s3973_s16  ;;  %v650_v43 = vmax.f32 %v642_v33, %v648_v21  ;;  %v2139_v33 = vmax.f32 %v5173_v40, %v4237_v8  ;;  %v1454_v21 = vrot.slane %v4944_v4, 7 }
 0x2b4   : > { %v652_v23 = vmax.f32 %v650_v43, %v4640_v48  ;;  %v5203_v48 = vsel %vm209_vm0, %v1455_v42, %v1454_v21  ;;  %v6229_v43 = vld [vmem:[#allocation33_spill] sm:$0xff]  ;;  %v2155_v58 = vmin.f32 %v2139_v33, %v2141_v54  ;;  %v5217_v2 = vsel %vm209_vm0, %v1454_v21, %v1455_v42 }
 0x2b5   : > { %v5206_v6 = vmax.f32 %v1344_v44, %v6229_v43  ;;  %v5228_v33 = vsel %vm228_vm1, %v1461_v17, %v1460_v34  ;;  %v1492_v42 = vmax.f32 %v5203_v48, %v4237_v8  ;;  %v1494_v34 = vmax.f32 %v5221_v25, %v4226_v62 }
 0x2b6   : > { %v5213_v27 = vsub.f32 %v4170_v24, %v652_v23  ;;  %v2156_v23 = vmin.f32 %v2140_v46, %v2142_v52  ;;  %v1493_v46 = vmax.f32 %v5217_v2, %v4235_v7  ;;  %v6232_v7 = vld [vmem:[#allocation37_spill] sm:$0xff] }
 0x2b7   : > { %v1337_v62 = vmin.f32 %v6232_v7, %v4855_v18  ;;  %v716_v7 = vmax.f32 %v5224_v51, 0.0  ;;  %v1403_v51 = vmin.f32 %v4883_v9, %v4853_v50  ;;  %v1458_v9 = vmin.f32 %v5203_v48, %v4616_v35 }
 0x2e6   : > { %v641_v5 = vpop.permute.xlu1 %640  ;;  %v647_v31 = vpop.permute.xlu0 %646 }
 0x2e7   : > { %v649_v47 = vmin.f32 %v647_v31, %v6222_v16 }
 0x2ea   : > { %v701_v26 = vpop.permute.xlu1 %700 }
 0x2eb   : > { %v707_v28 = vpop.permute.xlu0 %706  ;;  %v703_v17 = vmin.f32 %v701_v26, %v6221_v41 }
 0x2ec   : > { %v709_v52 = vmin.f32 %v707_v28, %v6222_v16 }
 0x2f0   : > { %v3840_v12 = vpop.permute.xlu1 %3839  ;;  %v3845_v22 = vpop.permute.xlu0 %3844 }
 0x2f1   : > { %v3842_v44 = vunpack.i.h.bf16 %v3840_v12  ;;  %v3841_v43 = vunpack.i.l.bf16 %v3840_v12  ;;  %v3847_v13 = vunpack.i.h.bf16 %v3845_v22  ;;  %v3846_v0 = vunpack.i.l.bf16 %v3845_v22 }
 0x2f2   : > { %v643_v22 = vmin.f32 %v641_v5, %v6221_v41  ;;  %v1495_v5 = vmax.f32 %v5228_v33, %v4224_v61 }
 0x2f3   : > { %v2148_v21 = vmax.f32 %v3842_v44, %v4231_v1  ;;  %v2147_v54 = vmax.f32 %v3841_v43, %v4231_v1  ;;  %v2154_v24 = vmax.f32 %v3847_v13, %v4241_v14  ;;  %v2153_v12 = vmax.f32 %v3846_v0, %v4241_v14 }
 0x2f4   : > { %v3850_v30 = vpop.permute.xlu1 %3849  ;;  %v3855_v13 = vpop.permute.xlu0 %3854  ;;  %v651_v8 = vmax.f32 %v643_v22, %v649_v47  ;;  %v6233_v47 = vld [vmem:[#allocation39_spill] sm:$0xff] }
 0x2f5   : > { %v2158_v44 = vmin.f32 %v2148_v21, %v2154_v24  ;;  %v2157_v43 = vmin.f32 %v2147_v54, %v2153_v12  ;;  %v3852_v60 = vunpack.i.h.bf16 %v3850_v30  ;;  %v3851_v0 = vunpack.i.l.bf16 %v3850_v30 }
 0x2f6   : > { %v3857_v31 = vunpack.i.h.bf16 %v3855_v13  ;;  %v3856_v39 = vunpack.i.l.bf16 %v3855_v13  ;;  %v711_v21 = vmax.f32 %v703_v17, %v709_v52  ;;  %v656_v13 = vmax.f32 %v5213_v27, 0.0 }
 0x2f7   : > { %v2160_v11 = vmin.f32 %v2156_v23, %v2158_v44  ;;  %v2159_v40 = vmin.f32 %v2155_v58, %v2157_v43  ;;  %v1501_v26 = vmax.f32 %v3852_v60, %v4231_v1  ;;  %v1500_v24 = vmax.f32 %v3851_v0, %v4231_v1 }
 0x2f8   : > { %v1507_v28 = vmax.f32 %v3857_v31, %v4241_v14  ;;  %v1506_v58 = vmax.f32 %v3856_v39, %v4241_v14  ;;  %v761_v23 = vpop.permute.xlu1 %760  ;;  %v767_v44 = vpop.permute.xlu0 %766  ;;  %v1343_v43 = vmin.f32 %v6233_v47, %v4853_v50  ;;  %v1397_v39 = vmin.f32 %v4874_v49, %v4855_v18 }
 0x2f9   : > { %v5252_v54 = vmin.f32 %v2160_v11, %v4924_v32  ;;  %v5255_v12 = vmin.f32 %v2159_v40, %v4927_v37  ;;  %v764_v22 = vmin.f32 %v761_v23, %v6221_v41  ;;  %v770_v60 = vmin.f32 %v767_v44, %v6222_v16 }
 0x2fa   : > { %v1511_v17 = vmin.f32 %v1501_v26, %v1507_v28  ;;  %v1510_v52 = vmin.f32 %v1500_v24, %v1506_v58  ;;  %v653_v40 = vmax.f32 %v651_v8, %v4888_v56  ;;  %v713_v0 = vmax.f32 %v711_v21, %v4910_v57  ;;  %v6234_v58 = vld [vmem:[#allocation30_spill] sm:$0xff] }
 0x2fb   : > { %v3863_v11 = vpack.i.bf16 %v5252_v54, %v5255_v12  ;;  %v772_v30 = vmax.f32 %v764_v22, %v770_v60  ;;  %v1508_v31 = vmin.f32 %v1492_v42, %v1494_v34  ;;  %v1509_v23 = vmin.f32 %v1493_v46, %v1495_v5 }
 0x2fc   : > { %v763_v26 = vpop.permute.xlu1 %762  ;;  %v769_v24 = vpop.permute.xlu0 %768  ;;  %v1345_v57 = vmax.f32 %v1337_v62, %v1343_v43  ;;  %v1464_v42 = vmin.f32 %v5221_v25, %v4618_v19  ;;  %v655_v46 = vsub.f32 %v6206_v59, %v653_v40  ;;  %v718_v5 = vmax.f32 %v656_v13, %v716_v7 }
 0x2fd   : > { %3864 = vrot.lane.b32.xlu0 %v3863_v11, %s3974_s18  ;;  %3859 = vrot.lane.b32.xlu1 %v3863_v11, %s3973_s16  ;;  %v774_v8 = vmax.f32 %v772_v30, %v4964_v45  ;;  %v765_v56 = vmin.f32 %v763_v26, %v6221_v41  ;;  %v771_v49 = vmin.f32 %v769_v24, %v6222_v16  ;;  %v2163_v62 = vrot.slane %v5255_v12, 7  ;;  %v6235_v30 = vld [vmem:[#allocation32_spill] sm:$0xff] }
 0x2fe   : > { %v1513_v27 = vmin.f32 %v1509_v23, %v1511_v17  ;;  %v1512_v28 = vmin.f32 %v1508_v31, %v1510_v52  ;;  %v1405_v21 = vmax.f32 %v1397_v39, %v1403_v51  ;;  %v715_v45 = vsub.f32 %v4281_v63, %v713_v0 }
 0x2ff   : > { %v773_v34 = vmax.f32 %v765_v56, %v771_v49  ;;  %v776_v44 = vsub.f32 %v6234_v58, %v774_v8  ;;  %v2164_v25 = vrot.slane %v5252_v54, 7  ;;  %v1459_v47 = vmin.f32 %v5217_v2, %v4855_v18 }
 0x300   : > { %v823_v22 = vpop.permute.xlu1 %822  ;;  %v829_v60 = vpop.permute.xlu0 %828  ;;  %v5296_v43 = vmin.f32 %v1513_v27, %v4941_v10  ;;  %v5299_v17 = vmin.f32 %v1512_v28, %v4944_v4  ;;  %v2169_v52 = vrot.slane %v5255_v12, 1  ;;  %v2170_v11 = vrot.slane %v5252_v54, 1 }
 0x301   : > { %1354 = vrot.lane.b32.xlu0 %v5206_v6, %s3974_s18  ;;  %1348 = vrot.lane.b32.xlu1 %v5206_v6, %s3973_s16  ;;  %v775_v48 = vmax.f32 %v773_v34, %v4986_v20  ;;  %v826_v7 = vmin.f32 %v823_v22, %v6221_v41  ;;  %v832_v63 = vmin.f32 %v829_v60, %v6222_v16  ;;  %v657_v13 = vmax.f32 %v655_v46, 0.0 }
 0x302   : > { %v5304_v20 = vmax.f32 %v1345_v57, %v6235_v30  ;;  %v1466_v39 = vmax.f32 %v1458_v9, %v1464_v42  ;;  %v1465_v51 = vmin.f32 %v5228_v33, %v4853_v50  ;;  %v717_v2 = vmax.f32 %v715_v45, 0.0 }
 0x303   : > { %v834_v40 = vmax.f32 %v826_v7, %v832_v63  ;;  %v778_v0 = vmax.f32 %v776_v44, 0.0  ;;  %v5314_v26 = vsel %vm209_vm0, %v2164_v25, %v2163_v62  ;;  %v777_v24 = vsub.f32 %v4405_v36, %v775_v48  ;;  %v6236_v48 = vld [vmem:[#allocation15_spill] sm:$0xff]  ;;  %v6237_v63 = vld [vmem:[#allocation14_spill] sm:$0xff] }
 0x304   : > { %v825_v31 = vpop.permute.xlu1 %824  ;;  %v831_v23 = vpop.permute.xlu0 %830  ;;  %v1516_v49 = vrot.slane %v5299_v17, 7  ;;  %v1517_v9 = vrot.slane %v5296_v43, 7  ;;  %v5324_v27 = vsel %vm228_vm1, %v2169_v52, %v2170_v11  ;;  %v5328_v28 = vsel %vm209_vm0, %v2163_v62, %v2164_v25 }
 0x305   : > { %1414 = vrot.lane.b32.xlu0 %v5210_v29, %s3974_s18  ;;  %1408 = vrot.lane.b32.xlu1 %v5210_v29, %s3973_s16  ;;  %v836_v8 = vmax.f32 %v834_v40, %v5013_v38  ;;  %v827_v33 = vmin.f32 %v825_v31, %v6221_v41  ;;  %v833_v56 = vmin.f32 %v831_v23, %v6222_v16  ;;  %v1522_v38 = vrot.slane %v5299_v17, 1 }
 0x306   : > { %v1523_v42 = vrot.slane %v5296_v43, 1  ;;  %v719_v46 = vmax.f32 %v657_v13, %v717_v2  ;;  %v5342_v58 = vmax.f32 %v1405_v21, %v4599_v55  ;;  %v779_v44 = vmax.f32 %v777_v24, 0.0  ;;  %v6238_v21 = vld [vmem:[#allocation13_spill] sm:$0xff]  ;;  %v6239_v2 = vld [vmem:[#allocation40_spill] sm:$0xff] }
 0x307   : > { %v835_v57 = vmax.f32 %v827_v33, %v833_v56  ;;  %v838_v36 = vsub.f32 %v4561_v53, %v836_v8  ;;  %v5346_v53 = vsel %vm228_vm1, %v2170_v11, %v2169_v52  ;;  %v780_v60 = vmax.f32 %v718_v5, %v778_v0 }
 0x308   : > { %v5333_v34 = vpop.permute.xlu1 %367  ;;  %v5335_v45 = vpop.permute.xlu0 %377  ;;  %v1519_v25 = vsel %vm209_vm0, %v1517_v9, %v1516_v49  ;;  %v2201_v7 = vmax.f32 %v5314_v26, %v6236_v48  ;;  %v2202_v40 = vmax.f32 %v5328_v28, %v6237_v63  ;;  %v2203_v13 = vmax.f32 %v5324_v27, %v6238_v21 }
 0x309   : > { %1356 = vrot.lane.b32.xlu0 %v5304_v20, %s3974_s18  ;;  %1350 = vrot.lane.b32.xlu1 %v5304_v20, %s3973_s16  ;;  %v837_v22 = vmax.f32 %v835_v57, %v5039_v15  ;;  %v840_v62 = vmax.f32 %v838_v36, 0.0  ;;  %v1524_v15 = vsel %vm228_vm1, %v1522_v38, %v1523_v42  ;;  %v2204_v5 = vmax.f32 %v5346_v53, %v4224_v61  ;;  %v6240_v57 = vld [vmem:[#allocation19_spill] sm:$0xff]  ;;  %v6241_v36 = vld [vmem:[#allocation50_spill] sm:$0xff] }
 0x30a   : > { %v5367_v23 = vmax.f32 %v1466_v39, %v4944_v4  ;;  %v1467_v24 = vmax.f32 %v1459_v47, %v1465_v51  ;;  %v5369_v8 = vmin.f32 %v2201_v7, %v2203_v13  ;;  %v781_v33 = vmax.f32 %v719_v46, %v779_v44 }
 0x30b   : > { %v839_v52 = vsub.f32 %v6239_v2, %v837_v22  ;;  %v842_v11 = vmax.f32 %v780_v60, %v840_v62  ;;  %v1518_v61 = vsel %vm209_vm0, %v1516_v49, %v1517_v9  ;;  %v1554_v22 = vmul.f32 %v6241_v36, %v6240_v57 }
 0x30c   : > { %v436_v0 = vpop.permute.xlu1 %435  ;;  %v442_v31 = vpop.permute.xlu0 %441  ;;  %v1520_v62 = vmin.f32 %v1519_v25, %v4616_v35  ;;  %v1526_v48 = vmin.f32 %v1524_v15, %v4618_v19  ;;  %v5378_v39 = vmin.f32 %v2202_v40, %v2204_v5  ;;  %v1525_v51 = vsel %vm228_vm1, %v1523_v42, %v1522_v38  ;;  %v6242_v25 = vld [vmem:[#allocation51_spill] sm:$0xff] }
 0x30d   : > { %1416 = vrot.lane.b32.xlu0 %v5342_v58, %s3974_s18  ;;  %1410 = vrot.lane.b32.xlu1 %v5342_v58, %s3973_s16  ;;  %v841_v56 = vmax.f32 %v839_v52, 0.0  ;;  %v1023_v60 = vmul.f32 %v6241_v36, %v842_v11  ;;  %v5387_v49 = vmax.f32 %v1467_v24, %v4941_v10  ;;  %v1521_v9 = vmin.f32 %v1518_v61, %v4855_v18 }
 0x30e   : > { %3267 = vmatprep.mubr.f32.mxu1 %v842_v11  ;;  %v1528_v63 = vmax.f32 %v1520_v62, %v1526_v48  ;;  %v1527_v38 = vmin.f32 %v1525_v51, %v4853_v50  ;;  %v6243_v42 = vmov 1.0   ;;  %v439_v40 = vmin.f32 %v436_v0, %v6221_v41  ;;  %v6245_v62 = vld [vmem:[#allocation47_spill] sm:$0xff] }
 0x30f   : > { %v843_v47 = vmax.f32 %v781_v33, %v841_v56  ;;  %3232 = vmatprep.mubr.f32.mxu0 %v1023_v60  ;;  %v445_v21 = vmin.f32 %v442_v31, %v6222_v16  ;;  %v375_v13 = vmin.f32 %v5333_v34, %v6221_v41  ;;  %v385_v2 = vmin.f32 %v5335_v45, %v6222_v16  ;;  %v6244_v60 = vld [vmem:[#allocation42_spill] sm:$0xff]  ;;  %v6246_v51 = vld [vmem:[#allocation11_spill] sm:$0xff] }
 0x310   : > { %v370_v46 = vpop.permute.xlu1 %369  ;;  %v380_v44 = vpop.permute.xlu0 %379  ;;  %v5407_v15 = vmax.f32 %v1528_v63, %v5299_v17  ;;  %v1529_v34 = vmax.f32 %v1521_v9, %v1527_v38  ;;  %v5426_v48 = vmax.f32 %v6245_v62, %v6244_v60 }
 0x311   : > { %1476 = vrot.lane.b32.xlu0 %v5367_v23, %s3974_s18  ;;  %3268 = vmatmul.mubr.f32.vlgmr.msra.gmra.mxu1 %v843_v47  ;;  %v1024_v7 = vmul.f32 %v6242_v25, %v843_v47  ;;  %v447_v45 = vmax.f32 %v439_v40, %v445_v21  ;;  %v387_v31 = vmax.f32 %v375_v13, %v385_v2  ;;  %v6249_v21 = vld [vmem:[#allocation10_spill] sm:$0xff] }
 0x312   : > { %1470 = vrot.lane.b32.xlu1 %v5367_v23, %s3973_s16  ;;  %3306 = vmatpush3.msra.mxu1 %v6243_v42  ;;  %v376_v24 = vmin.f32 %v370_v46, %v6221_v41  ;;  %v386_v33 = vmin.f32 %v380_v44, %v6222_v16  ;;  %v5430_v47 = vmax.f32 %v1529_v34, %v5296_v43  ;;  %v6247_v44 = vld [vmem:[#allocation12_spill] sm:$0xff] }
 0x313   : > { %3337 = vmatprep.mubr.f32.mxu1 %v1554_v22  ;;  %3307 = vmatprep.subr.mxu1 %v6243_v42  ;;  %v2105_v46 = vmin.f32 %v6246_v51, %v4616_v35  ;;  %v2111_v9 = vmin.f32 %v6247_v44, %v4618_v19  ;;  %v389_v13 = vmax.f32 %v387_v31, %v6249_v21  ;;  %v6255_v51 = vld [vmem:[#allocation29_spill] sm:$0xff]  ;;  %v6257_v21 = vld [vmem:[#allocation34_spill] sm:$0xff] }
 0x314   : > { %3233 = vmatmul.mubr.f32.vlgmr.msra.gmra.mxu0 %v1024_v7  ;;  %v444_v52 = vpop.permute.xlu0 %443  ;;  %v438_v11 = vpop.permute.xlu1 %437  ;;  %3308 = vmatpush3.msra.mxu1 %v6243_v42  ;;  %v6248_v7 = vld [vmem:[#allocation27_spill] sm:$0xff]  ;;  %v388_v43 = vmax.f32 %v376_v24, %v386_v33  ;;  %v6252_v24 = vld [vmem:[#allocation49_spill] sm:$0xff] }
 0x315   : > { %1478 = vrot.lane.b32.xlu0 %v5387_v49, %s3974_s18  ;;  %3271 = vmatpush3.msra.mxu0 %v6243_v42  ;;  %v446_v5 = vmin.f32 %v444_v52, %v6222_v16  ;;  %v440_v0 = vmin.f32 %v438_v11, %v6221_v41  ;;  %v449_v63 = vmax.f32 %v447_v45, %v6248_v7  ;;  %v6250_v11 = vld [vmem:[#allocation48_spill] sm:$0xff]  ;;  %v6251_v45 = vld [vmem:[#allocation31_spill] sm:$0xff] }
 0x316   : > { %1472 = vrot.lane.b32.xlu1 %v5387_v49, %s3973_s16  ;;  %3272 = vmatprep.subr.mxu0 %v6243_v42  ;;  %v2046_v34 = vmin.f32 %v6250_v11, %v4855_v18  ;;  %v2113_v31 = vmax.f32 %v2105_v46, %v2111_v9  ;;  %v2052_v33 = vmin.f32 %v6252_v24, %v4853_v50  ;;  %v6256_v46 = vld [vmem:[#allocation28_spill] sm:$0xff]  ;;  %v6260_v24 = vld [vmem:[#allocation22_spill] sm:$0xff] }
 0x317   : > { %3273 = vmatpush3.msra.mxu0 %v6243_v42  ;;  %3309 = vmatprep.subr.mxu1 %v6243_v42  ;;  %v448_v38 = vmax.f32 %v440_v0, %v446_v5  ;;  %v390_v9 = vmax.f32 %v388_v43, %v6256_v46  ;;  %v6259_v43 = vld [vmem:[#allocation38_spill] sm:$0xff]  ;;  %v6261_v46 = vld [vmem:[#allocation35_spill] sm:$0xff] }
 0x318   : > { %3274 = vmatprep.subr.mxu0 %v6243_v42  ;;  %v504_v17 = vpop.permute.xlu0 %503  ;;  %v498_v56 = vpop.permute.xlu1 %497  ;;  %3310 = vmatpush3.msra.mxu1 %v6243_v42 }
 0x319   : > { %1538 = vrot.lane.b32.xlu0 %v5407_v15, %s3974_s18  ;;  %3275 = vmatpush3.msra.mxu0 %v6243_v42  ;;  %v507_v61 = vmin.f32 %v504_v17, %v6222_v16  ;;  %v501_v22 = vmin.f32 %v498_v56, %v6221_v41  ;;  %v6253_v56 = vld [vmem:[#allocation36_spill] sm:$0xff]  ;;  %v450_v44 = vmax.f32 %v448_v38, %v6255_v51 }
 0x31a   : > { %1532 = vrot.lane.b32.xlu1 %v5407_v15, %s3973_s16  ;;  %3276 = vmatprep.subr.mxu0 %v6243_v42 }
 0x31b   : > { %v509_v40 = vmax.f32 %v501_v22, %v507_v61  ;;  %3277 = vmatpush3.msra.mxu0 %v6243_v42  ;;  %3311 = vmatprep.subr.mxu1 %v6243_v42  ;;  %v2106_v61 = vmin.f32 %v6253_v56, %v4855_v18  ;;  %v6254_v22 = vld [vmem:[#allocation21_spill] sm:$0xff]  ;;  %v452_v56 = vsub.f32 %v6260_v24, %v450_v44 }
 0x31c   : > { %3278 = vmatprep.subr.mxu0 %v6243_v42  ;;  %v506_v2 = vpop.permute.xlu0 %505  ;;  %v500_v52 = vpop.permute.xlu1 %499  ;;  %3312 = vmatpush3.msra.mxu1 %v6243_v42  ;;  %v451_v62 = vsub.f32 %v6254_v22, %v449_v63  ;;  %v6258_v63 = vld [vmem:[#allocation52_spill] sm:$0xff] }
 0x31d   : > { %1540 = vrot.lane.b32.xlu0 %v5430_v47, %s3974_s18  ;;  %v511_v5 = vmax.f32 %v509_v40, %v6251_v45  ;;  %3279 = vmatpush3.msra.mxu0 %v6243_v42  ;;  %v508_v0 = vmin.f32 %v506_v2, %v6222_v16  ;;  %v502_v17 = vmin.f32 %v500_v52, %v6221_v41 }
 0x31e   : > { %1534 = vrot.lane.b32.xlu1 %v5430_v47, %s3973_s16  ;;  %3280 = vmatprep.subr.mxu0 %v6243_v42  ;;  %v391_v40 = vsub.f32 %v6241_v36, %v389_v13  ;;  %v5476_v36 = vmax.f32 %v2113_v31, %v4927_v37  ;;  %v2054_v13 = vmax.f32 %v2046_v34, %v2052_v33 }
 0x31f   : > { %v510_v7 = vmax.f32 %v502_v17, %v508_v0  ;;  %3281 = vmatpush3.msra.mxu0 %v6243_v42  ;;  %3313 = vmatprep.subr.mxu1 %v6243_v42  ;;  %v513_v2 = vsub.f32 %v6257_v21, %v511_v5  ;;  %v2112_v5 = vmin.f32 %v6259_v43, %v4853_v50  ;;  %v453_v17 = vmax.f32 %v451_v62, 0.0  ;;  %v6262_v62 = vld [vmem:[#allocation53_spill] sm:$0xff] }
 0x320   : > { %3282 = vmatprep.subr.mxu0 %v6243_v42  ;;  %v566_v52 = vpop.permute.xlu0 %565  ;;  %v560_v11 = vpop.permute.xlu1 %559  ;;  %3314 = vmatpush3.msra.mxu1 %v6243_v42  ;;  %v393_v51 = vmax.f32 %v391_v40, 0.0 }
 0x321   : > { %2063 = vrot.lane.b32.xlu0 %v5426_v48, %s3974_s18  ;;  %v512_v38 = vmax.f32 %v510_v7, %v6258_v63  ;;  %3283 = vmatpush3.msra.mxu0 %v6243_v42  ;;  %v569_v45 = vmin.f32 %v566_v52, %v6222_v16  ;;  %v563_v0 = vmin.f32 %v560_v11, %v6221_v41  ;;  %v515_v33 = vmax.f32 %v513_v2, 0.0 }
 0x322   : > { %2057 = vrot.lane.b32.xlu1 %v5426_v48, %s3973_s16  ;;  %3284 = vmatprep.subr.mxu0 %v6243_v42  ;;  %v392_v7 = vsub.f32 %v6242_v25, %v390_v9  ;;  %v6263_v25 = vld [vmem:[#allocation41_spill] sm:$0xff]  ;;  %v2114_v11 = vmax.f32 %v2106_v61, %v2112_v5  ;;  %v455_v2 = vmax.f32 %v393_v51, %v453_v17  ;;  %v454_v63 = vmax.f32 %v452_v56, 0.0  ;;  %v6265_v56 = vld [vmem:[#allocation54_spill] sm:$0xff] }
 0x323   : > { %v571_v22 = vmax.f32 %v563_v0, %v569_v45  ;;  %3285 = vmatpush3.msra.mxu0 %v6243_v42  ;;  %3315 = vmatprep.subr.mxu1 %v6243_v42  ;;  %v514_v31 = vsub.f32 %v6261_v46, %v512_v38  ;;  %v5497_v9 = vmax.f32 %v2054_v13, %v6263_v25  ;;  %v6264_v38 = vld [vmem:[#allocation44_spill] sm:$0xff] }
 0x324   : > { %3286 = vmatprep.subr.mxu0 %v6243_v42  ;;  %v568_v21 = vpop.permute.xlu0 %567  ;;  %v562_v34 = vpop.permute.xlu1 %561  ;;  %3316 = vmatpush3.msra.mxu1 %v6243_v42  ;;  %v394_v43 = vmax.f32 %v392_v7, 0.0  ;;  %v2167_v13 = vmin.f32 %v5314_v26, %v4616_v35  ;;  %v2173_v61 = vmin.f32 %v5324_v27, %v4618_v19  ;;  %v517_v5 = vmax.f32 %v455_v2, %v515_v33  ;;  %v6266_v7 = vld [vmem:[#allocation45_spill] sm:$0xff] }
 0x325   : > { %2123 = vrot.lane.b32.xlu0 %v5476_v36, %s3974_s18  ;;  %v573_v44 = vmax.f32 %v571_v22, %v6262_v62  ;;  %3287 = vmatpush3.msra.mxu0 %v6243_v42  ;;  %v570_v52 = vmin.f32 %v568_v21, %v6222_v16  ;;  %v564_v40 = vmin.f32 %v562_v34, %v6221_v41  ;;  %v516_v17 = vmax.f32 %v514_v31, 0.0 }
 0x326   : > { %2117 = vrot.lane.b32.xlu1 %v5476_v36, %s3973_s16  ;;  %3288 = vmatprep.subr.mxu0 %v6243_v42  ;;  %v5517_v51 = vmax.f32 %v2114_v11, %v4924_v32  ;;  %v456_v26 = vmax.f32 %v394_v43, %v454_v63  ;;  %v2175_v31 = vmax.f32 %v2167_v13, %v2173_v61  ;;  %v6268_v63 = vld [vmem:[#allocation20_spill] sm:$0xff] }
 0x327   : > { %v575_v45 = vsub.f32 %v6264_v38, %v573_v44  ;;  %v572_v0 = vmax.f32 %v564_v40, %v570_v52  ;;  %3289 = vmatpush3.msra.mxu0 %v6243_v42  ;;  %3317 = vmatprep.subr.mxu1 %v6243_v42  ;;  %v2168_v21 = vmin.f32 %v5328_v28, %v4855_v18  ;;  %v6267_v44 = vld [vmem:[#allocation9_spill] sm:$0xff] }
 0x328   : > { %3290 = vmatprep.subr.mxu0 %v6243_v42  ;;  %3318 = vmatpush3.msra.mxu1 %v6243_v42  ;;  %v2174_v34 = vmin.f32 %v5346_v53, %v4853_v50  ;;  %v518_v33 = vmax.f32 %v456_v26, %v516_v17  ;;  %v5544_v28 = vmax.f32 %v2175_v31, %v5255_v12 }
 0x329   : > { %2065 = vrot.lane.b32.xlu0 %v5497_v9, %s3974_s18  ;;  %v577_v24 = vmax.f32 %v575_v45, 0.0  ;;  %v574_v22 = vmax.f32 %v572_v0, %v6265_v56  ;;  %3291 = vmatpush3.msra.mxu0 %v6243_v42 }
 0x32a   : > { %2059 = vrot.lane.b32.xlu1 %v5497_v9, %s3973_s16  ;;  %3292 = vmatprep.subr.mxu0 %v6243_v42  ;;  %v2176_v53 = vmax.f32 %v2168_v21, %v2174_v34 }
 0x32b   : > { %v576_v27 = vsub.f32 %v6266_v7, %v574_v22  ;;  %3293 = vmatpush3.msra.mxu0 %v6243_v42  ;;  %3319 = vmatprep.subr.mxu1 %v6243_v42  ;;  %v5522_v46 = vmax.f32 %v517_v5, %v577_v24 }
 0x32c   : > { %3294 = vmatprep.subr.mxu0 %v6243_v42  ;;  %3320 = vmatpush3.msra.mxu1 %v6243_v42  ;;  %v5558_v2 = vmax.f32 %v2176_v53, %v5252_v54 }
 0x32d   : > { %2125 = vrot.lane.b32.xlu0 %v5517_v51, %s3974_s18  ;;  %v578_v62 = vmax.f32 %v576_v27, 0.0  ;;  %3295 = vmatpush3.msra.mxu0 %v6243_v42  ;;  %v1201_v52 = vmul.f32 %v6267_v44, %v5522_v46 }
 0x32e   : > { %2119 = vrot.lane.b32.xlu1 %v5517_v51, %s3973_s16  ;;  %3296 = vmatprep.subr.mxu0 %v6243_v42 }
 0x32f   : > { %v5538_v40 = vmax.f32 %v518_v33, %v578_v62  ;;  %3297 = vmatpush3.msra.mxu0 %v6243_v42  ;;  %3302 = vmatprep.mubr.f32.mxu0 %v1201_v52 }
 0x330   : > { %3298 = vmatprep.subr.mxu0 %v6243_v42  ;;  %3321 = vmatprep.subr.mxu1 %v6243_v42 }
 0x331   : > { %3299 = vmatpush3.msra.mxu0 %v6243_v42  ;;  %3322 = vmatpush3.msra.mxu1 %v6243_v42  ;;  %v1202_v11 = vmul.f32 %v6206_v59, %v5538_v40  ;;  %v5582_v59 = vld [vmem:[%s4130_s26 + $0x8] sm:$0xff] }
 0x332   : > { %3300 = vmatprep.subr.mxu0 %v6243_v42  ;;  %2185 = vrot.lane.b32.xlu0 %v5544_v28, %s3974_s18  ;;  %v1555_v38 = vmul.f32 %v5582_v59, %v6268_v63 }
 0x333   : > { %2179 = vrot.lane.b32.xlu1 %v5544_v28, %s3973_s16  ;;  %3301 = vmatpush3.msra.mxu0 %v6243_v42 }
 0x334   : > { %3323 = vmatprep.subr.mxu1 %v6243_v42  ;;  %3303 = vmatmul.mubr.f32.vlgmr.msra.gmra.mxu0 %v1202_v11 }
 0x335   : > { %3324 = vmatpush3.msra.mxu1 %v6243_v42  ;;  %3340 = vmatprep.subr.mxu0 %v6243_v42 }
 0x336   : > { %3325 = vmatprep.subr.mxu1 %v6243_v42  ;;  %2187 = vrot.lane.b32.xlu0 %v5558_v2, %s3974_s18 }
 0x337   : > { %3326 = vmatpush3.msra.mxu1 %v6243_v42  ;;  %2181 = vrot.lane.b32.xlu1 %v5558_v2, %s3973_s16 }
 0x338   : > { %3327 = vmatprep.subr.mxu1 %v6243_v42  ;;  %3341 = vmatpush3.msra.mxu0 %v6243_v42 }
 0x339   : > { %3328 = vmatpush3.msra.mxu1 %v6243_v42  ;;  %3342 = vmatprep.subr.mxu0 %v6243_v42 }
 0x33a   : > { %3329 = vmatprep.subr.mxu1 %v6243_v42  ;;  %3343 = vmatpush3.msra.mxu0 %v6243_v42 }
 0x33b   : > { %3330 = vmatpush3.msra.mxu1 %v6243_v42  ;;  %3344 = vmatprep.subr.mxu0 %v6243_v42 }
 0x33c   : > { %3331 = vmatprep.subr.mxu1 %v6243_v42  ;;  %3345 = vmatpush3.msra.mxu0 %v6243_v42 }
 0x33d   : > { %3332 = vmatpush3.msra.mxu1 %v6243_v42  ;;  %3346 = vmatprep.subr.mxu0 %v6243_v42 }
 0x33e   : > { %3333 = vmatprep.subr.mxu1 %v6243_v42  ;;  %3347 = vmatpush3.msra.mxu0 %v6243_v42 }
 0x33f   : > { %3334 = vmatpush3.msra.mxu1 %v6243_v42  ;;  %3348 = vmatprep.subr.mxu0 %v6243_v42 }
 0x340   : > { %3335 = vmatprep.subr.mxu1 %v6243_v42  ;;  %3349 = vmatpush3.msra.mxu0 %v6243_v42 }
 0x341   : > { %3336 = vmatpush3.msra.mxu1 %v6243_v42  ;;  %3350 = vmatprep.subr.mxu0 %v6243_v42 }
 0x342   : > { %3338 = vmatmul.mubr.f32.vlgmr.msra.gmra.mxu1 %v1555_v38  ;;  %3351 = vmatpush3.msra.mxu0 %v6243_v42 }
 0x343   : > { %3352 = vmatprep.subr.mxu0 %v6243_v42  ;;  %3372 = vmatprep.mubr.msk.f32.mxu0 %vm1294_vm10, %v6243_v42 }
 0x344   : > { %3353 = vmatpush3.msra.mxu0 %v6243_v42  ;;  %3375 = vmatprep.subr.mxu1 %v6243_v42 }
 0x345   : > { %3354 = vmatprep.subr.mxu0 %v6243_v42  ;;  %3376 = vmatpush3.msra.mxu1 %v6243_v42 }
 0x346   : > { %3355 = vmatpush3.msra.mxu0 %v6243_v42  ;;  %3377 = vmatprep.subr.mxu1 %v6243_v42 }
 0x347   : > { %3356 = vmatprep.subr.mxu0 %v6243_v42  ;;  %3378 = vmatpush3.msra.mxu1 %v6243_v42 }
 0x348   : > { %3357 = vmatpush3.msra.mxu0 %v6243_v42  ;;  %3379 = vmatprep.subr.mxu1 %v6243_v42 }
 0x349   : > { %3358 = vmatprep.subr.mxu0 %v6243_v42  ;;  %3380 = vmatpush3.msra.mxu1 %v6243_v42 }
 0x34a   : > { %3359 = vmatpush3.msra.mxu0 %v6243_v42  ;;  %3381 = vmatprep.subr.mxu1 %v6243_v42 }
 0x34b   : > { %3360 = vmatprep.subr.mxu0 %v6243_v42  ;;  %3382 = vmatpush3.msra.mxu1 %v6243_v42 }
 0x34c   : > { %3361 = vmatpush3.msra.mxu0 %v6243_v42  ;;  %3383 = vmatprep.subr.mxu1 %v6243_v42 }
 0x34d   : > { %3362 = vmatprep.subr.mxu0 %v6243_v42  ;;  %3384 = vmatpush3.msra.mxu1 %v6243_v42 }
 0x34e   : > { %3363 = vmatpush3.msra.mxu0 %v6243_v42  ;;  %3385 = vmatprep.subr.mxu1 %v6243_v42 }
 0x34f   : > { %3364 = vmatprep.subr.mxu0 %v6243_v42  ;;  %3386 = vmatpush3.msra.mxu1 %v6243_v42 }
 0x350   : > { %3365 = vmatpush3.msra.mxu0 %v6243_v42  ;;  %3387 = vmatprep.subr.mxu1 %v6243_v42 }
 0x351   : > { %3366 = vmatprep.subr.mxu0 %v6243_v42  ;;  %3388 = vmatpush3.msra.mxu1 %v6243_v42 }
 0x352   : > { %3367 = vmatpush3.msra.mxu0 %v6243_v42  ;;  %3389 = vmatprep.subr.mxu1 %v6243_v42 }
 0x353   : > { %3368 = vmatprep.subr.mxu0 %v6243_v42  ;;  %3390 = vmatpush3.msra.mxu1 %v6243_v42 }
 0x354   : > { %3369 = vmatpush3.msra.mxu0 %v6243_v42  ;;  %3391 = vmatprep.subr.mxu1 %v6243_v42 }
 0x355   : > { %3370 = vmatprep.subr.mxu0 %v6243_v42  ;;  %3392 = vmatpush3.msra.mxu1 %v6243_v42 }
 0x356   : > { %3371 = vmatpush3.msra.mxu0 %v6243_v42  ;;  %3393 = vmatprep.subr.mxu1 %v6243_v42 }
 0x357   : > { %3373 = vmatmul.mubr.msk.f32.vlgmr.msra.gmra.mxu0 %vm1295_vm11, %v6243_v42  ;;  %3410 = vmatprep.subr.mxu0 %v6243_v42 }
 0x358   : > { %3411 = vmatpush3.msra.mxu0 %v6243_v42  ;;  %3394 = vmatpush3.msra.mxu1 %v6243_v42 }
 0x359   : > { %3412 = vmatprep.subr.mxu0 %v6243_v42  ;;  %3395 = vmatprep.subr.mxu1 %v6243_v42 }
 0x35a   : > { %3413 = vmatpush3.msra.mxu0 %v6243_v42  ;;  %3396 = vmatpush3.msra.mxu1 %v6243_v42 }
 0x35b   : > { %3414 = vmatprep.subr.mxu0 %v6243_v42  ;;  %3397 = vmatprep.subr.mxu1 %v6243_v42 }
 0x35c   : > { %3415 = vmatpush3.msra.mxu0 %v6243_v42  ;;  %3398 = vmatpush3.msra.mxu1 %v6243_v42 }
 0x35d   : > { %3416 = vmatprep.subr.mxu0 %v6243_v42  ;;  %3399 = vmatprep.subr.mxu1 %v6243_v42 }
 0x35e   : > { %3417 = vmatpush3.msra.mxu0 %v6243_v42  ;;  %3400 = vmatpush3.msra.mxu1 %v6243_v42 }
 0x35f   : > { %3418 = vmatprep.subr.mxu0 %v6243_v42  ;;  %3401 = vmatprep.subr.mxu1 %v6243_v42 }
 0x360   : > { %3419 = vmatpush3.msra.mxu0 %v6243_v42  ;;  %3402 = vmatpush3.msra.mxu1 %v6243_v42 }
 0x361   : > { %3420 = vmatprep.subr.mxu0 %v6243_v42  ;;  %3403 = vmatprep.subr.mxu1 %v6243_v42 }
 0x362   : > { %3421 = vmatpush3.msra.mxu0 %v6243_v42  ;;  %3404 = vmatpush3.msra.mxu1 %v6243_v42 }
 0x363   : > { %3422 = vmatprep.subr.mxu0 %v6243_v42  ;;  %3405 = vmatprep.subr.mxu1 %v6243_v42 }
 0x364   : > { %3423 = vmatpush3.msra.mxu0 %v6243_v42  ;;  %3406 = vmatpush3.msra.mxu1 %v6243_v42 }
 0x365   : > { %3424 = vmatprep.subr.mxu0 %v6243_v42  ;;  %3445 = vmatprep.subr.mxu1 %v6243_v42 }
 0x366   : > { %3425 = vmatpush3.msra.mxu0 %v6243_v42 }
 0x367   : > { %3426 = vmatprep.subr.mxu0 %v6243_v42 }
 0x368   : > { %3427 = vmatpush3.msra.mxu0 %v6243_v42 }
 0x369   : > { %3428 = vmatprep.subr.mxu0 %v6243_v42 }
 0x36a   : > { %3429 = vmatpush3.msra.mxu0 %v6243_v42 }
 0x36b   : > { %3430 = vmatprep.subr.mxu0 %v6243_v42 }
 0x36c   : > { %3431 = vmatpush3.msra.mxu0 %v6243_v42 }
 0x36d   : > { %3432 = vmatprep.subr.mxu0 %v6243_v42 }
 0x36e   : > { %3433 = vmatpush3.msra.mxu0 %v6243_v42 }
 0x36f   : > { %v3865_v43 = vpop.permute.xlu0 %3864  ;;  %v3860_v13 = vpop.permute.xlu1 %3859  ;;  %3434 = vmatprep.subr.mxu0 %v6243_v42 }
 0x370   : > { %v3867_v61 = vunpack.i.h.bf16 %v3865_v43  ;;  %v3866_v5 = vunpack.i.l.bf16 %v3865_v43  ;;  %v3862_v17 = vunpack.i.h.bf16 %v3860_v13  ;;  %v3861_v24 = vunpack.i.l.bf16 %v3860_v13  ;;  %3435 = vmatpush3.msra.mxu0 %v6243_v42 }
 0x371   : > { %3436 = vmatprep.subr.mxu0 %v6243_v42 }
 0x372   : > { %v2216_v56 = vmax.f32 %v3867_v61, %v4241_v14  ;;  %v2215_v22 = vmax.f32 %v3866_v5, %v4241_v14  ;;  %v2210_v26 = vmax.f32 %v3862_v17, %v4231_v1  ;;  %v2209_v7 = vmax.f32 %v3861_v24, %v4231_v1  ;;  %3437 = vmatpush3.msra.mxu0 %v6243_v42 }
 0x373   : > { %v1355_v27 = vpop.permute.xlu0 %1354  ;;  %v1349_v31 = vpop.permute.xlu1 %1348  ;;  %3438 = vmatprep.subr.mxu0 %v6243_v42 }
 0x374   : > { %v2220_v21 = vmin.f32 %v2210_v26, %v2216_v56  ;;  %v2219_v34 = vmin.f32 %v2209_v7, %v2215_v22  ;;  %3439 = vmatpush3.msra.mxu0 %v6243_v42 }
 0x375   : > { %3440 = vmatprep.subr.mxu0 %v6243_v42 }
 0x376   : > { %v2222_v33 = vmin.f32 %v5378_v39, %v2220_v21  ;;  %v2221_v14 = vmin.f32 %v5369_v8, %v2219_v34  ;;  %3441 = vmatpush3.msra.mxu0 %v6243_v42 }
 0x377   : > { %v1415_v62 = vpop.permute.xlu0 %1414  ;;  %v1409_v1 = vpop.permute.xlu1 %1408  ;;  %3480 = vmatprep.subr.mxu0 %v6243_v42 }
 0x378   : > { %v2224_v44 = vmin.f32 %v2222_v33, %v5252_v54  ;;  %v2223_v52 = vmin.f32 %v2221_v14, %v5255_v12  ;;  %v1418_v5 = vmin.f32 %v1415_v62, %v6222_v16  ;;  %v1412_v17 = vmin.f32 %v1409_v1, %v6221_v41 }
 0x37a   : > { %v2226_v53 = vrot.slane %v2224_v44, 7  ;;  %v2232_v11 = vrot.slane %v2224_v44, 1  ;;  %v2225_v38 = vrot.slane %v2223_v52, 7  ;;  %v2231_v45 = vrot.slane %v2223_v52, 1 }
 0x37b   : > { %v1357_v0 = vpop.permute.xlu0 %1356  ;;  %v1351_v39 = vpop.permute.xlu1 %1350  ;;  %v1420_v62 = vmax.f32 %v1412_v17, %v1418_v5 }
 0x37c   : > { %v2228_v8 = vsel %vm209_vm0, %v2226_v53, %v2225_v38  ;;  %v2233_v43 = vsel %vm228_vm1, %v2231_v45, %v2232_v11  ;;  %v2227_v24 = vsel %vm209_vm0, %v2225_v38, %v2226_v53  ;;  %v2234_v56 = vsel %vm228_vm1, %v2232_v11, %v2231_v45 }
 0x37d   : > { %v2229_v13 = vmin.f32 %v2228_v8, %v4616_v35  ;;  %v2235_v61 = vmin.f32 %v2233_v43, %v4618_v19  ;;  %v2230_v21 = vmin.f32 %v2227_v24, %v4855_v18  ;;  %v2236_v34 = vmin.f32 %v2234_v56, %v4853_v50 }
 0x37e   : > { %v1358_v35 = vmin.f32 %v1355_v27, %v6222_v16  ;;  %v1352_v19 = vmin.f32 %v1349_v31, %v6221_v41  ;;  %v1359_v27 = vmin.f32 %v1357_v0, %v6222_v16  ;;  %v1353_v31 = vmin.f32 %v1351_v39, %v6221_v41 }
 0x37f   : > { %v1417_v22 = vpop.permute.xlu0 %1416  ;;  %v1411_v26 = vpop.permute.xlu1 %1410  ;;  %v2237_v7 = vmax.f32 %v2229_v13, %v2235_v61  ;;  %v2238_v14 = vmax.f32 %v2230_v21, %v2236_v34  ;;  %v1422_v45 = vmax.f32 %v1420_v62, %v5210_v29  ;;  %v6271_v29 = vld [vmem:[#allocation33_spill] sm:$0xff] }
 0x380   : > { %v1419_v1 = vmin.f32 %v1417_v22, %v6222_v16  ;;  %v1413_v3 = vmin.f32 %v1411_v26, %v6221_v41  ;;  %v1360_v50 = vmax.f32 %v1352_v19, %v1358_v35  ;;  %v1361_v0 = vmax.f32 %v1353_v31, %v1359_v27  ;;  %v6272_v35 = vld [vmem:[#allocation43_spill] sm:$0xff] }
 0x381   : > { %v5710_v33 = vmax.f32 %v2237_v7, %v2223_v52  ;;  %v5718_v18 = vmax.f32 %v2238_v14, %v2224_v44  ;;  %v1424_v24 = vsub.f32 %v6271_v29, %v1422_v45  ;;  %v5751_v29 = vld [vmem:[%s4130_s26] sm:$0xff] }
 0x382   : > { %v1421_v8 = vmax.f32 %v1413_v3, %v1419_v1  ;;  %v1362_v44 = vmax.f32 %v1360_v50, %v5206_v6  ;;  %v1363_v21 = vmax.f32 %v1361_v0, %v5304_v20 }
 0x383   : > { %v1477_v53 = vpop.permute.xlu0 %1476  ;;  %2247 = vrot.lane.b32.xlu0 %v5710_v33, %s3974_s18  ;;  %2241 = vrot.lane.b32.xlu1 %v5710_v33, %s3973_s16  ;;  %v1426_v62 = vmax.f32 %v1424_v24, 0.0 }
 0x384   : > { %v1480_v52 = vmin.f32 %v1477_v53, %v6222_v16  ;;  %v1471_v11 = vpop.permute.xlu1 %1470  ;;  %v1423_v56 = vmax.f32 %v1421_v8, %v5342_v58  ;;  %v1364_v7 = vsub.f32 %v6240_v57, %v1362_v44  ;;  %v1365_v50 = vsub.f32 %v6268_v63, %v1363_v21 }
 0x385   : > { %v1474_v38 = vmin.f32 %v1471_v11, %v6221_v41 }
 0x386   : > { %v1425_v1 = vsub.f32 %v6235_v30, %v1423_v56  ;;  %v1366_v53 = vmax.f32 %v1364_v7, 0.0  ;;  %v6273_v56 = vld [vmem:[#allocation25_spill] sm:$0xff] }
 0x387   : > { %v1482_v43 = vmax.f32 %v1474_v38, %v1480_v52  ;;  %v1479_v13 = vpop.permute.xlu0 %1478  ;;  %2249 = vrot.lane.b32.xlu0 %v5718_v18, %s3974_s18  ;;  %2243 = vrot.lane.b32.xlu1 %v5718_v18, %s3973_s16 }
 0x388   : > { %v1481_v39 = vmin.f32 %v1479_v13, %v6222_v16  ;;  %v1473_v61 = vpop.permute.xlu1 %1472  ;;  %v1427_v38 = vmax.f32 %v1425_v1, 0.0  ;;  %v1428_v8 = vmax.f32 %v1366_v53, %v1426_v62  ;;  %v1911_v1 = vmul.f32 %v6268_v63, %v5538_v40 }
 0x389   : > { %v1484_v5 = vmax.f32 %v1482_v43, %v5367_v23  ;;  %v1475_v17 = vmin.f32 %v1473_v61, %v6221_v41  ;;  %v1367_v43 = vmax.f32 %v1365_v50, 0.0 }
 0x38b   : > { %v1483_v22 = vmax.f32 %v1475_v17, %v1481_v39  ;;  %v1539_v26 = vpop.permute.xlu0 %1538  ;;  %v1486_v19 = vsub.f32 %v6272_v35, %v1484_v5  ;;  %v1429_v61 = vmax.f32 %v1367_v43, %v1427_v38  ;;  %v6274_v35 = vld [vmem:[#allocation26_spill] sm:$0xff] }
 0x38c   : > { %v1542_v6 = vmin.f32 %v1539_v26, %v6222_v16  ;;  %v1533_v34 = vpop.permute.xlu1 %1532  ;;  %v3199_v26 = vpop.f32.mrf.mxu1 }
 0x38d   : > { %v1485_v14 = vmax.f32 %v1483_v22, %v5387_v49  ;;  %v1536_v23 = vmin.f32 %v1533_v34, %v6221_v41  ;;  %v1488_v31 = vmax.f32 %v1486_v19, 0.0  ;;  %v2264_v19 = vmul.f32 %v5582_v59, %v6274_v35 }
 0x38e   : > { %v1001_v34 = vpop.f32.mrf.mxu1 }
 0x38f   : > { %v1544_v3 = vmax.f32 %v1536_v23, %v1542_v6  ;;  %v1541_v58 = vpop.permute.xlu0 %1540  ;;  %v1487_v52 = vsub.f32 %v4599_v55, %v1485_v14  ;;  %v1490_v0 = vmax.f32 %v1428_v8, %v1488_v31  ;;  %v1011_v14 = vsel %vm921_vm14, %v3199_v26, 0.0 }
 0x390   : > { %v1543_v27 = vmin.f32 %v1541_v58, %v6222_v16  ;;  %v1535_v20 = vpop.permute.xlu1 %1534  ;;  %v1010_v23 = vsel %vm921_vm14, %v1001_v34, 0.0 }
 0x391   : > { %v1546_v11 = vmax.f32 %v1544_v3, %v5407_v15  ;;  %v1537_v49 = vmin.f32 %v1535_v20, %v6221_v41  ;;  %v1489_v13 = vmax.f32 %v1487_v52, 0.0  ;;  %v1012_v3 = vadd.f32 %v1011_v14, %v1010_v23 }
 0x393   : > { %v1545_v45 = vmax.f32 %v1537_v49, %v1543_v27  ;;  %v1548_v30 = vsub.f32 %v4944_v4, %v1546_v11  ;;  %v1491_v17 = vmax.f32 %v1429_v61, %v1489_v13  ;;  %v2263_v4 = vmul.f32 %v5751_v29, %v6273_v56  ;;  %v5856_v63 = vpop.permute.xlu0 %2063 }
 0x394   : > { %v5860_v53 = vpop.permute.xlu1 %2057 }
 0x395   : > { %v1547_v44 = vmax.f32 %v1545_v45, %v5430_v47  ;;  %v1550_v39 = vmax.f32 %v1548_v30, 0.0 }
 0x397   : > { %v1549_v5 = vsub.f32 %v4941_v10, %v1547_v44  ;;  %v1552_v55 = vmax.f32 %v1490_v0, %v1550_v39  ;;  %v1910_v10 = vmul.f32 %v6240_v57, %v5522_v46  ;;  %v3164_v57 = vpop.f32.mrf.mxu0  ;;  %v5872_v27 = vpop.permute.xlu0 %2123 }
 0x398   : > { %v923_v21 = vsel %vm921_vm14, %v3164_v57, 0.0  ;;  %v5876_v20 = vpop.permute.xlu1 %2117 }
 0x399   : > { %v1551_v15 = vmax.f32 %v1549_v5, 0.0  ;;  %3442 = vmatprep.mubr.f32.mxu0 %v1552_v55  ;;  %v1732_v24 = vmul.f32 %v5751_v29, %v1552_v55  ;;  %v912_v7 = vpop.f32.mrf.mxu0 }
 0x39a   : > { %v922_v6 = vsel %vm921_vm14, %v912_v7, 0.0 }
 0x39b   : > { %3407 = vmatprep.mubr.f32.mxu1 %v1732_v24  ;;  %v1553_v22 = vmax.f32 %v1491_v17, %v1551_v15  ;;  %v924_v62 = vadd.f32 %v923_v21, %v922_v6  ;;  %v5893_v13 = vpop.permute.xlu0 %2065  ;;  %v2127_v17 = vmin.f32 %v5872_v27, %v6222_v16  ;;  %v2121_v15 = vmin.f32 %v5876_v20, %v6221_v41 }
 0x39c   : > { %v5895_v44 = vpop.permute.xlu1 %2059  ;;  %v2067_v24 = vmin.f32 %v5856_v63, %v6222_v16  ;;  %v2068_v34 = vmin.f32 %v5893_v13, %v6222_v16 }
 0x39d   : > { %3443 = vmatmul.mubr.f32.vlgmr.msra.gmra.mxu0 %v1553_v22  ;;  %v1733_v47 = vmul.f32 %v5582_v59, %v1553_v22  ;;  %v2129_v26 = vmax.f32 %v2121_v15, %v2127_v17 }
 0x39e   : > { %3481 = vmatpush3.msra.mxu0 %v6243_v42  ;;  %3512 = vmatprep.mubr.f32.mxu0 %v2263_v4  ;;  %v2061_v4 = vmin.f32 %v5860_v53, %v6221_v41 }
 0x39f   : > { %3408 = vmatmul.mubr.f32.vlgmr.msra.gmra.mxu1 %v1733_v47  ;;  %3482 = vmatprep.subr.mxu0 %v6243_v42  ;;  %v2126_v39 = vpop.permute.xlu0 %2125 }
 0x3a0   : > { %3446 = vmatpush3.msra.mxu1 %v6243_v42  ;;  %3477 = vmatprep.mubr.f32.mxu1 %v1910_v10  ;;  %v2120_v61 = vpop.permute.xlu1 %2119  ;;  %v2128_v7 = vmin.f32 %v2126_v39, %v6222_v16  ;;  %v2069_v6 = vmax.f32 %v2061_v4, %v2067_v24 }
 0x3a1   : > { %3447 = vmatprep.subr.mxu1 %v6243_v42  ;;  %3483 = vmatpush3.msra.mxu0 %v6243_v42  ;;  %v2122_v21 = vmin.f32 %v2120_v61, %v6221_v41 }
 0x3a2   : > { %3448 = vmatpush3.msra.mxu1 %v6243_v42  ;;  %3484 = vmatprep.subr.mxu0 %v6243_v42  ;;  %v2071_v58 = vmax.f32 %v2069_v6, %v5426_v48 }
 0x3a3   : > { %3449 = vmatprep.subr.mxu1 %v6243_v42  ;;  %3485 = vmatpush3.msra.mxu0 %v6243_v42 }
 0x3a4   : > { %3450 = vmatpush3.msra.mxu1 %v6243_v42  ;;  %3486 = vmatprep.subr.mxu0 %v6243_v42  ;;  %v2186_v5 = vpop.permute.xlu0 %2185  ;;  %v2073_v48 = vsub.f32 %v6273_v56, %v2071_v58 }
 0x3a5   : > { %3451 = vmatprep.subr.mxu1 %v6243_v42  ;;  %3487 = vmatpush3.msra.mxu0 %v6243_v42  ;;  %v2180_v55 = vpop.permute.xlu1 %2179  ;;  %v2189_v22 = vmin.f32 %v2186_v5, %v6222_v16 }
 0x3a6   : > { %3452 = vmatpush3.msra.mxu1 %v6243_v42  ;;  %3488 = vmatprep.subr.mxu0 %v6243_v42  ;;  %v2183_v47 = vmin.f32 %v2180_v55, %v6221_v41 }
 0x3a7   : > { %3453 = vmatprep.subr.mxu1 %v6243_v42  ;;  %3489 = vmatpush3.msra.mxu0 %v6243_v42 }
 0x3a8   : > { %3454 = vmatpush3.msra.mxu1 %v6243_v42  ;;  %3490 = vmatprep.subr.mxu0 %v6243_v42  ;;  %v2188_v10 = vpop.permute.xlu0 %2187  ;;  %v2191_v14 = vmax.f32 %v2183_v47, %v2189_v22 }
 0x3a9   : > { %3455 = vmatprep.subr.mxu1 %v6243_v42  ;;  %3491 = vmatpush3.msra.mxu0 %v6243_v42  ;;  %v2182_v57 = vpop.permute.xlu1 %2181  ;;  %v2190_v23 = vmin.f32 %v2188_v10, %v6222_v16 }
 0x3aa   : > { %3456 = vmatpush3.msra.mxu1 %v6243_v42  ;;  %3492 = vmatprep.subr.mxu0 %v6243_v42  ;;  %v2193_v53 = vmax.f32 %v2191_v14, %v5544_v28 }
 0x3ab   : > { %3457 = vmatprep.subr.mxu1 %v6243_v42  ;;  %3493 = vmatpush3.msra.mxu0 %v6243_v42 }
 0x3ac   : > { %3458 = vmatpush3.msra.mxu1 %v6243_v42  ;;  %3494 = vmatprep.subr.mxu0 %v6243_v42 }
 0x3ad   : > { %3459 = vmatprep.subr.mxu1 %v6243_v42  ;;  %3495 = vmatpush3.msra.mxu0 %v6243_v42 }
 0x3ae   : > { %3460 = vmatpush3.msra.mxu1 %v6243_v42  ;;  %3496 = vmatprep.subr.mxu0 %v6243_v42 }
 0x3af   : > { %3461 = vmatprep.subr.mxu1 %v6243_v42  ;;  %3497 = vmatpush3.msra.mxu0 %v6243_v42 }
 0x3b0   : > { %3462 = vmatpush3.msra.mxu1 %v6243_v42  ;;  %3498 = vmatprep.subr.mxu0 %v6243_v42 }
 0x3b1   : > { %3463 = vmatprep.subr.mxu1 %v6243_v42  ;;  %3499 = vmatpush3.msra.mxu0 %v6243_v42 }
 0x3b2   : > { %3464 = vmatpush3.msra.mxu1 %v6243_v42  ;;  %3500 = vmatprep.subr.mxu0 %v6243_v42 }
 0x3b3   : > { %3465 = vmatprep.subr.mxu1 %v6243_v42  ;;  %3501 = vmatpush3.msra.mxu0 %v6243_v42 }
 0x3b4   : > { %3466 = vmatpush3.msra.mxu1 %v6243_v42  ;;  %3502 = vmatprep.subr.mxu0 %v6243_v42 }
 0x3b5   : > { %3467 = vmatprep.subr.mxu1 %v6243_v42  ;;  %3503 = vmatpush3.msra.mxu0 %v6243_v42 }
 0x3b6   : > { %3468 = vmatpush3.msra.mxu1 %v6243_v42  ;;  %3504 = vmatprep.subr.mxu0 %v6243_v42 }
 0x3b7   : > { %3469 = vmatprep.subr.mxu1 %v6243_v42  ;;  %3505 = vmatpush3.msra.mxu0 %v6243_v42 }
 0x3b8   : > { %3470 = vmatpush3.msra.mxu1 %v6243_v42  ;;  %3506 = vmatprep.subr.mxu0 %v6243_v42 }
 0x3b9   : > { %3471 = vmatprep.subr.mxu1 %v6243_v42  ;;  %3507 = vmatpush3.msra.mxu0 %v6243_v42 }
 0x3ba   : > { %3472 = vmatpush3.msra.mxu1 %v6243_v42  ;;  %3508 = vmatprep.subr.mxu0 %v6243_v42 }
 0x3bb   : > { %3473 = vmatprep.subr.mxu1 %v6243_v42  ;;  %3509 = vmatpush3.msra.mxu0 %v6243_v42 }
 0x3bc   : > { %3474 = vmatpush3.msra.mxu1 %v6243_v42  ;;  %3510 = vmatprep.subr.mxu0 %v6243_v42 }
 0x3bd   : > { %3475 = vmatprep.subr.mxu1 %v6243_v42  ;;  %3511 = vmatpush3.msra.mxu0 %v6243_v42 }
 0x3be   : > { %3476 = vmatpush3.msra.mxu1 %v6243_v42  ;;  %3513 = vmatmul.mubr.f32.vlgmr.msra.gmra.mxu0 %v2264_v19  ;;  %v2062_v19 = vmin.f32 %v5895_v44, %v6221_v41 }
 0x3bf   : > { %3478 = vmatmul.mubr.f32.vlgmr.msra.gmra.mxu1 %v1911_v1  ;;  %3515 = vmatprep.subr.mxu1 %v6243_v42  ;;  %v2131_v1 = vmax.f32 %v2129_v26, %v5476_v36 }
 0x3c0   : > { %3516 = vmatpush3.msra.mxu1 %v6243_v42  ;;  %925 = vadd.xlane.f32.xlu1 %v924_v62  ;;  %v2184_v62 = vmin.f32 %v2182_v57, %v6221_v41  ;;  %v2070_v63 = vmax.f32 %v2062_v19, %v2068_v34 }
 0x3c1   : > { %3517 = vmatprep.subr.mxu1 %v6243_v42  ;;  %1013 = vadd.xlane.f32.xlu0 %v1012_v3  ;;  %v2130_v3 = vmax.f32 %v2122_v21, %v2128_v7  ;;  %v2133_v27 = vsub.f32 %v6244_v60, %v2131_v1  ;;  %v2620_v1 = vmul.f32 %v6274_v35, %v5538_v40 }
 0x3c2   : > { %3518 = vmatpush3.msra.mxu1 %v6243_v42  ;;  %3547 = vmatprep.mubr.msk.f32.mxu1 %vm2003_vm12, %v6243_v42 }
 0x3c3   : > { %3519 = vmatprep.subr.mxu1 %v6243_v42  ;;  %3550 = vmatprep.subr.mxu0 %v6243_v42  ;;  %v2132_v20 = vmax.f32 %v2130_v3, %v5517_v51 }
 0x3c4   : > { %3520 = vmatpush3.msra.mxu1 %v6243_v42  ;;  %3551 = vmatpush3.msra.mxu0 %v6243_v42 }
 0x3c5   : > { %3521 = vmatprep.subr.mxu1 %v6243_v42  ;;  %3552 = vmatprep.subr.mxu0 %v6243_v42 }
 0x3c6   : > { %3522 = vmatpush3.msra.mxu1 %v6243_v42  ;;  %3553 = vmatpush3.msra.mxu0 %v6243_v42 }
 0x3c7   : > { %3523 = vmatprep.subr.mxu1 %v6243_v42  ;;  %3554 = vmatprep.subr.mxu0 %v6243_v42 }
 0x3c8   : > { %3524 = vmatpush3.msra.mxu1 %v6243_v42  ;;  %3555 = vmatpush3.msra.mxu0 %v6243_v42 }
 0x3c9   : > { %3525 = vmatprep.subr.mxu1 %v6243_v42  ;;  %3556 = vmatprep.subr.mxu0 %v6243_v42 }
 0x3ca   : > { %3526 = vmatpush3.msra.mxu1 %v6243_v42  ;;  %3557 = vmatpush3.msra.mxu0 %v6243_v42 }
 0x3cb   : > { %3527 = vmatprep.subr.mxu1 %v6243_v42  ;;  %3558 = vmatprep.subr.mxu0 %v6243_v42 }
 0x3cc   : > { %3528 = vmatpush3.msra.mxu1 %v6243_v42  ;;  %3559 = vmatpush3.msra.mxu0 %v6243_v42 }
 0x3cd   : > { %3529 = vmatprep.subr.mxu1 %v6243_v42  ;;  %3560 = vmatprep.subr.mxu0 %v6243_v42 }
 0x3ce   : > { %3530 = vmatpush3.msra.mxu1 %v6243_v42  ;;  %3561 = vmatpush3.msra.mxu0 %v6243_v42 }
 0x3cf   : > { %3531 = vmatprep.subr.mxu1 %v6243_v42  ;;  %3562 = vmatprep.subr.mxu0 %v6243_v42 }
 0x3d0   : > { %3532 = vmatpush3.msra.mxu1 %v6243_v42  ;;  %3563 = vmatpush3.msra.mxu0 %v6243_v42 }
 0x3d1   : > { %3533 = vmatprep.subr.mxu1 %v6243_v42  ;;  %3564 = vmatprep.subr.mxu0 %v6243_v42  ;;  %v3269_v50 = vpop.f32.mrf.mxu1 }
 0x3d2   : > { %3534 = vmatpush3.msra.mxu1 %v6243_v42  ;;  %3565 = vmatpush3.msra.mxu0 %v6243_v42  ;;  %v1189_v52 = vsel %vm921_vm14, %v3269_v50, 0.0  ;;  %v2192_v50 = vmax.f32 %v2184_v62, %v2190_v23 }
 0x3d3   : > { %3535 = vmatprep.subr.mxu1 %v6243_v42  ;;  %3566 = vmatprep.subr.mxu0 %v6243_v42  ;;  %v1179_v31 = vpop.f32.mrf.mxu1 }
 0x3d4   : > { %3536 = vmatpush3.msra.mxu1 %v6243_v42  ;;  %3567 = vmatpush3.msra.mxu0 %v6243_v42  ;;  %v3234_v11 = vpop.f32.mrf.mxu0  ;;  %v1188_v49 = vsel %vm921_vm14, %v1179_v31, 0.0 }
 0x3d5   : > { %3537 = vmatprep.subr.mxu1 %v6243_v42  ;;  %3568 = vmatprep.subr.mxu0 %v6243_v42  ;;  %v1190_v38 = vadd.f32 %v1189_v52, %v1188_v49  ;;  %v1101_v8 = vsel %vm921_vm14, %v3234_v11, 0.0  ;;  %v2072_v52 = vmax.f32 %v2070_v63, %v5497_v9  ;;  %v2195_v49 = vsub.f32 %v4927_v37, %v2193_v53 }
 0x3d6   : > { %3538 = vmatpush3.msra.mxu1 %v6243_v42  ;;  %3569 = vmatpush3.msra.mxu0 %v6243_v42  ;;  %v1091_v45 = vpop.f32.mrf.mxu0  ;;  %v2135_v9 = vmax.f32 %v2133_v27, 0.0  ;;  %v2075_v37 = vmax.f32 %v2073_v48, 0.0 }
 0x3d7   : > { %3539 = vmatprep.subr.mxu1 %v6243_v42  ;;  %3570 = vmatprep.subr.mxu0 %v6243_v42  ;;  %v1100_v30 = vsel %vm921_vm14, %v1091_v45, 0.0  ;;  %v2197_v61 = vmax.f32 %v2195_v49, 0.0 }
 0x3d8   : > { %3540 = vmatpush3.msra.mxu1 %v6243_v42  ;;  %1191 = vadd.xlane.f32.xlu1 %v1190_v38  ;;  %v1102_v43 = vadd.f32 %v1101_v8, %v1100_v30  ;;  %v2194_v38 = vmax.f32 %v2192_v50, %v5558_v2  ;;  %v2134_v30 = vsub.f32 %v6263_v25, %v2132_v20 }
 0x3d9   : > { %3541 = vmatprep.subr.mxu1 %v6243_v42  ;;  %3571 = vmatpush3.msra.mxu0 %v6243_v42  ;;  %v2074_v2 = vsub.f32 %v6274_v35, %v2072_v52  ;;  %v2137_v24 = vmax.f32 %v2075_v37, %v2135_v9 }
 0x3da   : > { %3542 = vmatpush3.msra.mxu1 %v6243_v42  ;;  %3572 = vmatprep.subr.mxu0 %v6243_v42  ;;  %v2196_v5 = vsub.f32 %v4924_v32, %v2194_v38  ;;  %v2136_v17 = vmax.f32 %v2134_v30, 0.0 }
 0x3db   : > { %3543 = vmatprep.subr.mxu1 %v6243_v42  ;;  %1103 = vadd.xlane.f32.xlu0 %v1102_v43  ;;  %v2076_v4 = vmax.f32 %v2074_v2, 0.0  ;;  %v2199_v22 = vmax.f32 %v2137_v24, %v2197_v61 }
 0x3dc   : > { %3544 = vmatpush3.msra.mxu1 %v6243_v42  ;;  %3573 = vmatpush3.msra.mxu0 %v6243_v42  ;;  %v2198_v32 = vmax.f32 %v2196_v5, 0.0 }
 0x3dd   : > { %3545 = vmatprep.subr.mxu1 %v6243_v42  ;;  %3574 = vmatprep.subr.mxu0 %v6243_v42 }
 0x3de   : > { %3546 = vmatpush3.msra.mxu1 %v6243_v42  ;;  %3575 = vmatpush3.msra.mxu0 %v6243_v42 }
 0x3df   : > { %3548 = vmatmul.mubr.msk.f32.vlgmr.msra.gmra.mxu1 %vm2004_vm13, %v6243_v42  ;;  %3585 = vmatprep.subr.mxu1 %v6243_v42 }
 0x3e0   : > { %3586 = vmatpush3.msra.mxu1 %v6243_v42  ;;  %3576 = vmatprep.subr.mxu0 %v6243_v42 }
 0x3e1   : > { %3587 = vmatprep.subr.mxu1 %v6243_v42  ;;  %3577 = vmatpush3.msra.mxu0 %v6243_v42 }
 0x3e2   : > { %3588 = vmatpush3.msra.mxu1 %v6243_v42  ;;  %3578 = vmatprep.subr.mxu0 %v6243_v42 }
 0x3e3   : > { %3589 = vmatprep.subr.mxu1 %v6243_v42  ;;  %3579 = vmatpush3.msra.mxu0 %v6243_v42 }
 0x3e4   : > { %3590 = vmatpush3.msra.mxu1 %v6243_v42  ;;  %3580 = vmatprep.subr.mxu0 %v6243_v42 }
 0x3e5   : > { %3591 = vmatprep.subr.mxu1 %v6243_v42  ;;  %3581 = vmatpush3.msra.mxu0 %v6243_v42 }
 0x3e6   : > { %3592 = vmatpush3.msra.mxu1 %v6243_v42  ;;  %3620 = vmatprep.subr.mxu0 %v6243_v42 }
 0x3e7   : > { %3593 = vmatprep.subr.mxu1 %v6243_v42 }
 0x3e8   : > { %3594 = vmatpush3.msra.mxu1 %v6243_v42 }
 0x3e9   : > { %3595 = vmatprep.subr.mxu1 %v6243_v42 }
 0x3ea   : > { %3596 = vmatpush3.msra.mxu1 %v6243_v42 }
 0x3eb   : > { %3597 = vmatprep.subr.mxu1 %v6243_v42 }
 0x3ec   : > { %3598 = vmatpush3.msra.mxu1 %v6243_v42 }
 0x3ed   : > { %3599 = vmatprep.subr.mxu1 %v6243_v42 }
 0x3ee   : > { %3600 = vmatpush3.msra.mxu1 %v6243_v42 }
 0x3ef   : > { %3601 = vmatprep.subr.mxu1 %v6243_v42 }
 0x3f0   : > { %3602 = vmatpush3.msra.mxu1 %v6243_v42 }
 0x3f1   : > { %3603 = vmatprep.subr.mxu1 %v6243_v42 }
 0x3f2   : > { %3604 = vmatpush3.msra.mxu1 %v6243_v42 }
 0x3f3   : > { %3605 = vmatprep.subr.mxu1 %v6243_v42 }
 0x3f4   : > { %3606 = vmatpush3.msra.mxu1 %v6243_v42  ;;  %v3304_v36 = vpop.f32.mrf.mxu0 }
 0x3f5   : > { %v2248_v31 = vpop.permute.xlu0 %2247  ;;  %3607 = vmatprep.subr.mxu1 %v6243_v42  ;;  %v2242_v28 = vpop.permute.xlu1 %2241  ;;  %v1279_v45 = vsel %vm921_vm14, %v3304_v36, 0.0 }
 0x3f6   : > { %v2251_v11 = vmin.f32 %v2248_v31, %v6222_v16  ;;  %3608 = vmatpush3.msra.mxu1 %v6243_v42  ;;  %v1269_v60 = vpop.f32.mrf.mxu0  ;;  %v2245_v51 = vmin.f32 %v2242_v28, %v6221_v41 }
 0x3f7   : > { %3609 = vmatprep.subr.mxu1 %v6243_v42  ;;  %v1278_v8 = vsel %vm921_vm14, %v1269_v60, 0.0 }
 0x3f8   : > { %3610 = vmatpush3.msra.mxu1 %v6243_v42  ;;  %v1280_v43 = vadd.f32 %v1279_v45, %v1278_v8  ;;  %v2253_v13 = vmax.f32 %v2245_v51, %v2251_v11 }
 0x3f9   : > { %v2250_v44 = vpop.permute.xlu0 %2249  ;;  %3611 = vmatprep.subr.mxu1 %v6243_v42  ;;  %v2244_v39 = vpop.permute.xlu1 %2243 }
 0x3fa   : > { %v2252_v0 = vmin.f32 %v2250_v44, %v6222_v16  ;;  %3612 = vmatpush3.msra.mxu1 %v6243_v42  ;;  %v2255_v55 = vmax.f32 %v2253_v13, %v5710_v33  ;;  %1281 = vadd.xlane.f32.xlu0 %v1280_v43  ;;  %v2246_v25 = vmin.f32 %v2244_v39, %v6221_v41 }
 0x3fb   : > { %3613 = vmatprep.subr.mxu1 %v6243_v42  ;;  %v2138_v41 = vmax.f32 %v2076_v4, %v2136_v17 }
 0x3fc   : > { %3614 = vmatpush3.msra.mxu1 %v6243_v42  ;;  %v2254_v15 = vmax.f32 %v2246_v25, %v2252_v0  ;;  %v2257_v16 = vsub.f32 %v5255_v12, %v2255_v55 }
 0x3fd   : > { %3615 = vmatprep.subr.mxu1 %v6243_v42  ;;  %v2200_v26 = vmax.f32 %v2138_v41, %v2198_v32 }
 0x3fe   : > { %3616 = vmatpush3.msra.mxu1 %v6243_v42  ;;  %v2256_v33 = vmax.f32 %v2254_v15, %v5718_v18  ;;  %v2259_v47 = vmax.f32 %v2257_v16, 0.0 }
 0x400   : > { %v2258_v10 = vsub.f32 %v5252_v54, %v2256_v33  ;;  %v2261_v57 = vmax.f32 %v2199_v22, %v2259_v47  ;;  %v2619_v54 = vmul.f32 %v6273_v56, %v5522_v46 }
 0x402   : > { %v2260_v7 = vmax.f32 %v2258_v10, 0.0  ;;  %v3339_v21 = vpop.f32.mrf.mxu1  ;;  %3617 = vmatprep.mubr.f32.mxu1 %v2261_v57  ;;  %v2441_v12 = vmul.f32 %v5751_v29, %v2261_v57 }
 0x403   : > { %v1632_v6 = vsel %vm921_vm14, %v3339_v21, 0.0 }
 0x404   : > { %v1622_v34 = vpop.f32.mrf.mxu1  ;;  %3582 = vmatprep.mubr.f32.mxu0 %v2441_v12  ;;  %v2262_v19 = vmax.f32 %v2200_v26, %v2260_v7 }
 0x405   : > { %v1631_v14 = vsel %vm921_vm14, %v1622_v34, 0.0 }
 0x406   : > { %v1633_v18 = vadd.f32 %v1632_v6, %v1631_v14  ;;  %3618 = vmatmul.mubr.f32.vlgmr.msra.gmra.mxu1 %v2262_v19  ;;  %v2442_v23 = vmul.f32 %v5582_v59, %v2262_v19 }
 0x408   : > { %1634 = vadd.xlane.f32.xlu1 %v1633_v18  ;;  %3583 = vmatmul.mubr.f32.vlgmr.msra.gmra.mxu0 %v2442_v23 }
 0x409   : > { %3621 = vmatpush3.msra.mxu0 %v6243_v42  ;;  %3652 = vmatprep.mubr.f32.mxu0 %v2619_v54 }
 0x40a   : > { %3622 = vmatprep.subr.mxu0 %v6243_v42 }
 0x40b   : > { %3623 = vmatpush3.msra.mxu0 %v6243_v42 }
 0x40c   : > { %3624 = vmatprep.subr.mxu0 %v6243_v42 }
 0x40d   : > { %3625 = vmatpush3.msra.mxu0 %v6243_v42 }
 0x40e   : > { %3626 = vmatprep.subr.mxu0 %v6243_v42 }
 0x40f   : > { %3627 = vmatpush3.msra.mxu0 %v6243_v42 }
 0x410   : > { %3628 = vmatprep.subr.mxu0 %v6243_v42 }
 0x411   : > { %3629 = vmatpush3.msra.mxu0 %v6243_v42 }
 0x412   : > { %3630 = vmatprep.subr.mxu0 %v6243_v42 }
 0x413   : > { %3631 = vmatpush3.msra.mxu0 %v6243_v42 }
 0x414   : > { %3632 = vmatprep.subr.mxu0 %v6243_v42 }
 0x415   : > { %3633 = vmatpush3.msra.mxu0 %v6243_v42 }
 0x416   : > { %3634 = vmatprep.subr.mxu0 %v6243_v42 }
 0x417   : > { %3635 = vmatpush3.msra.mxu0 %v6243_v42  ;;  %v3374_v46 = vpop.f32.mrf.mxu0 }
 0x418   : > { %3636 = vmatprep.subr.mxu0 %v6243_v42  ;;  %v1720_v59 = vsel %vm921_vm14, %v3374_v46, 0.0 }
 0x419   : > { %3637 = vmatpush3.msra.mxu0 %v6243_v42  ;;  %v1710_v29 = vpop.f32.mrf.mxu0 }
 0x41a   : > { %3638 = vmatprep.subr.mxu0 %v6243_v42  ;;  %v1719_v56 = vsel %vm921_vm14, %v1710_v29, 0.0 }
 0x41b   : > { %3639 = vmatpush3.msra.mxu0 %v6243_v42  ;;  %v1721_v62 = vadd.f32 %v1720_v59, %v1719_v56 }
 0x41c   : > { %3640 = vmatprep.subr.mxu0 %v6243_v42 }
 0x41d   : > { %3641 = vmatpush3.msra.mxu0 %v6243_v42  ;;  %1722 = vadd.xlane.f32.xlu0 %v1721_v62 }
 0x41e   : > { %3642 = vmatprep.subr.mxu0 %v6243_v42 }
 0x41f   : > { %3643 = vmatpush3.msra.mxu0 %v6243_v42 }
 0x420   : > { %3644 = vmatprep.subr.mxu0 %v6243_v42 }
 0x421   : > { %3645 = vmatpush3.msra.mxu0 %v6243_v42 }
 0x422   : > { %3646 = vmatprep.subr.mxu0 %v6243_v42 }
 0x423   : > { %3647 = vmatpush3.msra.mxu0 %v6243_v42 }
 0x424   : > { %3648 = vmatprep.subr.mxu0 %v6243_v42 }
 0x425   : > { %3649 = vmatpush3.msra.mxu0 %v6243_v42 }
 0x426   : > { %3650 = vmatprep.subr.mxu0 %v6243_v42 }
 0x427   : > { %3651 = vmatpush3.msra.mxu0 %v6243_v42 }
 0x428   : > { %3653 = vmatmul.mubr.f32.vlgmr.msra.gmra.mxu0 %v2620_v1 }
 0x449   : > { %v926_v3 = vpop.xlane.xlu1 %925 }
 0x44a   : > { %v927_v58 = vrot.slane %v926_v3, 4  ;;  %v1014_v63 = vpop.xlane.xlu0 %1013 }
 0x44b   : > { %v1015_v53 = vrot.slane %v1014_v63, 4 }
 0x44c   : > { %v928_v50 = vadd.f32 %v927_v58, %v926_v3 }
 0x44d   : > { %v1016_v27 = vadd.f32 %v1015_v53, %v1014_v63 }
 0x44e   : > { %v929_v20 = vrot.slane %v928_v50, 2 }
 0x44f   : > { %v1017_v36 = vrot.slane %v1016_v27, 2 }
 0x450   : > { %v930_v31 = vadd.f32 %v929_v20, %v928_v50 }
 0x451   : > { %v1018_v48 = vadd.f32 %v1017_v36, %v1016_v27 }
 0x452   : > { %v931_v52 = vrot.slane %v930_v31, 1 }
 0x453   : > { %v1019_v11 = vrot.slane %v1018_v48, 1 }
 0x454   : > { %v932_v28 = vadd.f32 %v931_v52, %v930_v31 }
 0x455   : > { %v1020_v49 = vadd.f32 %v1019_v11, %v1018_v48 }
 0x456   : > { %3655 = vpush %v932_v28 }
 0x457   : > { %3657 = vpush %v1020_v49 }
 0x45d   : > { %v3444_v40 = vpop.f32.mrf.mxu0 }
 0x45e   : > { %v1898_v38 = vsel %vm921_vm14, %v3444_v40, 0.0 }
 0x45f   : > { %v3409_v35 = vpop.f32.mrf.mxu1  ;;  %v1888_v42 = vpop.f32.mrf.mxu0 }
 0x460   : > { %v1897_v60 = vsel %vm921_vm14, %v1888_v42, 0.0  ;;  %v1810_v9 = vsel %vm921_vm14, %v3409_v35, 0.0 }
 0x461   : > { %v1899_v51 = vadd.f32 %v1898_v38, %v1897_v60  ;;  %v1800_v45 = vpop.f32.mrf.mxu1  ;;  %v1192_v8 = vpop.xlane.xlu1 %1191 }
 0x462   : > { %v1809_v30 = vsel %vm921_vm14, %v1800_v45, 0.0  ;;  %v1193_v43 = vrot.slane %v1192_v8, 4 }
 0x463   : > { %v1811_v13 = vadd.f32 %v1810_v9, %v1809_v30  ;;  %1900 = vadd.xlane.f32.xlu0 %v1899_v51 }
 0x464   : > { %v1194_v44 = vadd.f32 %v1193_v43, %v1192_v8  ;;  %v1104_v37 = vpop.xlane.xlu0 %1103 }
 0x465   : > { %v1105_v2 = vrot.slane %v1104_v37, 4  ;;  %1812 = vadd.xlane.f32.xlu1 %v1811_v13 }
 0x466   : > { %v1195_v0 = vrot.slane %v1194_v44, 2 }
 0x467   : > { %v1106_v39 = vadd.f32 %v1105_v2, %v1104_v37 }
 0x468   : > { %v1196_v61 = vadd.f32 %v1195_v0, %v1194_v44 }
 0x469   : > { %v1107_v5 = vrot.slane %v1106_v39, 2 }
 0x46a   : > { %v1197_v25 = vrot.slane %v1196_v61, 1 }
 0x46b   : > { %v1108_v55 = vadd.f32 %v1107_v5, %v1106_v39 }
 0x46c   : > { %v1198_v24 = vadd.f32 %v1197_v25, %v1196_v61 }
 0x46d   : > { %v1109_v17 = vrot.slane %v1108_v55, 1 }
 0x46f   : > { %v1110_v15 = vadd.f32 %v1109_v17, %v1108_v55 }
 0x471   : > { %3659 = vpush %v1110_v15 }
 0x472   : > { %3661 = vpush %v1198_v24 }
 0x47e   : > { %v3514_v16 = vpop.f32.mrf.mxu0 }
 0x47f   : > { %v3479_v4 = vpop.f32.mrf.mxu1  ;;  %v2341_v32 = vsel %vm921_vm14, %v3514_v16, 0.0 }
 0x480   : > { %v2331_v33 = vpop.f32.mrf.mxu0  ;;  %v1988_v41 = vsel %vm921_vm14, %v3479_v4, 0.0 }
 0x481   : > { %v1978_v22 = vpop.f32.mrf.mxu1  ;;  %v2340_v47 = vsel %vm921_vm14, %v2331_v33, 0.0 }
 0x482   : > { %v1987_v10 = vsel %vm921_vm14, %v1978_v22, 0.0  ;;  %v2342_v57 = vadd.f32 %v2341_v32, %v2340_v47 }
 0x483   : > { %v1989_v26 = vadd.f32 %v1988_v41, %v1987_v10  ;;  %v1282_v7 = vpop.xlane.xlu0 %1281 }
 0x484   : > { %2343 = vadd.xlane.f32.xlu0 %v2342_v57  ;;  %v1283_v21 = vrot.slane %v1282_v7, 4 }
 0x485   : > { %1990 = vadd.xlane.f32.xlu1 %v1989_v26 }
 0x486   : > { %v1284_v12 = vadd.f32 %v1283_v21, %v1282_v7 }
 0x487   : > { %s3656_s20 = spop %3655 }
 0x488   : > { %v1285_v6 = vrot.slane %v1284_v12, 2  ;;  %s3658_s23 = spop %3657 }
 0x48a   : > { %v1286_v34 = vadd.f32 %v1285_v6, %v1284_v12 }
 0x48c   : > { %v1287_v19 = vrot.slane %v1286_v34, 1 }
 0x48e   : > { %v1288_v14 = vadd.f32 %v1287_v19, %v1286_v34 }
 0x490   : > { %3663 = vpush %v1288_v14 }
 0x491   : > { %v1635_v18 = vpop.xlane.xlu1 %1634 }
 0x492   : > { %v1636_v23 = vrot.slane %v1635_v18, 4 }
 0x494   : > { %v1637_v54 = vadd.f32 %v1636_v23, %v1635_v18 }
 0x496   : > { %v1638_v46 = vrot.slane %v1637_v54, 2 }
 0x498   : > { %v1639_v59 = vadd.f32 %v1638_v46, %v1637_v54 }
 0x49a   : > { %v1640_v29 = vrot.slane %v1639_v59, 1 }
 0x49c   : > { %v1641_v56 = vadd.f32 %v1640_v29, %v1639_v59 }
 0x49e   : > { %3665 = vpush %v1641_v56 }
 0x49f   : > { %v3549_v62 = vpop.f32.mrf.mxu1 }
 0x4a0   : > { %v2429_v1 = vsel %vm921_vm14, %v3549_v62, 0.0 }
 0x4a1   : > { %v2419_v3 = vpop.f32.mrf.mxu1 }
 0x4a2   : > { %v2428_v58 = vsel %vm921_vm14, %v2419_v3, 0.0  ;;  %s3660_s30 = spop %3659 }
 0x4a3   : > { %v2430_v63 = vadd.f32 %v2429_v1, %v2428_v58  ;;  %s3662_s4 = spop %3661 }
 0x4a5   : > { %2431 = vadd.xlane.f32.xlu1 %v2430_v63 }
 0x4a6   : > { %v1723_v53 = vpop.xlane.xlu0 %1722 }
 0x4a7   : > { %v1724_v50 = vrot.slane %v1723_v53, 4 }
 0x4a9   : > { %v1725_v27 = vadd.f32 %v1724_v50, %v1723_v53 }
 0x4ab   : > { %v1726_v20 = vrot.slane %v1725_v27, 2 }
 0x4ad   : > { %v1727_v36 = vadd.f32 %v1726_v20, %v1725_v27 }
 0x4af   : > { %v1728_v31 = vrot.slane %v1727_v36, 1 }
 0x4b1   : > { %v1729_v48 = vadd.f32 %v1728_v31, %v1727_v36 }
 0x4b3   : > { %3667 = vpush %v1729_v48 }
 0x4c1   : > { %s6045_s24 = spop %3663 }
 0x4c6   : > { %v3619_v52 = vpop.f32.mrf.mxu1 }
 0x4c7   : > { %v2607_v49 = vsel %vm921_vm14, %v3619_v52, 0.0 }
 0x4c8   : > { %v3584_v11 = vpop.f32.mrf.mxu0  ;;  %v2597_v28 = vpop.f32.mrf.mxu1 }
 0x4c9   : > { %v2606_v40 = vsel %vm921_vm14, %v2597_v28, 0.0  ;;  %v2519_v38 = vsel %vm921_vm14, %v3584_v11, 0.0 }
 0x4ca   : > { %v2608_v35 = vadd.f32 %v2607_v49, %v2606_v40  ;;  %v2509_v42 = vpop.f32.mrf.mxu0 }
 0x4cb   : > { %v2518_v60 = vsel %vm921_vm14, %v2509_v42, 0.0 }
 0x4cc   : > { %v2520_v51 = vadd.f32 %v2519_v38, %v2518_v60  ;;  %2609 = vadd.xlane.f32.xlu1 %v2608_v35  ;;  %v6277_v38 = vld [vmem:[#allocation8_spill] sm:$0xff] }
 0x4cd   : > { %vm2709_vm15 = vcmp.eq.s32.totalorder %v6277_v38, 0  ;;  %vm2712_vm0 = vcmp.eq.s32.totalorder %v6277_v38, 1  ;;  %vm2715_vm1 = vcmp.eq.s32.totalorder %v6277_v38, 2  ;;  %vm2718_vm2 = vcmp.eq.s32.totalorder %v6277_v38, 3 }
 0x4ce   : > { %2521 = vadd.xlane.f32.xlu0 %v2520_v51  ;;  %vm2721_vm3 = vcmp.eq.s32.totalorder %v6277_v38, 4 }
 0x4cf   : > { %s3666_s12 = spop %3665 }
 0x4d0   : > { %s1643_s19 = sadd.f32 %s3666_s12, %s3656_s20  ;;  %s2825_s20 = sshll.u32 %s6283_s13, 3 }
 0x4e4   : > { %s3668_s28 = spop %3667 }
 0x4e5   : > { %s1731_s9 = sadd.f32 %s3668_s28, %s3658_s23  ;;  %s201_s28 = scalar_lea.vmem %s6076_s2, %s2825_s20 }
 0x4e8   : > { %v3654_v45 = vpop.f32.mrf.mxu0 }
 0x4e9   : > { %v2697_v9 = vsel %vm921_vm14, %v3654_v45, 0.0 }
 0x4ea   : > { %v2687_v8 = vpop.f32.mrf.mxu0 }
 0x4eb   : > { %v2696_v30 = vsel %vm921_vm14, %v2687_v8, 0.0 }
 0x4ec   : > { %v1901_v43 = vpop.xlane.xlu0 %1900  ;;  %v2698_v13 = vadd.f32 %v2697_v9, %v2696_v30 }
 0x4ed   : > { %v1902_v44 = vrot.slane %v1901_v43, 4 }
 0x4ee   : > { %v1813_v37 = vpop.xlane.xlu1 %1812  ;;  %2699 = vadd.xlane.f32.xlu0 %v2698_v13 }
 0x4ef   : > { %v1903_v2 = vadd.f32 %v1902_v44, %v1901_v43  ;;  %v1814_v0 = vrot.slane %v1813_v37, 4 }
 0x4f1   : > { %v1904_v39 = vrot.slane %v1903_v2, 2  ;;  %v1815_v61 = vadd.f32 %v1814_v0, %v1813_v37 }
 0x4f3   : > { %v1816_v5 = vrot.slane %v1815_v61, 2  ;;  %v1905_v55 = vadd.f32 %v1904_v39, %v1903_v2 }
 0x4f5   : > { %v1817_v25 = vadd.f32 %v1816_v5, %v1815_v61  ;;  %v1906_v17 = vrot.slane %v1905_v55, 1 }
 0x4f7   : > { %v1818_v15 = vrot.slane %v1817_v25, 1  ;;  %v1907_v16 = vadd.f32 %v1906_v17, %v1905_v55 }
 0x4f9   : > { %v1819_v24 = vadd.f32 %v1818_v15, %v1817_v25 }
 0x4fb   : > { %3669 = vpush %v1819_v24 }
 0x4fc   : > { %3671 = vpush %v1907_v16 }
 0x50d   : > { %v2344_v4 = vpop.xlane.xlu0 %2343 }
 0x50e   : > { %v2345_v32 = vrot.slane %v2344_v4, 4  ;;  %v1991_v33 = vpop.xlane.xlu1 %1990 }
 0x50f   : > { %v1992_v22 = vrot.slane %v1991_v33, 4 }
 0x510   : > { %v2346_v47 = vadd.f32 %v2345_v32, %v2344_v4 }
 0x511   : > { %v1993_v41 = vadd.f32 %v1992_v22, %v1991_v33 }
 0x512   : > { %v2347_v10 = vrot.slane %v2346_v47, 2 }
 0x513   : > { %v1994_v57 = vrot.slane %v1993_v41, 2 }
 0x514   : > { %v2348_v26 = vadd.f32 %v2347_v10, %v2346_v47 }
 0x515   : > { %v1995_v7 = vadd.f32 %v1994_v57, %v1993_v41 }
 0x516   : > { %v2349_v21 = vrot.slane %v2348_v26, 1 }
 0x517   : > { %v1996_v12 = vrot.slane %v1995_v7, 1 }
 0x518   : > { %v2350_v6 = vadd.f32 %v2349_v21, %v2348_v26 }
 0x519   : > { %v1997_v34 = vadd.f32 %v1996_v12, %v1995_v7 }
 0x51b   : > { %3673 = vpush %v1997_v34 }
 0x51c   : > { %3675 = vpush %v2350_v6 }
 0x52c   : > { %s3670_s5 = spop %3669 }
 0x52d   : > { %s3672_s6 = spop %3671  ;;  %s1821_s21 = sadd.f32 %s3670_s5, %s3660_s30 }
 0x52e   : > { %v2432_v19 = vpop.xlane.xlu1 %2431  ;;  %s1909_s26 = sadd.f32 %s3672_s6, %s3662_s4 }
 0x52f   : > { %v2433_v14 = vrot.slane %v2432_v19, 4 }
 0x531   : > { %v2434_v18 = vadd.f32 %v2433_v14, %v2432_v19 }
 0x533   : > { %v2435_v23 = vrot.slane %v2434_v18, 2 }
 0x535   : > { %v2436_v54 = vadd.f32 %v2435_v23, %v2434_v18 }
 0x537   : > { %v2437_v46 = vrot.slane %v2436_v54, 1 }
 0x539   : > { %v2438_v59 = vadd.f32 %v2437_v46, %v2436_v54 }
 0x53b   : > { %3677 = vpush %v2438_v59 }
 0x54c   : > { %s6047_s7 = spop %3673 }
 0x54d   : > { %s3676_s8 = spop %3675  ;;  %s1999_s18 = sadd.f32 %s6047_s7, %s6045_s24 }
 0x54e   : > { %s2352_s25 = sadd.f32 %s3676_s8, %s1643_s19 }
 0x550   : > { %v2710_v60 = vstv %s2352_s25 }
 0x551   : > { %v2711_v8 = vsel %vm2709_vm15, %v2710_v60, 0.0 }
 0x555   : > { %v2610_v29 = vpop.xlane.xlu1 %2609 }
 0x556   : > { %v2611_v56 = vrot.slane %v2610_v29, 4 }
 0x557   : > { %v2522_v62 = vpop.xlane.xlu0 %2521 }
 0x558   : > { %v2612_v1 = vadd.f32 %v2611_v56, %v2610_v29  ;;  %v2523_v3 = vrot.slane %v2522_v62, 4 }
 0x55a   : > { %v2613_v58 = vrot.slane %v2612_v1, 2  ;;  %v2524_v63 = vadd.f32 %v2523_v3, %v2522_v62 }
 0x55c   : > { %v2614_v53 = vadd.f32 %v2613_v58, %v2612_v1  ;;  %v2525_v50 = vrot.slane %v2524_v63, 2 }
 0x55e   : > { %v2526_v27 = vadd.f32 %v2525_v50, %v2524_v63  ;;  %v2615_v20 = vrot.slane %v2614_v53, 1 }
 0x560   : > { %v2527_v36 = vrot.slane %v2526_v27, 1  ;;  %v2616_v48 = vadd.f32 %v2615_v20, %v2614_v53 }
 0x562   : > { %v2528_v31 = vadd.f32 %v2527_v36, %v2526_v27 }
 0x564   : > { %3679 = vpush %v2528_v31 }
 0x565   : > { %3681 = vpush %v2616_v48 }
 0x56c   : > { %s3678_s15 = spop %3677 }
 0x56d   : > { %s2440_s29 = sadd.f32 %s3678_s15, %s1731_s9 }
 0x56f   : > { %v2713_v51 = vstv %s2440_s29 }
 0x570   : > { %v2714_v9 = vsel %vm2712_vm0, %v2713_v51, %v2711_v8 }
 0x577   : > { %v2700_v52 = vpop.xlane.xlu0 %2699 }
 0x578   : > { %v2701_v11 = vrot.slane %v2700_v52, 4 }
 0x57a   : > { %v2702_v28 = vadd.f32 %v2701_v11, %v2700_v52 }
 0x57c   : > { %v2703_v49 = vrot.slane %v2702_v28, 2 }
 0x57e   : > { %v2704_v40 = vadd.f32 %v2703_v49, %v2702_v28 }
 0x580   : > { %v2705_v35 = vrot.slane %v2704_v40, 1 }
 0x582   : > { %v2706_v42 = vadd.f32 %v2705_v35, %v2704_v40 }
 0x584   : > { %3683 = vpush %v2706_v42 }
 0x595   : > { %s3680_s22 = spop %3679 }
 0x596   : > { %s2530_s27 = sadd.f32 %s3680_s22, %s1821_s21  ;;  %s3682_s3 = spop %3681 }
 0x597   : > { %s2618_s16 = sadd.f32 %s3682_s3, %s1909_s26 }
 0x598   : > { %v2716_v45 = vstv %s2530_s27 }
 0x599   : > { %v2717_v30 = vsel %vm2715_vm1, %v2716_v45, %v2714_v9  ;;  %v2719_v43 = vstv %s2618_s16 }
 0x59a   : > { %v2720_v13 = vsel %vm2718_vm2, %v2719_v43, %v2717_v30 }
 0x5b5   : > { %s3684_s23 = spop %3683 }
 0x5b6   : > { %s2708_s30 = sadd.f32 %s3684_s23, %s1999_s18 }
 0x5b8   : > { %v2722_v44 = vstv %s2708_s30 }
 0x5b9   : > { %v2723_v37 = vsel %vm2721_vm3, %v2722_v44, %v2720_v13 }
 0x5ba   : > { %2724 = vst [vmem:[%s201_s28] sm:$0xff] %v2723_v37 }
 0x5bb PF: > { %p15_p11 = scmp.ge.s32.totalorder %s4014_s14, 4   ;;  %s6278_s9 = smov %s3958_s10 }
 0x5bc   : > { %s6279_s10 = smov %s3962_s11  ;;  %s6280_s11 = smov %s4024_s17 }
 0x5bd   : > { %s6281_s12 = smov %s4014_s14  ;;  %17 = sbr.rel (!%p15_p11) target bundleno = 5 (0x5), region = 84 }
 0x5c2   :  { %2744 = vsyncpa [#allocation3], 1 }
 0x5c3   :  { %2746 = vsyncpa [#allocation3 + $0x1], 1 }
 0x5c4   :  { %2747 = vsyncpa [#allocation5], 1 }
 0x5c5   :  { %2749 = vsyncpa [#allocation5 + $0x1], 1 }

</bundles_post_ra>
